<compile_context>
chip_gen: v7x
topology: tpu7x:2x2x1
jax: 0.10.0
libtpu: 0.0.40
codegen_flags: <defaults>
</compile_context>

<pallas_src>
import functools

import jax
import jax.numpy as jnp
from jax.experimental import pallas as pl
from jax.experimental.pallas import tpu as pltpu

# ---------------- sizes (small, structurally faithful to the module) ---------
B = 2             # batch
BP = 8            # batch padded to the f32 sublane tile
T = 8             # max question length
VOCAB = 50        # vocab_size
E = 64            # embedding_dimensions          (300 in the original)
Q = 128           # question_feature_size / LSTM hidden (1024 in the original)
C = 64            # constants.img_features_size
COMMON = 128      # common_feature_size           (512 in the original)
G = 2             # n_glimpses
IMG_H = IMG_W = 8
HW = IMG_H * IMG_W
HID = 128         # classifier hidden             (1024 in the original)
OUT = 256         # output_features_size          (3000 in the original)
FEAT = G * C + Q  # classifier input size (= 256)

# rows of the packed bias operand (width 4*Q = 512, zero-padded)
_B_LSTM, _B_CONV1, _B_LINQ, _B_CONV2, _B_LIN1, _B_LIN2 = range(6)


# --------------------------- Fused forward kernel ----------------------------
def fused_network_kernel(x_rev_ref, mask_ref, wih_ref, whh_ref, img_ref,
                         wc_ref, wl_ref, w2_ref, w1_ref, w3_ref, bias_ref,
                         answer_ref, prob_ref, xg_ref):
    f32 = jnp.float32
    bf16 = jnp.bfloat16

    # ---------- Question model: reverse-direction LSTM over packed seq -------
    # Hoisted input projection for all timesteps -> VMEM scratch, so per-step
    # gate slices are aligned (BP, 4Q) VMEM loads with bounded live ranges.
    xg_ref[...] = (jnp.dot(x_rev_ref[...], wih_ref[...],
                           preferred_element_type=f32)
                   + bias_ref[_B_LSTM:_B_LSTM + 1, :])            # (T*BP, 4Q)

    h = jnp.zeros((BP, Q), f32)
    c = jnp.zeros((BP, Q), f32)
    for t in range(T):  # static unroll; whh / xg re-read from VMEM each step
        gates = xg_ref[t * BP:(t + 1) * BP, :] + jnp.dot(
            h.astype(bf16), whh_ref[...], preferred_element_type=f32)
        i_g = jax.nn.sigmoid(gates[:, 0 * Q:1 * Q])
        f_g = jax.nn.sigmoid(gates[:, 1 * Q:2 * Q])
        g_g = jnp.tanh(gates[:, 2 * Q:3 * Q])
        o_g = jax.nn.sigmoid(gates[:, 3 * Q:4 * Q])
        c_new = f_g * c + i_g * g_g
        h_new = o_g * jnp.tanh(c_new)
        m = mask_ref[t * BP:(t + 1) * BP, :]     # (BP, 1): 1 while t < len[b]
        c = m * c_new + (1.0 - m) * c
        h = m * h_new + (1.0 - m) * h
    q_enc = c           # == final_cell_state[-1]; (BP, Q), pad rows are zero

    # ---------- Attention (L2 channel norm + 1x1 convs + pixel softmax) ------
    img = img_ref[...]                                            # (B*HW, C)
    img_n = img * jax.lax.rsqrt(
        jnp.sum(img * img, axis=-1, keepdims=True) + 1e-8)

    img_f = (jnp.dot(img_n.astype(bf16), wc_ref[...],
                     preferred_element_type=f32)
             + bias_ref[_B_CONV1:_B_CONV1 + 1, :COMMON])          # (B*HW, COMMON)
    q_f = (jnp.dot(q_enc.astype(bf16), wl_ref[...],
                   preferred_element_type=f32)
           + bias_ref[_B_LINQ:_B_LINQ + 1, :COMMON])              # (BP, COMMON)

    att = jnp.maximum(img_f.reshape(B, HW, COMMON) + q_f[:B][:, None, :], 0.0)
    logits = (jnp.dot(att.reshape(B * HW, COMMON), w2_ref[...],
                      preferred_element_type=f32)
              + bias_ref[_B_CONV2:_B_CONV2 + 1, :G])              # (B*HW, G)
    logits = jnp.transpose(logits.reshape(B, HW, G), (0, 2, 1))   # (B, G, HW)
    mx = jnp.max(logits, axis=-1, keepdims=True)
    ex = jnp.exp(logits - mx)
    prob = ex / jnp.sum(ex, axis=-1, keepdims=True)  # softmax over pixels
    prob_ref[...] = prob                             # lane-dense (B, G, HW)

    # glimpse-weighted means over pixels (uses the *normalized* features,
    # exactly as the PyTorch module does)
    wm = jnp.einsum('bgp,bpc->bgc', prob, img_n.reshape(B, HW, C),
                    preferred_element_type=f32)                   # (B, G, C)

    # ---------- Classifier: K-split of lin1 replaces the lane concatenate ----
    h1 = jnp.dot(q_enc[:B].astype(bf16), w1_ref[G * C:, :],
                 preferred_element_type=f32)
    for g in range(G):
        h1 = h1 + jnp.dot(wm[:, g, :].astype(bf16),
                          w1_ref[g * C:(g + 1) * C, :],
                          preferred_element_type=f32)
    h1 = jnp.maximum(h1 + bias_ref[_B_LIN1:_B_LIN1 + 1, :HID], 0.0)
    logits2 = (jnp.dot(h1.astype(bf16), w3_ref[...],
                       preferred_element_type=f32)
               + bias_ref[_B_LIN2:_B_LIN2 + 1, :OUT])             # (B, OUT)
    mx2 = jnp.max(logits2, axis=-1, keepdims=True)
    lse = jnp.log(jnp.sum(jnp.exp(logits2 - mx2), axis=-1, keepdims=True)) + mx2
    answer_ref[...] = logits2 - lse                               # log_softmax


def run_network(x_rev, mask, img, p):
    # Single fused call, no grid: every operand is a whole-array VMEM block
    # (total < 1 MiB); only `answer` and `prob` go back to HBM.
    return pl.pallas_call(
        fused_network_kernel,
        out_shape=(jax.ShapeDtypeStruct((B, OUT), jnp.float32),
                   jax.ShapeDtypeStruct((B, G, HW), jnp.float32)),
        scratch_shapes=[pltpu.VMEM((T * BP, 4 * Q), jnp.float32)],
    )(x_rev, mask,
      p["lstm_wih_t"], p["lstm_whh_t"],
      img,
      p["conv1_w"], p["linq_w"], p["conv2_w"],
      p["lin1_w"], p["lin2_w"], p["bias_pack"])


# --------------------------- Full network forward ----------------------------
def network_forward(params, img_features_nchw, ques_indexed, ques_len):
    # Embedding lookup + tanh and the per-sequence reversal are data-dependent
    # gathers; they stay as cheap XLA glue feeding the fused kernel.
    emb = jnp.tanh(params["embedding"][ques_indexed])             # (B, T, E)
    lens = ques_len.astype(jnp.int32)
    # reverse each sequence within its valid length (packed-seq backward dir)
    rev_idx = jnp.clip(lens[:, None] - 1 - jnp.arange(T)[None, :], 0, T - 1)
    x_rev = emb[jnp.arange(B)[:, None], rev_idx, :]               # (B, T, E)
    x_rev = jnp.transpose(x_rev, (1, 0, 2))                       # (T, B, E)
    x_rev = jnp.pad(x_rev, ((0, 0), (0, BP - B), (0, 0)))         # (T, BP, E)
    x_rev = x_rev.reshape(T * BP, E).astype(jnp.bfloat16)         # row = t*BP+b

    mask = (jnp.arange(T)[:, None] < lens[None, :]).astype(jnp.float32)  # (T,B)
    mask = jnp.pad(mask, ((0, 0), (0, BP - B))).reshape(T * BP, 1)

    # image: NCHW -> (B*HW, C) so channels sit on lanes
    img = jnp.transpose(img_features_nchw, (0, 2, 3, 1)).reshape(B * HW, C)

    answer, prob = run_network(x_rev, mask, img, params)
    probs = prob.reshape(B, G, IMG_H, IMG_W)   # already (B, G, HW): reshape only
    return answer, probs


# ------------------------------ Parameter init --------------------------------
def _xavier(key, shape):
    bound = (6.0 / (shape[0] + shape[1])) ** 0.5
    return jax.random.uniform(key, shape, minval=-bound, maxval=bound,
                              dtype=jnp.float32)


def init_params(key):
    ks = jax.random.split(key, 8)
    emb = _xavier(ks[0], (VOCAB, E)).at[0].set(0.0)     # padding_idx=0
    # packed biases, one row each (all zero-initialised like the module):
    #   row 0: lstm (b_ih + b_hh), row 1: conv1, row 2: linq,
    #   row 3: conv2, row 4: lin1, row 5: lin2
    bias_pack = jnp.zeros((8, 4 * Q), jnp.float32)
    return {
        "embedding": emb,
        # reverse-direction LSTM weights, pre-transposed (in, out), bf16 MXU
        "lstm_wih_t": _xavier(ks[1], (E, 4 * Q)).astype(jnp.bfloat16),
        "lstm_whh_t": _xavier(ks[2], (Q, 4 * Q)).astype(jnp.bfloat16),
        # 1x1 convs / linears (xavier weights; biases live in bias_pack)
        "conv1_w": _xavier(ks[3], (C, COMMON)).astype(jnp.bfloat16),
        "linq_w": _xavier(ks[4], (Q, COMMON)).astype(jnp.bfloat16),
        "conv2_w": _xavier(ks[5], (COMMON, G)),                 # tiny, keep f32
        "lin1_w": _xavier(ks[6], (FEAT, HID)).astype(jnp.bfloat16),
        "lin2_w": _xavier(ks[7], (HID, OUT)).astype(jnp.bfloat16),
        "bias_pack": bias_pack,
    }


if __name__ == "__main__":
    root = jax.random.PRNGKey(0)
    k_p, k_img, k_q = jax.random.split(root, 3)
    params = init_params(k_p)

    # Inputs (PyTorch conventions: image features NCHW, padded token ids,
    # lengths sorted descending as required by pack_padded_sequence).
    img_features = jax.random.normal(k_img, (B, C, IMG_H, IMG_W), jnp.float32)
    ques_len = jnp.array([8, 5], dtype=jnp.int32)
    tokens = jax.random.randint(k_q, (B, T), 1, VOCAB, dtype=jnp.int32)
    pad_mask = (jnp.arange(T)[None, :] < ques_len[:, None]).astype(jnp.int32)
    ques_indexed = tokens * pad_mask                               # zero-padded

    fwd = jax.jit(functools.partial(network_forward, params))
    answer, probs = fwd(img_features, ques_indexed, ques_len)
    jax.block_until_ready((answer, probs))

    # sanity checks: softmax over pixels sums to 1, log-softmax is normalised
    assert probs.shape == (B, G, IMG_H, IMG_W)
    assert answer.shape == (B, OUT)
    p_sum = jnp.sum(probs.reshape(B, G, -1), axis=-1)
    a_sum = jnp.sum(jnp.exp(answer), axis=-1)
    assert bool(jnp.all(jnp.abs(p_sum - 1.0) < 1e-4))
    assert bool(jnp.all(jnp.abs(a_sum - 1.0) < 1e-3))

    print("KERNEL_OK")
</pallas_src>

<mosaic_0001>
module attributes {stable_mosaic.version = 11 : i64} {
  func.func @fused_network_kernel(%arg0: memref<64x64xbf16, #tpu.memory_space<vmem>>, %arg1: memref<64x1xf32, #tpu.memory_space<vmem>>, %arg2: memref<64x512xbf16, #tpu.memory_space<vmem>>, %arg3: memref<128x512xbf16, #tpu.memory_space<vmem>>, %arg4: memref<128x64xf32, #tpu.memory_space<vmem>>, %arg5: memref<64x128xbf16, #tpu.memory_space<vmem>>, %arg6: memref<128x128xbf16, #tpu.memory_space<vmem>>, %arg7: memref<128x2xf32, #tpu.memory_space<vmem>>, %arg8: memref<256x128xbf16, #tpu.memory_space<vmem>>, %arg9: memref<128x256xbf16, #tpu.memory_space<vmem>>, %arg10: memref<8x512xf32, #tpu.memory_space<vmem>>, %arg11: memref<2x256xf32, #tpu.memory_space<vmem>>, %arg12: memref<2x2x64xf32, #tpu.memory_space<vmem>>, %arg13: memref<64x512xf32, #tpu.memory_space<vmem>>) attributes {dimension_semantics = [], scalar_prefetch = 0 : i64, scratch_operands = 1 : i64, tpu.core_type = #tpu.core_type<tc>} {
    %c0 = arith.constant 0 : index
    %c0_0 = arith.constant 0 : index
    %0 = vector.load %arg0[%c0, %c0_0] : memref<64x64xbf16, #tpu.memory_space<vmem>>, vector<64x64xbf16>
    %c0_1 = arith.constant 0 : index
    %c0_2 = arith.constant 0 : index
    %1 = vector.load %arg2[%c0_1, %c0_2] : memref<64x512xbf16, #tpu.memory_space<vmem>>, vector<64x512xbf16>
    %cst = arith.constant dense<0.000000e+00> : vector<64x512xf32>
    %2 = tpu.matmul %0, %1, %cst {dimension_numbers = #tpu.dot_dimension_numbers<[1], [0], [0], [1], [0, 0, 1, 1], [], []>} : vector<64x64xbf16>, vector<64x512xbf16>, vector<64x512xf32> -> vector<64x512xf32>
    %c0_3 = arith.constant 0 : index
    %c0_4 = arith.constant 0 : index
    %3 = vector.load %arg10[%c0_3, %c0_4] : memref<8x512xf32, #tpu.memory_space<vmem>>, vector<1x512xf32>
    %4 = vector.broadcast %3 : vector<1x512xf32> to vector<64x512xf32>
    %5 = arith.addf %2, %4 : vector<64x512xf32>
    %c0_5 = arith.constant 0 : index
    %c0_6 = arith.constant 0 : index
    %6 = vector.load %arg13[%c0_5, %c0_6] : memref<64x512xf32, #tpu.memory_space<vmem>>, vector<64x512xf32>
    tpu.vector_store %arg13[%c0_5, %c0_6], %5 {strides = array<i32>} : memref<64x512xf32, #tpu.memory_space<vmem>>, vector<64x512xf32>,
    %cst_7 = arith.constant 0.000000e+00 : f32
    %7 = vector.broadcast %cst_7 : f32 to vector<8x128xf32>
    %cst_8 = arith.constant 0.000000e+00 : f32
    %8 = vector.broadcast %cst_8 : f32 to vector<8x128xf32>
    %c0_9 = arith.constant 0 : index
    %c0_10 = arith.constant 0 : index
    %9 = vector.load %arg13[%c0_9, %c0_10] : memref<64x512xf32, #tpu.memory_space<vmem>>, vector<8x512xf32>
    %10 = arith.truncf %7 : vector<8x128xf32> to vector<8x128xbf16>
    %c0_11 = arith.constant 0 : index
    %c0_12 = arith.constant 0 : index
    %11 = vector.load %arg3[%c0_11, %c0_12] : memref<128x512xbf16, #tpu.memory_space<vmem>>, vector<128x512xbf16>
    %cst_13 = arith.constant dense<0.000000e+00> : vector<8x512xf32>
    %12 = tpu.matmul %10, %11, %cst_13 {dimension_numbers = #tpu.dot_dimension_numbers<[1], [0], [0], [1], [0, 0, 1, 1], [], []>} : vector<8x128xbf16>, vector<128x512xbf16>, vector<8x512xf32> -> vector<8x512xf32>
    %13 = arith.addf %9, %12 : vector<8x512xf32>
    %14 = vector.extract_strided_slice %13 {offsets = [0, 0], sizes = [8, 128], strides = [1, 1]} : vector<8x512xf32> to vector<8x128xf32>
    %15 = arith.negf %14 : vector<8x128xf32>
    %16 = math.exp %15 : vector<8x128xf32>
    %cst_14 = arith.constant 1.000000e+00 : f32
    %17 = vector.broadcast %cst_14 : f32 to vector<8x128xf32>
    %18 = arith.addf %17, %16 : vector<8x128xf32>
    %19 = arith.divf %17, %18 : vector<8x128xf32>
    %20 = vector.extract_strided_slice %13 {offsets = [0, 128], sizes = [8, 128], strides = [1, 1]} : vector<8x512xf32> to vector<8x128xf32>
    %21 = arith.negf %20 : vector<8x128xf32>
    %22 = math.exp %21 : vector<8x128xf32>
    %cst_15 = arith.constant 1.000000e+00 : f32
    %23 = vector.broadcast %cst_15 : f32 to vector<8x128xf32>
    %24 = arith.addf %23, %22 : vector<8x128xf32>
    %25 = arith.divf %23, %24 : vector<8x128xf32>
    %26 = vector.extract_strided_slice %13 {offsets = [0, 256], sizes = [8, 128], strides = [1, 1]} : vector<8x512xf32> to vector<8x128xf32>
    %27 = math.tanh %26 : vector<8x128xf32>
    %28 = vector.extract_strided_slice %13 {offsets = [0, 384], sizes = [8, 128], strides = [1, 1]} : vector<8x512xf32> to vector<8x128xf32>
    %29 = arith.negf %28 : vector<8x128xf32>
    %30 = math.exp %29 : vector<8x128xf32>
    %cst_16 = arith.constant 1.000000e+00 : f32
    %31 = vector.broadcast %cst_16 : f32 to vector<8x128xf32>
    %32 = arith.addf %31, %30 : vector<8x128xf32>
    %33 = arith.divf %31, %32 : vector<8x128xf32>
    %34 = arith.mulf %25, %8 : vector<8x128xf32>
    %35 = arith.mulf %19, %27 : vector<8x128xf32>
    %36 = arith.addf %34, %35 : vector<8x128xf32>
    %37 = math.tanh %36 : vector<8x128xf32>
    %38 = arith.mulf %33, %37 : vector<8x128xf32>
    %c0_17 = arith.constant 0 : index
    %c0_18 = arith.constant 0 : index
    %39 = vector.load %arg1[%c0_17, %c0_18] : memref<64x1xf32, #tpu.memory_space<vmem>>, vector<8x1xf32>
    %40 = vector.broadcast %39 : vector<8x1xf32> to vector<8x128xf32>
    %41 = arith.mulf %40, %36 : vector<8x128xf32>
    %cst_19 = arith.constant 1.000000e+00 : f32
    %42 = vector.broadcast %cst_19 : f32 to vector<8x1xf32>
    %43 = arith.subf %42, %39 : vector<8x1xf32>
    %44 = vector.broadcast %43 : vector<8x1xf32> to vector<8x128xf32>
    %45 = arith.mulf %44, %8 : vector<8x128xf32>
    %46 = arith.addf %41, %45 : vector<8x128xf32>
    %47 = vector.broadcast %39 : vector<8x1xf32> to vector<8x128xf32>
    %48 = arith.mulf %47, %38 : vector<8x128xf32>
    %cst_20 = arith.constant 1.000000e+00 : f32
    %49 = vector.broadcast %cst_20 : f32 to vector<8x1xf32>
    %50 = arith.subf %49, %39 : vector<8x1xf32>
    %51 = vector.broadcast %50 : vector<8x1xf32> to vector<8x128xf32>
    %52 = arith.mulf %51, %7 : vector<8x128xf32>
    %53 = arith.addf %48, %52 : vector<8x128xf32>
    %c8 = arith.constant 8 : index
    %c0_21 = arith.constant 0 : index
    %54 = vector.load %arg13[%c8, %c0_21] : memref<64x512xf32, #tpu.memory_space<vmem>>, vector<8x512xf32>
    %55 = arith.truncf %53 : vector<8x128xf32> to vector<8x128xbf16>
    %c0_22 = arith.constant 0 : index
    %c0_23 = arith.constant 0 : index
    %56 = vector.load %arg3[%c0_22, %c0_23] : memref<128x512xbf16, #tpu.memory_space<vmem>>, vector<128x512xbf16>
    %cst_24 = arith.constant dense<0.000000e+00> : vector<8x512xf32>
    %57 = tpu.matmul %55, %56, %cst_24 {dimension_numbers = #tpu.dot_dimension_numbers<[1], [0], [0], [1], [0, 0, 1, 1], [], []>} : vector<8x128xbf16>, vector<128x512xbf16>, vector<8x512xf32> -> vector<8x512xf32>
    %58 = arith.addf %54, %57 : vector<8x512xf32>
    %59 = vector.extract_strided_slice %58 {offsets = [0, 0], sizes = [8, 128], strides = [1, 1]} : vector<8x512xf32> to vector<8x128xf32>
    %60 = arith.negf %59 : vector<8x128xf32>
    %61 = math.exp %60 : vector<8x128xf32>
    %cst_25 = arith.constant 1.000000e+00 : f32
    %62 = vector.broadcast %cst_25 : f32 to vector<8x128xf32>
    %63 = arith.addf %62, %61 : vector<8x128xf32>
    %64 = arith.divf %62, %63 : vector<8x128xf32>
    %65 = vector.extract_strided_slice %58 {offsets = [0, 128], sizes = [8, 128], strides = [1, 1]} : vector<8x512xf32> to vector<8x128xf32>
    %66 = arith.negf %65 : vector<8x128xf32>
    %67 = math.exp %66 : vector<8x128xf32>
    %cst_26 = arith.constant 1.000000e+00 : f32
    %68 = vector.broadcast %cst_26 : f32 to vector<8x128xf32>
    %69 = arith.addf %68, %67 : vector<8x128xf32>
    %70 = arith.divf %68, %69 : vector<8x128xf32>
    %71 = vector.extract_strided_slice %58 {offsets = [0, 256], sizes = [8, 128], strides = [1, 1]} : vector<8x512xf32> to vector<8x128xf32>
    %72 = math.tanh %71 : vector<8x128xf32>
    %73 = vector.extract_strided_slice %58 {offsets = [0, 384], sizes = [8, 128], strides = [1, 1]} : vector<8x512xf32> to vector<8x128xf32>
    %74 = arith.negf %73 : vector<8x128xf32>
    %75 = math.exp %74 : vector<8x128xf32>
    %cst_27 = arith.constant 1.000000e+00 : f32
    %76 = vector.broadcast %cst_27 : f32 to vector<8x128xf32>
    %77 = arith.addf %76, %75 : vector<8x128xf32>
    %78 = arith.divf %76, %77 : vector<8x128xf32>
    %79 = arith.mulf %70, %46 : vector<8x128xf32>
    %80 = arith.mulf %64, %72 : vector<8x128xf32>
    %81 = arith.addf %79, %80 : vector<8x128xf32>
    %82 = math.tanh %81 : vector<8x128xf32>
    %83 = arith.mulf %78, %82 : vector<8x128xf32>
    %c8_28 = arith.constant 8 : index
    %c0_29 = arith.constant 0 : index
    %84 = vector.load %arg1[%c8_28, %c0_29] : memref<64x1xf32, #tpu.memory_space<vmem>>, vector<8x1xf32>
    %85 = vector.broadcast %84 : vector<8x1xf32> to vector<8x128xf32>
    %86 = arith.mulf %85, %81 : vector<8x128xf32>
    %cst_30 = arith.constant 1.000000e+00 : f32
    %87 = vector.broadcast %cst_30 : f32 to vector<8x1xf32>
    %88 = arith.subf %87, %84 : vector<8x1xf32>
    %89 = vector.broadcast %88 : vector<8x1xf32> to vector<8x128xf32>
    %90 = arith.mulf %89, %46 : vector<8x128xf32>
    %91 = arith.addf %86, %90 : vector<8x128xf32>
    %92 = vector.broadcast %84 : vector<8x1xf32> to vector<8x128xf32>
    %93 = arith.mulf %92, %83 : vector<8x128xf32>
    %cst_31 = arith.constant 1.000000e+00 : f32
    %94 = vector.broadcast %cst_31 : f32 to vector<8x1xf32>
    %95 = arith.subf %94, %84 : vector<8x1xf32>
    %96 = vector.broadcast %95 : vector<8x1xf32> to vector<8x128xf32>
    %97 = arith.mulf %96, %53 : vector<8x128xf32>
    %98 = arith.addf %93, %97 : vector<8x128xf32>
    %c16 = arith.constant 16 : index
    %c0_32 = arith.constant 0 : index
    %99 = vector.load %arg13[%c16, %c0_32] : memref<64x512xf32, #tpu.memory_space<vmem>>, vector<8x512xf32>
    %100 = arith.truncf %98 : vector<8x128xf32> to vector<8x128xbf16>
    %c0_33 = arith.constant 0 : index
    %c0_34 = arith.constant 0 : index
    %101 = vector.load %arg3[%c0_33, %c0_34] : memref<128x512xbf16, #tpu.memory_space<vmem>>, vector<128x512xbf16>
    %cst_35 = arith.constant dense<0.000000e+00> : vector<8x512xf32>
    %102 = tpu.matmul %100, %101, %cst_35 {dimension_numbers = #tpu.dot_dimension_numbers<[1], [0], [0], [1], [0, 0, 1, 1], [], []>} : vector<8x128xbf16>, vector<128x512xbf16>, vector<8x512xf32> -> vector<8x512xf32>
    %103 = arith.addf %99, %102 : vector<8x512xf32>
    %104 = vector.extract_strided_slice %103 {offsets = [0, 0], sizes = [8, 128], strides = [1, 1]} : vector<8x512xf32> to vector<8x128xf32>
    %105 = arith.negf %104 : vector<8x128xf32>
    %106 = math.exp %105 : vector<8x128xf32>
    %cst_36 = arith.constant 1.000000e+00 : f32
    %107 = vector.broadcast %cst_36 : f32 to vector<8x128xf32>
    %108 = arith.addf %107, %106 : vector<8x128xf32>
    %109 = arith.divf %107, %108 : vector<8x128xf32>
    %110 = vector.extract_strided_slice %103 {offsets = [0, 128], sizes = [8, 128], strides = [1, 1]} : vector<8x512xf32> to vector<8x128xf32>
    %111 = arith.negf %110 : vector<8x128xf32>
    %112 = math.exp %111 : vector<8x128xf32>
    %cst_37 = arith.constant 1.000000e+00 : f32
    %113 = vector.broadcast %cst_37 : f32 to vector<8x128xf32>
    %114 = arith.addf %113, %112 : vector<8x128xf32>
    %115 = arith.divf %113, %114 : vector<8x128xf32>
    %116 = vector.extract_strided_slice %103 {offsets = [0, 256], sizes = [8, 128], strides = [1, 1]} : vector<8x512xf32> to vector<8x128xf32>
    %117 = math.tanh %116 : vector<8x128xf32>
    %118 = vector.extract_strided_slice %103 {offsets = [0, 384], sizes = [8, 128], strides = [1, 1]} : vector<8x512xf32> to vector<8x128xf32>
    %119 = arith.negf %118 : vector<8x128xf32>
    %120 = math.exp %119 : vector<8x128xf32>
    %cst_38 = arith.constant 1.000000e+00 : f32
    %121 = vector.broadcast %cst_38 : f32 to vector<8x128xf32>
    %122 = arith.addf %121, %120 : vector<8x128xf32>
    %123 = arith.divf %121, %122 : vector<8x128xf32>
    %124 = arith.mulf %115, %91 : vector<8x128xf32>
    %125 = arith.mulf %109, %117 : vector<8x128xf32>
    %126 = arith.addf %124, %125 : vector<8x128xf32>
    %127 = math.tanh %126 : vector<8x128xf32>
    %128 = arith.mulf %123, %127 : vector<8x128xf32>
    %c16_39 = arith.constant 16 : index
    %c0_40 = arith.constant 0 : index
    %129 = vector.load %arg1[%c16_39, %c0_40] : memref<64x1xf32, #tpu.memory_space<vmem>>, vector<8x1xf32>
    %130 = vector.broadcast %129 : vector<8x1xf32> to vector<8x128xf32>
    %131 = arith.mulf %130, %126 : vector<8x128xf32>
    %cst_41 = arith.constant 1.000000e+00 : f32
    %132 = vector.broadcast %cst_41 : f32 to vector<8x1xf32>
    %133 = arith.subf %132, %129 : vector<8x1xf32>
    %134 = vector.broadcast %133 : vector<8x1xf32> to vector<8x128xf32>
    %135 = arith.mulf %134, %91 : vector<8x128xf32>
    %136 = arith.addf %131, %135 : vector<8x128xf32>
    %137 = vector.broadcast %129 : vector<8x1xf32> to vector<8x128xf32>
    %138 = arith.mulf %137, %128 : vector<8x128xf32>
    %cst_42 = arith.constant 1.000000e+00 : f32
    %139 = vector.broadcast %cst_42 : f32 to vector<8x1xf32>
    %140 = arith.subf %139, %129 : vector<8x1xf32>
    %141 = vector.broadcast %140 : vector<8x1xf32> to vector<8x128xf32>
    %142 = arith.mulf %141, %98 : vector<8x128xf32>
    %143 = arith.addf %138, %142 : vector<8x128xf32>
    %c24 = arith.constant 24 : index
    %c0_43 = arith.constant 0 : index
    %144 = vector.load %arg13[%c24, %c0_43] : memref<64x512xf32, #tpu.memory_space<vmem>>, vector<8x512xf32>
    %145 = arith.truncf %143 : vector<8x128xf32> to vector<8x128xbf16>
    %c0_44 = arith.constant 0 : index
    %c0_45 = arith.constant 0 : index
    %146 = vector.load %arg3[%c0_44, %c0_45] : memref<128x512xbf16, #tpu.memory_space<vmem>>, vector<128x512xbf16>
    %cst_46 = arith.constant dense<0.000000e+00> : vector<8x512xf32>
    %147 = tpu.matmul %145, %146, %cst_46 {dimension_numbers = #tpu.dot_dimension_numbers<[1], [0], [0], [1], [0, 0, 1, 1], [], []>} : vector<8x128xbf16>, vector<128x512xbf16>, vector<8x512xf32> -> vector<8x512xf32>
    %148 = arith.addf %144, %147 : vector<8x512xf32>
    %149 = vector.extract_strided_slice %148 {offsets = [0, 0], sizes = [8, 128], strides = [1, 1]} : vector<8x512xf32> to vector<8x128xf32>
    %150 = arith.negf %149 : vector<8x128xf32>
    %151 = math.exp %150 : vector<8x128xf32>
    %cst_47 = arith.constant 1.000000e+00 : f32
    %152 = vector.broadcast %cst_47 : f32 to vector<8x128xf32>
    %153 = arith.addf %152, %151 : vector<8x128xf32>
    %154 = arith.divf %152, %153 : vector<8x128xf32>
    %155 = vector.extract_strided_slice %148 {offsets = [0, 128], sizes = [8, 128], strides = [1, 1]} : vector<8x512xf32> to vector<8x128xf32>
    %156 = arith.negf %155 : vector<8x128xf32>
    %157 = math.exp %156 : vector<8x128xf32>
    %cst_48 = arith.constant 1.000000e+00 : f32
    %158 = vector.broadcast %cst_48 : f32 to vector<8x128xf32>
    %159 = arith.addf %158, %157 : vector<8x128xf32>
    %160 = arith.divf %158, %159 : vector<8x128xf32>
    %161 = vector.extract_strided_slice %148 {offsets = [0, 256], sizes = [8, 128], strides = [1, 1]} : vector<8x512xf32> to vector<8x128xf32>
    %162 = math.tanh %161 : vector<8x128xf32>
    %163 = vector.extract_strided_slice %148 {offsets = [0, 384], sizes = [8, 128], strides = [1, 1]} : vector<8x512xf32> to vector<8x128xf32>
    %164 = arith.negf %163 : vector<8x128xf32>
    %165 = math.exp %164 : vector<8x128xf32>
    %cst_49 = arith.constant 1.000000e+00 : f32
    %166 = vector.broadcast %cst_49 : f32 to vector<8x128xf32>
    %167 = arith.addf %166, %165 : vector<8x128xf32>
    %168 = arith.divf %166, %167 : vector<8x128xf32>
    %169 = arith.mulf %160, %136 : vector<8x128xf32>
    %170 = arith.mulf %154, %162 : vector<8x128xf32>
    %171 = arith.addf %169, %170 : vector<8x128xf32>
    %172 = math.tanh %171 : vector<8x128xf32>
    %173 = arith.mulf %168, %172 : vector<8x128xf32>
    %c24_50 = arith.constant 24 : index
    %c0_51 = arith.constant 0 : index
    %174 = vector.load %arg1[%c24_50, %c0_51] : memref<64x1xf32, #tpu.memory_space<vmem>>, vector<8x1xf32>
    %175 = vector.broadcast %174 : vector<8x1xf32> to vector<8x128xf32>
    %176 = arith.mulf %175, %171 : vector<8x128xf32>
    %cst_52 = arith.constant 1.000000e+00 : f32
    %177 = vector.broadcast %cst_52 : f32 to vector<8x1xf32>
    %178 = arith.subf %177, %174 : vector<8x1xf32>
    %179 = vector.broadcast %178 : vector<8x1xf32> to vector<8x128xf32>
    %180 = arith.mulf %179, %136 : vector<8x128xf32>
    %181 = arith.addf %176, %180 : vector<8x128xf32>
    %182 = vector.broadcast %174 : vector<8x1xf32> to vector<8x128xf32>
    %183 = arith.mulf %182, %173 : vector<8x128xf32>
    %cst_53 = arith.constant 1.000000e+00 : f32
    %184 = vector.broadcast %cst_53 : f32 to vector<8x1xf32>
    %185 = arith.subf %184, %174 : vector<8x1xf32>
    %186 = vector.broadcast %185 : vector<8x1xf32> to vector<8x128xf32>
    %187 = arith.mulf %186, %143 : vector<8x128xf32>
    %188 = arith.addf %183, %187 : vector<8x128xf32>
    %c32 = arith.constant 32 : index
    %c0_54 = arith.constant 0 : index
    %189 = vector.load %arg13[%c32, %c0_54] : memref<64x512xf32, #tpu.memory_space<vmem>>, vector<8x512xf32>
    %190 = arith.truncf %188 : vector<8x128xf32> to vector<8x128xbf16>
    %c0_55 = arith.constant 0 : index
    %c0_56 = arith.constant 0 : index
    %191 = vector.load %arg3[%c0_55, %c0_56] : memref<128x512xbf16, #tpu.memory_space<vmem>>, vector<128x512xbf16>
    %cst_57 = arith.constant dense<0.000000e+00> : vector<8x512xf32>
    %192 = tpu.matmul %190, %191, %cst_57 {dimension_numbers = #tpu.dot_dimension_numbers<[1], [0], [0], [1], [0, 0, 1, 1], [], []>} : vector<8x128xbf16>, vector<128x512xbf16>, vector<8x512xf32> -> vector<8x512xf32>
    %193 = arith.addf %189, %192 : vector<8x512xf32>
    %194 = vector.extract_strided_slice %193 {offsets = [0, 0], sizes = [8, 128], strides = [1, 1]} : vector<8x512xf32> to vector<8x128xf32>
    %195 = arith.negf %194 : vector<8x128xf32>
    %196 = math.exp %195 : vector<8x128xf32>
    %cst_58 = arith.constant 1.000000e+00 : f32
    %197 = vector.broadcast %cst_58 : f32 to vector<8x128xf32>
    %198 = arith.addf %197, %196 : vector<8x128xf32>
    %199 = arith.divf %197, %198 : vector<8x128xf32>
    %200 = vector.extract_strided_slice %193 {offsets = [0, 128], sizes = [8, 128], strides = [1, 1]} : vector<8x512xf32> to vector<8x128xf32>
    %201 = arith.negf %200 : vector<8x128xf32>
    %202 = math.exp %201 : vector<8x128xf32>
    %cst_59 = arith.constant 1.000000e+00 : f32
    %203 = vector.broadcast %cst_59 : f32 to vector<8x128xf32>
    %204 = arith.addf %203, %202 : vector<8x128xf32>
    %205 = arith.divf %203, %204 : vector<8x128xf32>
    %206 = vector.extract_strided_slice %193 {offsets = [0, 256], sizes = [8, 128], strides = [1, 1]} : vector<8x512xf32> to vector<8x128xf32>
    %207 = math.tanh %206 : vector<8x128xf32>
    %208 = vector.extract_strided_slice %193 {offsets = [0, 384], sizes = [8, 128], strides = [1, 1]} : vector<8x512xf32> to vector<8x128xf32>
    %209 = arith.negf %208 : vector<8x128xf32>
    %210 = math.exp %209 : vector<8x128xf32>
    %cst_60 = arith.constant 1.000000e+00 : f32
    %211 = vector.broadcast %cst_60 : f32 to vector<8x128xf32>
    %212 = arith.addf %211, %210 : vector<8x128xf32>
    %213 = arith.divf %211, %212 : vector<8x128xf32>
    %214 = arith.mulf %205, %181 : vector<8x128xf32>
    %215 = arith.mulf %199, %207 : vector<8x128xf32>
    %216 = arith.addf %214, %215 : vector<8x128xf32>
    %217 = math.tanh %216 : vector<8x128xf32>
    %218 = arith.mulf %213, %217 : vector<8x128xf32>
    %c32_61 = arith.constant 32 : index
    %c0_62 = arith.constant 0 : index
    %219 = vector.load %arg1[%c32_61, %c0_62] : memref<64x1xf32, #tpu.memory_space<vmem>>, vector<8x1xf32>
    %220 = vector.broadcast %219 : vector<8x1xf32> to vector<8x128xf32>
    %221 = arith.mulf %220, %216 : vector<8x128xf32>
    %cst_63 = arith.constant 1.000000e+00 : f32
    %222 = vector.broadcast %cst_63 : f32 to vector<8x1xf32>
    %223 = arith.subf %222, %219 : vector<8x1xf32>
    %224 = vector.broadcast %223 : vector<8x1xf32> to vector<8x128xf32>
    %225 = arith.mulf %224, %181 : vector<8x128xf32>
    %226 = arith.addf %221, %225 : vector<8x128xf32>
    %227 = vector.broadcast %219 : vector<8x1xf32> to vector<8x128xf32>
    %228 = arith.mulf %227, %218 : vector<8x128xf32>
    %cst_64 = arith.constant 1.000000e+00 : f32
    %229 = vector.broadcast %cst_64 : f32 to vector<8x1xf32>
    %230 = arith.subf %229, %219 : vector<8x1xf32>
    %231 = vector.broadcast %230 : vector<8x1xf32> to vector<8x128xf32>
    %232 = arith.mulf %231, %188 : vector<8x128xf32>
    %233 = arith.addf %228, %232 : vector<8x128xf32>
    %c40 = arith.constant 40 : index
    %c0_65 = arith.constant 0 : index
    %234 = vector.load %arg13[%c40, %c0_65] : memref<64x512xf32, #tpu.memory_space<vmem>>, vector<8x512xf32>
    %235 = arith.truncf %233 : vector<8x128xf32> to vector<8x128xbf16>
    %c0_66 = arith.constant 0 : index
    %c0_67 = arith.constant 0 : index
    %236 = vector.load %arg3[%c0_66, %c0_67] : memref<128x512xbf16, #tpu.memory_space<vmem>>, vector<128x512xbf16>
    %cst_68 = arith.constant dense<0.000000e+00> : vector<8x512xf32>
    %237 = tpu.matmul %235, %236, %cst_68 {dimension_numbers = #tpu.dot_dimension_numbers<[1], [0], [0], [1], [0, 0, 1, 1], [], []>} : vector<8x128xbf16>, vector<128x512xbf16>, vector<8x512xf32> -> vector<8x512xf32>
    %238 = arith.addf %234, %237 : vector<8x512xf32>
    %239 = vector.extract_strided_slice %238 {offsets = [0, 0], sizes = [8, 128], strides = [1, 1]} : vector<8x512xf32> to vector<8x128xf32>
    %240 = arith.negf %239 : vector<8x128xf32>
    %241 = math.exp %240 : vector<8x128xf32>
    %cst_69 = arith.constant 1.000000e+00 : f32
    %242 = vector.broadcast %cst_69 : f32 to vector<8x128xf32>
    %243 = arith.addf %242, %241 : vector<8x128xf32>
    %244 = arith.divf %242, %243 : vector<8x128xf32>
    %245 = vector.extract_strided_slice %238 {offsets = [0, 128], sizes = [8, 128], strides = [1, 1]} : vector<8x512xf32> to vector<8x128xf32>
    %246 = arith.negf %245 : vector<8x128xf32>
    %247 = math.exp %246 : vector<8x128xf32>
    %cst_70 = arith.constant 1.000000e+00 : f32
    %248 = vector.broadcast %cst_70 : f32 to vector<8x128xf32>
    %249 = arith.addf %248, %247 : vector<8x128xf32>
    %250 = arith.divf %248, %249 : vector<8x128xf32>
    %251 = vector.extract_strided_slice %238 {offsets = [0, 256], sizes = [8, 128], strides = [1, 1]} : vector<8x512xf32> to vector<8x128xf32>
    %252 = math.tanh %251 : vector<8x128xf32>
    %253 = vector.extract_strided_slice %238 {offsets = [0, 384], sizes = [8, 128], strides = [1, 1]} : vector<8x512xf32> to vector<8x128xf32>
    %254 = arith.negf %253 : vector<8x128xf32>
    %255 = math.exp %254 : vector<8x128xf32>
    %cst_71 = arith.constant 1.000000e+00 : f32
    %256 = vector.broadcast %cst_71 : f32 to vector<8x128xf32>
    %257 = arith.addf %256, %255 : vector<8x128xf32>
    %258 = arith.divf %256, %257 : vector<8x128xf32>
    %259 = arith.mulf %250, %226 : vector<8x128xf32>
    %260 = arith.mulf %244, %252 : vector<8x128xf32>
    %261 = arith.addf %259, %260 : vector<8x128xf32>
    %262 = math.tanh %261 : vector<8x128xf32>
    %263 = arith.mulf %258, %262 : vector<8x128xf32>
    %c40_72 = arith.constant 40 : index
    %c0_73 = arith.constant 0 : index
    %264 = vector.load %arg1[%c40_72, %c0_73] : memref<64x1xf32, #tpu.memory_space<vmem>>, vector<8x1xf32>
    %265 = vector.broadcast %264 : vector<8x1xf32> to vector<8x128xf32>
    %266 = arith.mulf %265, %261 : vector<8x128xf32>
    %cst_74 = arith.constant 1.000000e+00 : f32
    %267 = vector.broadcast %cst_74 : f32 to vector<8x1xf32>
    %268 = arith.subf %267, %264 : vector<8x1xf32>
    %269 = vector.broadcast %268 : vector<8x1xf32> to vector<8x128xf32>
    %270 = arith.mulf %269, %226 : vector<8x128xf32>
    %271 = arith.addf %266, %270 : vector<8x128xf32>
    %272 = vector.broadcast %264 : vector<8x1xf32> to vector<8x128xf32>
    %273 = arith.mulf %272, %263 : vector<8x128xf32>
    %cst_75 = arith.constant 1.000000e+00 : f32
    %274 = vector.broadcast %cst_75 : f32 to vector<8x1xf32>
    %275 = arith.subf %274, %264 : vector<8x1xf32>
    %276 = vector.broadcast %275 : vector<8x1xf32> to vector<8x128xf32>
    %277 = arith.mulf %276, %233 : vector<8x128xf32>
    %278 = arith.addf %273, %277 : vector<8x128xf32>
    %c48 = arith.constant 48 : index
    %c0_76 = arith.constant 0 : index
    %279 = vector.load %arg13[%c48, %c0_76] : memref<64x512xf32, #tpu.memory_space<vmem>>, vector<8x512xf32>
    %280 = arith.truncf %278 : vector<8x128xf32> to vector<8x128xbf16>
    %c0_77 = arith.constant 0 : index
    %c0_78 = arith.constant 0 : index
    %281 = vector.load %arg3[%c0_77, %c0_78] : memref<128x512xbf16, #tpu.memory_space<vmem>>, vector<128x512xbf16>
    %cst_79 = arith.constant dense<0.000000e+00> : vector<8x512xf32>
    %282 = tpu.matmul %280, %281, %cst_79 {dimension_numbers = #tpu.dot_dimension_numbers<[1], [0], [0], [1], [0, 0, 1, 1], [], []>} : vector<8x128xbf16>, vector<128x512xbf16>, vector<8x512xf32> -> vector<8x512xf32>
    %283 = arith.addf %279, %282 : vector<8x512xf32>
    %284 = vector.extract_strided_slice %283 {offsets = [0, 0], sizes = [8, 128], strides = [1, 1]} : vector<8x512xf32> to vector<8x128xf32>
    %285 = arith.negf %284 : vector<8x128xf32>
    %286 = math.exp %285 : vector<8x128xf32>
    %cst_80 = arith.constant 1.000000e+00 : f32
    %287 = vector.broadcast %cst_80 : f32 to vector<8x128xf32>
    %288 = arith.addf %287, %286 : vector<8x128xf32>
    %289 = arith.divf %287, %288 : vector<8x128xf32>
    %290 = vector.extract_strided_slice %283 {offsets = [0, 128], sizes = [8, 128], strides = [1, 1]} : vector<8x512xf32> to vector<8x128xf32>
    %291 = arith.negf %290 : vector<8x128xf32>
    %292 = math.exp %291 : vector<8x128xf32>
    %cst_81 = arith.constant 1.000000e+00 : f32
    %293 = vector.broadcast %cst_81 : f32 to vector<8x128xf32>
    %294 = arith.addf %293, %292 : vector<8x128xf32>
    %295 = arith.divf %293, %294 : vector<8x128xf32>
    %296 = vector.extract_strided_slice %283 {offsets = [0, 256], sizes = [8, 128], strides = [1, 1]} : vector<8x512xf32> to vector<8x128xf32>
    %297 = math.tanh %296 : vector<8x128xf32>
    %298 = vector.extract_strided_slice %283 {offsets = [0, 384], sizes = [8, 128], strides = [1, 1]} : vector<8x512xf32> to vector<8x128xf32>
    %299 = arith.negf %298 : vector<8x128xf32>
    %300 = math.exp %299 : vector<8x128xf32>
    %cst_82 = arith.constant 1.000000e+00 : f32
    %301 = vector.broadcast %cst_82 : f32 to vector<8x128xf32>
    %302 = arith.addf %301, %300 : vector<8x128xf32>
    %303 = arith.divf %301, %302 : vector<8x128xf32>
    %304 = arith.mulf %295, %271 : vector<8x128xf32>
    %305 = arith.mulf %289, %297 : vector<8x128xf32>
    %306 = arith.addf %304, %305 : vector<8x128xf32>
    %307 = math.tanh %306 : vector<8x128xf32>
    %308 = arith.mulf %303, %307 : vector<8x128xf32>
    %c48_83 = arith.constant 48 : index
    %c0_84 = arith.constant 0 : index
    %309 = vector.load %arg1[%c48_83, %c0_84] : memref<64x1xf32, #tpu.memory_space<vmem>>, vector<8x1xf32>
    %310 = vector.broadcast %309 : vector<8x1xf32> to vector<8x128xf32>
    %311 = arith.mulf %310, %306 : vector<8x128xf32>
    %cst_85 = arith.constant 1.000000e+00 : f32
    %312 = vector.broadcast %cst_85 : f32 to vector<8x1xf32>
    %313 = arith.subf %312, %309 : vector<8x1xf32>
    %314 = vector.broadcast %313 : vector<8x1xf32> to vector<8x128xf32>
    %315 = arith.mulf %314, %271 : vector<8x128xf32>
    %316 = arith.addf %311, %315 : vector<8x128xf32>
    %317 = vector.broadcast %309 : vector<8x1xf32> to vector<8x128xf32>
    %318 = arith.mulf %317, %308 : vector<8x128xf32>
    %cst_86 = arith.constant 1.000000e+00 : f32
    %319 = vector.broadcast %cst_86 : f32 to vector<8x1xf32>
    %320 = arith.subf %319, %309 : vector<8x1xf32>
    %321 = vector.broadcast %320 : vector<8x1xf32> to vector<8x128xf32>
    %322 = arith.mulf %321, %278 : vector<8x128xf32>
    %323 = arith.addf %318, %322 : vector<8x128xf32>
    %c56 = arith.constant 56 : index
    %c0_87 = arith.constant 0 : index
    %324 = vector.load %arg13[%c56, %c0_87] : memref<64x512xf32, #tpu.memory_space<vmem>>, vector<8x512xf32>
    %325 = arith.truncf %323 : vector<8x128xf32> to vector<8x128xbf16>
    %c0_88 = arith.constant 0 : index
    %c0_89 = arith.constant 0 : index
    %326 = vector.load %arg3[%c0_88, %c0_89] : memref<128x512xbf16, #tpu.memory_space<vmem>>, vector<128x512xbf16>
    %cst_90 = arith.constant dense<0.000000e+00> : vector<8x512xf32>
    %327 = tpu.matmul %325, %326, %cst_90 {dimension_numbers = #tpu.dot_dimension_numbers<[1], [0], [0], [1], [0, 0, 1, 1], [], []>} : vector<8x128xbf16>, vector<128x512xbf16>, vector<8x512xf32> -> vector<8x512xf32>
    %328 = arith.addf %324, %327 : vector<8x512xf32>
    %329 = vector.extract_strided_slice %328 {offsets = [0, 0], sizes = [8, 128], strides = [1, 1]} : vector<8x512xf32> to vector<8x128xf32>
    %330 = arith.negf %329 : vector<8x128xf32>
    %331 = math.exp %330 : vector<8x128xf32>
    %cst_91 = arith.constant 1.000000e+00 : f32
    %332 = vector.broadcast %cst_91 : f32 to vector<8x128xf32>
    %333 = arith.addf %332, %331 : vector<8x128xf32>
    %334 = arith.divf %332, %333 : vector<8x128xf32>
    %335 = vector.extract_strided_slice %328 {offsets = [0, 128], sizes = [8, 128], strides = [1, 1]} : vector<8x512xf32> to vector<8x128xf32>
    %336 = arith.negf %335 : vector<8x128xf32>
    %337 = math.exp %336 : vector<8x128xf32>
    %cst_92 = arith.constant 1.000000e+00 : f32
    %338 = vector.broadcast %cst_92 : f32 to vector<8x128xf32>
    %339 = arith.addf %338, %337 : vector<8x128xf32>
    %340 = arith.divf %338, %339 : vector<8x128xf32>
    %341 = vector.extract_strided_slice %328 {offsets = [0, 256], sizes = [8, 128], strides = [1, 1]} : vector<8x512xf32> to vector<8x128xf32>
    %342 = math.tanh %341 : vector<8x128xf32>
    %343 = arith.mulf %340, %316 : vector<8x128xf32>
    %344 = arith.mulf %334, %342 : vector<8x128xf32>
    %345 = arith.addf %343, %344 : vector<8x128xf32>
    %c56_93 = arith.constant 56 : index
    %c0_94 = arith.constant 0 : index
    %346 = vector.load %arg1[%c56_93, %c0_94] : memref<64x1xf32, #tpu.memory_space<vmem>>, vector<8x1xf32>
    %347 = vector.broadcast %346 : vector<8x1xf32> to vector<8x128xf32>
    %348 = arith.mulf %347, %345 : vector<8x128xf32>
    %cst_95 = arith.constant 1.000000e+00 : f32
    %349 = vector.broadcast %cst_95 : f32 to vector<8x1xf32>
    %350 = arith.subf %349, %346 : vector<8x1xf32>
    %351 = vector.broadcast %350 : vector<8x1xf32> to vector<8x128xf32>
    %352 = arith.mulf %351, %316 : vector<8x128xf32>
    %353 = arith.addf %348, %352 : vector<8x128xf32>
    %c0_96 = arith.constant 0 : index
    %c0_97 = arith.constant 0 : index
    %354 = vector.load %arg4[%c0_96, %c0_97] : memref<128x64xf32, #tpu.memory_space<vmem>>, vector<128x64xf32>
    %355 = arith.mulf %354, %354 : vector<128x64xf32>
    %cst_98 = arith.constant dense<0.000000e+00> : vector<128xf32>
    %356 = vector.multi_reduction <add>, %355, %cst_98 [1] : vector<128x64xf32> to vector<128xf32>
    %357 = vector.shape_cast %356 : vector<128xf32> to vector<128x1xf32>
    %cst_99 = arith.constant 9.99999993E-9 : f32
    %358 = vector.broadcast %cst_99 : f32 to vector<128x1xf32>
    %359 = arith.addf %357, %358 : vector<128x1xf32>
    %360 = math.rsqrt %359 : vector<128x1xf32>
    %361 = vector.broadcast %360 : vector<128x1xf32> to vector<128x64xf32>
    %362 = arith.mulf %354, %361 : vector<128x64xf32>
    %363 = arith.truncf %362 : vector<128x64xf32> to vector<128x64xbf16>
    %c0_100 = arith.constant 0 : index
    %c0_101 = arith.constant 0 : index
    %364 = vector.load %arg5[%c0_100, %c0_101] : memref<64x128xbf16, #tpu.memory_space<vmem>>, vector<64x128xbf16>
    %cst_102 = arith.constant dense<0.000000e+00> : vector<128x128xf32>
    %365 = tpu.matmul %363, %364, %cst_102 {dimension_numbers = #tpu.dot_dimension_numbers<[1], [0], [0], [1], [0, 0, 1, 1], [], []>} : vector<128x64xbf16>, vector<64x128xbf16>, vector<128x128xf32> -> vector<128x128xf32>
    %c1 = arith.constant 1 : index
    %c0_103 = arith.constant 0 : index
    %366 = vector.load %arg10[%c1, %c0_103] : memref<8x512xf32, #tpu.memory_space<vmem>>, vector<1x128xf32>
    %367 = vector.broadcast %366 : vector<1x128xf32> to vector<128x128xf32>
    %368 = arith.addf %365, %367 : vector<128x128xf32>
    %369 = arith.truncf %353 : vector<8x128xf32> to vector<8x128xbf16>
    %c0_104 = arith.constant 0 : index
    %c0_105 = arith.constant 0 : index
    %370 = vector.load %arg6[%c0_104, %c0_105] : memref<128x128xbf16, #tpu.memory_space<vmem>>, vector<128x128xbf16>
    %cst_106 = arith.constant dense<0.000000e+00> : vector<8x128xf32>
    %371 = tpu.matmul %369, %370, %cst_106 {dimension_numbers = #tpu.dot_dimension_numbers<[1], [0], [0], [1], [0, 0, 1, 1], [], []>} : vector<8x128xbf16>, vector<128x128xbf16>, vector<8x128xf32> -> vector<8x128xf32>
    %c2 = arith.constant 2 : index
    %c0_107 = arith.constant 0 : index
    %372 = vector.load %arg10[%c2, %c0_107] : memref<8x512xf32, #tpu.memory_space<vmem>>, vector<1x128xf32>
    %373 = vector.broadcast %372 : vector<1x128xf32> to vector<8x128xf32>
    %374 = arith.addf %371, %373 : vector<8x128xf32>
    %375 = vector.shape_cast %368 : vector<128x128xf32> to vector<2x64x128xf32>
    %376 = vector.extract_strided_slice %374 {offsets = [0, 0], sizes = [2, 128], strides = [1, 1]} : vector<8x128xf32> to vector<2x128xf32>
    %377 = vector.shape_cast %376 : vector<2x128xf32> to vector<2x1x128xf32>
    %378 = vector.broadcast %377 : vector<2x1x128xf32> to vector<2x64x128xf32>
    %379 = arith.addf %375, %378 : vector<2x64x128xf32>
    %cst_108 = arith.constant 0.000000e+00 : f32
    %380 = vector.broadcast %cst_108 : f32 to vector<2x64x128xf32>
    %381 = arith.maximumf %379, %380 : vector<2x64x128xf32>
    %382 = vector.shape_cast %381 : vector<2x64x128xf32> to vector<128x128xf32>
    %c0_109 = arith.constant 0 : index
    %c0_110 = arith.constant 0 : index
    %383 = vector.load %arg7[%c0_109, %c0_110] : memref<128x2xf32, #tpu.memory_space<vmem>>, vector<128x2xf32>
    %cst_111 = arith.constant dense<0.000000e+00> : vector<128x2xf32>
    %384 = tpu.matmul %382, %383, %cst_111 {dimension_numbers = #tpu.dot_dimension_numbers<[1], [0], [0], [1], [0, 0, 1, 1], [], []>} : vector<128x128xf32>, vector<128x2xf32>, vector<128x2xf32> -> vector<128x2xf32>
    %c3 = arith.constant 3 : index
    %c0_112 = arith.constant 0 : index
    %385 = vector.load %arg10[%c3, %c0_112] : memref<8x512xf32, #tpu.memory_space<vmem>>, vector<1x2xf32>
    %386 = vector.broadcast %385 : vector<1x2xf32> to vector<128x2xf32>
    %387 = arith.addf %384, %386 : vector<128x2xf32>
    %388 = vector.shape_cast %387 : vector<128x2xf32> to vector<2x64x2xf32>
    %389 = tpu.transpose %388, [0, 2, 1] : vector<2x64x2xf32> -> vector<2x2x64xf32>
    %cst_113 = arith.constant dense<0xFF800000> : vector<2x2xf32>
    %390 = vector.multi_reduction <maximumf>, %389, %cst_113 [2] : vector<2x2x64xf32> to vector<2x2xf32>
    %391 = vector.shape_cast %390 : vector<2x2xf32> to vector<2x2x1xf32>
    %392 = vector.broadcast %391 : vector<2x2x1xf32> to vector<2x2x64xf32>
    %393 = arith.subf %389, %392 : vector<2x2x64xf32>
    %394 = math.exp %393 : vector<2x2x64xf32>
    %cst_114 = arith.constant dense<0.000000e+00> : vector<2x2xf32>
    %395 = vector.multi_reduction <add>, %394, %cst_114 [2] : vector<2x2x64xf32> to vector<2x2xf32>
    %396 = vector.shape_cast %395 : vector<2x2xf32> to vector<2x2x1xf32>
    %397 = vector.broadcast %396 : vector<2x2x1xf32> to vector<2x2x64xf32>
    %398 = arith.divf %394, %397 : vector<2x2x64xf32>
    %c0_115 = arith.constant 0 : index
    %c0_116 = arith.constant 0 : index
    %c0_117 = arith.constant 0 : index
    %399 = vector.load %arg12[%c0_115, %c0_116, %c0_117] : memref<2x2x64xf32, #tpu.memory_space<vmem>>, vector<2x2x64xf32>
    tpu.vector_store %arg12[%c0_115, %c0_116, %c0_117], %398 {strides = array<i32>} : memref<2x2x64xf32, #tpu.memory_space<vmem>>, vector<2x2x64xf32>,
    %400 = vector.shape_cast %362 : vector<128x64xf32> to vector<2x64x64xf32>
    "tpu.trace_start"() <{level = 10 : i32, message = "bgp,bpc->bgc"}> : () -> ()
    %cst_118 = arith.constant dense<0.000000e+00> : vector<2x2x64xf32>
    %401 = tpu.matmul %398, %400, %cst_118 {dimension_numbers = #tpu.dot_dimension_numbers<[2], [1], [1], [2], [0, 0, 0, 1, 1, 2], [0], [0]>} : vector<2x2x64xf32>, vector<2x64x64xf32>, vector<2x2x64xf32> -> vector<2x2x64xf32>
    "tpu.trace_stop"() : () -> ()
    %402 = vector.extract_strided_slice %353 {offsets = [0, 0], sizes = [2, 128], strides = [1, 1]} : vector<8x128xf32> to vector<2x128xf32>
    %403 = arith.truncf %402 : vector<2x128xf32> to vector<2x128xbf16>
    %c128 = arith.constant 128 : index
    %c0_119 = arith.constant 0 : index
    %404 = vector.load %arg8[%c128, %c0_119] : memref<256x128xbf16, #tpu.memory_space<vmem>>, vector<128x128xbf16>
    %cst_120 = arith.constant dense<0.000000e+00> : vector<2x128xf32>
    %405 = tpu.matmul %403, %404, %cst_120 {dimension_numbers = #tpu.dot_dimension_numbers<[1], [0], [0], [1], [0, 0, 1, 1], [], []>} : vector<2x128xbf16>, vector<128x128xbf16>, vector<2x128xf32> -> vector<2x128xf32>
    %406 = vector.extract_strided_slice %401 {offsets = [0, 0, 0], sizes = [2, 1, 64], strides = [1, 1, 1]} : vector<2x2x64xf32> to vector<2x1x64xf32>
    %407 = vector.shape_cast %406 : vector<2x1x64xf32> to vector<2x64xf32>
    %408 = arith.truncf %407 : vector<2x64xf32> to vector<2x64xbf16>
    %c0_121 = arith.constant 0 : index
    %c0_122 = arith.constant 0 : index
    %409 = vector.load %arg8[%c0_121, %c0_122] : memref<256x128xbf16, #tpu.memory_space<vmem>>, vector<64x128xbf16>
    %cst_123 = arith.constant dense<0.000000e+00> : vector<2x128xf32>
    %410 = tpu.matmul %408, %409, %cst_123 {dimension_numbers = #tpu.dot_dimension_numbers<[1], [0], [0], [1], [0, 0, 1, 1], [], []>} : vector<2x64xbf16>, vector<64x128xbf16>, vector<2x128xf32> -> vector<2x128xf32>
    %411 = arith.addf %405, %410 : vector<2x128xf32>
    %412 = vector.extract_strided_slice %401 {offsets = [0, 1, 0], sizes = [2, 1, 64], strides = [1, 1, 1]} : vector<2x2x64xf32> to vector<2x1x64xf32>
    %413 = vector.shape_cast %412 : vector<2x1x64xf32> to vector<2x64xf32>
    %414 = arith.truncf %413 : vector<2x64xf32> to vector<2x64xbf16>
    %c64 = arith.constant 64 : index
    %c0_124 = arith.constant 0 : index
    %415 = vector.load %arg8[%c64, %c0_124] : memref<256x128xbf16, #tpu.memory_space<vmem>>, vector<64x128xbf16>
    %cst_125 = arith.constant dense<0.000000e+00> : vector<2x128xf32>
    %416 = tpu.matmul %414, %415, %cst_125 {dimension_numbers = #tpu.dot_dimension_numbers<[1], [0], [0], [1], [0, 0, 1, 1], [], []>} : vector<2x64xbf16>, vector<64x128xbf16>, vector<2x128xf32> -> vector<2x128xf32>
    %417 = arith.addf %411, %416 : vector<2x128xf32>
    %c4 = arith.constant 4 : index
    %c0_126 = arith.constant 0 : index
    %418 = vector.load %arg10[%c4, %c0_126] : memref<8x512xf32, #tpu.memory_space<vmem>>, vector<1x128xf32>
    %419 = vector.broadcast %418 : vector<1x128xf32> to vector<2x128xf32>
    %420 = arith.addf %417, %419 : vector<2x128xf32>
    %cst_127 = arith.constant 0.000000e+00 : f32
    %421 = vector.broadcast %cst_127 : f32 to vector<2x128xf32>
    %422 = arith.maximumf %420, %421 : vector<2x128xf32>
    %423 = arith.truncf %422 : vector<2x128xf32> to vector<2x128xbf16>
    %c0_128 = arith.constant 0 : index
    %c0_129 = arith.constant 0 : index
    %424 = vector.load %arg9[%c0_128, %c0_129] : memref<128x256xbf16, #tpu.memory_space<vmem>>, vector<128x256xbf16>
    %cst_130 = arith.constant dense<0.000000e+00> : vector<2x256xf32>
    %425 = tpu.matmul %423, %424, %cst_130 {dimension_numbers = #tpu.dot_dimension_numbers<[1], [0], [0], [1], [0, 0, 1, 1], [], []>} : vector<2x128xbf16>, vector<128x256xbf16>, vector<2x256xf32> -> vector<2x256xf32>
    %c5 = arith.constant 5 : index
    %c0_131 = arith.constant 0 : index
    %426 = vector.load %arg10[%c5, %c0_131] : memref<8x512xf32, #tpu.memory_space<vmem>>, vector<1x256xf32>
    %427 = vector.broadcast %426 : vector<1x256xf32> to vector<2x256xf32>
    %428 = arith.addf %425, %427 : vector<2x256xf32>
    %cst_132 = arith.constant dense<0xFF800000> : vector<2xf32>
    %429 = vector.multi_reduction <maximumf>, %428, %cst_132 [1] : vector<2x256xf32> to vector<2xf32>
    %430 = vector.shape_cast %429 : vector<2xf32> to vector<2x1xf32>
    %431 = vector.broadcast %430 : vector<2x1xf32> to vector<2x256xf32>
    %432 = arith.subf %428, %431 : vector<2x256xf32>
    %433 = math.exp %432 : vector<2x256xf32>
    %cst_133 = arith.constant dense<0.000000e+00> : vector<2xf32>
    %434 = vector.multi_reduction <add>, %433, %cst_133 [1] : vector<2x256xf32> to vector<2xf32>
    %435 = vector.shape_cast %434 : vector<2xf32> to vector<2x1xf32>
    %436 = math.log %435 : vector<2x1xf32>
    %437 = arith.addf %436, %430 : vector<2x1xf32>
    %438 = vector.broadcast %437 : vector<2x1xf32> to vector<2x256xf32>
    %439 = arith.subf %428, %438 : vector<2x256xf32>
    %c0_134 = arith.constant 0 : index
    %c0_135 = arith.constant 0 : index
    %440 = vector.load %arg11[%c0_134, %c0_135] : memref<2x256xf32, #tpu.memory_space<vmem>>, vector<2x256xf32>
    tpu.vector_store %arg11[%c0_134, %c0_135], %439 {strides = array<i32>} : memref<2x256xf32, #tpu.memory_space<vmem>>, vector<2x256xf32>,
    return
  }
}

</mosaic_0001>

<bundles_post_ra>
// kernel: network_forward.1
= control target key start
LH: loop header
LB: loop body
LE: loop exit
PB: predicated region body
PF: predicated region fallthrough
CT: control target
= control target key end

     0   :  { %v5257_v2 = vmov 0   ;;  %vm188_vm0 = vcmask 523264   ;;  %s5243_s0 = inlined_call_operand.vmem [shape: bf16[64,64], index: 0, kind: input, shape index: {}]   ;;  %s5244_s1 = inlined_call_operand.vmem [shape: f32[64,1], index: 1, kind: input, shape index: {}]   ;;  %s5245_s2 = inlined_call_operand.vmem [shape: bf16[64,512], index: 2, kind: input, shape index: {}]   ;;  %s5246_s3 = inlined_call_operand.vmem [shape: bf16[128,512], index: 3, kind: input, shape index: {}]   ;;  %s5247_s4 = inlined_call_operand.vmem [shape: f32[128,64], index: 4, kind: input, shape index: {}]   ;;  %s5248_s5 = inlined_call_operand.vmem [shape: bf16[64,128], index: 5, kind: input, shape index: {}]   ;;  %s5249_s6 = inlined_call_operand.vmem [shape: bf16[128,128], index: 6, kind: input, shape index: {}]   ;;  %s5250_s7 = inlined_call_operand.vmem [shape: f32[128,2], index: 7, kind: input, shape index: {}]   ;;  %s5251_s8 = inlined_call_operand.vmem [shape: bf16[256,128], index: 8, kind: input, shape index: {}]   ;;  %s5252_s9 = inlined_call_operand.vmem [shape: bf16[128,256], index: 9, kind: input, shape index: {}]   ;;  %s5253_s10 = inlined_call_operand.vmem [shape: f32[8,512], index: 10, kind: input, shape index: {}]   ;;  %s5254_s11 = inlined_call_operand.hbm [shape: f32[2,256], index: 11, kind: output, shape index: {0}]   ;;  %s5255_s12 = inlined_call_operand.vmem [shape: f32[2,2,64], index: 12, kind: output, shape index: {1}]  }
   0x1   :  { %v3428_v0 = vld [vmem:[%s5245_s2 + $0x4] ss:$16 sps:$4 sm:$0xff]   ;;  %v3430_v1 = vld [vmem:[%s5245_s2 + $0xc] ss:$16 sps:$4 sm:$0xff]   ;;  %233 = vmatprep.mubr.bf16.mxu0 %v5257_v2  ;;  %306 = vmatprep.mubr.bf16.mxu1 %v5257_v2  ;;  %v3432_v3 = vld [vmem:[%s5245_s2] ss:$16 sps:$4 sm:$0xff]  }
   0x2   :  { %201 = vmatprep.subr.bf16.mxu0 %v3428_v0  ;;  %v3433_v4 = vld [vmem:[%s5245_s2 + $0x8] ss:$16 sps:$4 sm:$0xff]   ;;  %3426 = vset.pattern.permute.xlu0 %v5257_v2  ;;  %v3434_v5 = vld [vmem:[%s5245_s2 + $0x24] ss:$16 sps:$4 sm:$0xff]   ;;  %v3436_v6 = vld [vmem:[%s5245_s2 + $0x2c] ss:$16 sps:$4 sm:$0xff]  }
   0x3   :  { %274 = vmatprep.subr.bf16.mxu1 %v3430_v1  ;;  %3427 = vset.pattern.permute.xlu1 %v5257_v2  ;;  %v3438_v7 = vld [vmem:[%s5245_s2 + $0x20] ss:$16 sps:$4 sm:$0xff]   ;;  %v3439_v8 = vld [vmem:[%s5245_s2 + $0x28] ss:$16 sps:$4 sm:$0xff]   ;;  %v3440_v9 = vld [vmem:[%s5245_s2 + $0x44] ss:$16 sps:$4 sm:$0xff]  }
   0x4   :  { %202 = vmatpush1.bf16.msra.mxu0 %v3432_v3  ;;  %275 = vmatpush1.bf16.msra.mxu1 %v3433_v4  ;;  %v3442_v10 = vld [vmem:[%s5245_s2 + $0x4c] ss:$16 sps:$4 sm:$0xff]   ;;  %v3444_v11 = vld [vmem:[%s5245_s2 + $0x40] ss:$16 sps:$4 sm:$0xff]   ;;  %v3445_v12 = vld [vmem:[%s5245_s2 + $0x48] ss:$16 sps:$4 sm:$0xff]  }
   0x5   :  { %203 = vmatprep.subr.bf16.mxu0 %v3434_v5  ;;  %276 = vmatprep.subr.bf16.mxu1 %v3436_v6  ;;  %v3446_v13 = vld [vmem:[%s5245_s2 + $0x64] ss:$16 sps:$4 sm:$0xff]   ;;  %v3448_v14 = vld [vmem:[%s5245_s2 + $0x6c] ss:$16 sps:$4 sm:$0xff]   ;;  %v3450_v15 = vld [vmem:[%s5245_s2 + $0x60] ss:$16 sps:$4 sm:$0xff]  }
   0x6   :  { %v3451_v16 = vld [vmem:[%s5245_s2 + $0x68] ss:$16 sps:$4 sm:$0xff]   ;;  %v3922_v17 = vld [vmem:[%s5246_s3 + $0x4] ss:$16 sps:$4 sm:$0xff]   ;;  %v3927_v18 = vld [vmem:[%s5246_s3 + $0xc] ss:$16 sps:$4 sm:$0xff]  }
   0x7   :  { %v3452_v19 = vld [vmem:[%s5243_s0] sm:$0xff]   ;;  %v3940_v21 = vld [vmem:[%s5246_s3 + $0x8] ss:$16 sps:$4 sm:$0xff]   ;;  %v3952_v23 = vld [vmem:[%s5246_s3 + $0x2c] ss:$16 sps:$4 sm:$0xff]  }
   0x8   :  { %204 = vmatpush1.bf16.msra.mxu0 %v3438_v7  ;;  %277 = vmatpush1.bf16.msra.mxu1 %v3439_v8  ;;  %v3935_v20 = vld [vmem:[%s5246_s3] ss:$16 sps:$4 sm:$0xff]   ;;  %v3945_v22 = vld [vmem:[%s5246_s3 + $0x24] ss:$16 sps:$4 sm:$0xff]   ;;  %v3966_v25 = vld [vmem:[%s5246_s3 + $0x28] ss:$16 sps:$4 sm:$0xff]  }
   0x9   :  { %205 = vmatprep.subr.bf16.mxu0 %v3440_v9  ;;  %278 = vmatprep.subr.bf16.mxu1 %v3442_v10  ;;  %v3959_v24 = vld [vmem:[%s5246_s3 + $0x20] ss:$16 sps:$4 sm:$0xff]   ;;  %v3971_v26 = vld [vmem:[%s5246_s3 + $0x44] ss:$16 sps:$4 sm:$0xff]   ;;  %v3978_v27 = vld [vmem:[%s5246_s3 + $0x4c] ss:$16 sps:$4 sm:$0xff]  }
   0xa   :  { %v3465_v28 = vld [vmem:[%s5243_s0 + $0x8] sm:$0xff]   ;;  %v3988_v29 = vld [vmem:[%s5246_s3 + $0x40] ss:$16 sps:$4 sm:$0xff]   ;;  %v4000_v31 = vld [vmem:[%s5246_s3 + $0x64] ss:$16 sps:$4 sm:$0xff]  }
   0xb   :  { %v3993_v30 = vld [vmem:[%s5246_s3 + $0x48] ss:$16 sps:$4 sm:$0xff]   ;;  %v4007_v32 = vld [vmem:[%s5246_s3 + $0x6c] ss:$16 sps:$4 sm:$0xff]   ;;  %v4014_v33 = vld [vmem:[%s5246_s3 + $0x60] ss:$16 sps:$4 sm:$0xff]  }
   0xc   :  { %206 = vmatpush1.bf16.msra.mxu0 %v3444_v11  ;;  %279 = vmatpush1.bf16.msra.mxu1 %v3445_v12  ;;  %v4021_v34 = vld [vmem:[%s5246_s3 + $0x68] ss:$16 sps:$4 sm:$0xff]   ;;  %v4028_v35 = vld [vmem:[%s5246_s3 + $0x84] ss:$16 sps:$4 sm:$0xff]   ;;  %v4033_v36 = vld [vmem:[%s5246_s3 + $0x8c] ss:$16 sps:$4 sm:$0xff]  }
   0xd   :  { %207 = vmatprep.subr.bf16.mxu0 %v3446_v13  ;;  %280 = vmatprep.subr.bf16.mxu1 %v3448_v14  ;;  %v3478_v37 = vld [vmem:[%s5243_s0 + $0x10] sm:$0xff]   ;;  %v4050_v39 = vld [vmem:[%s5246_s3 + $0x88] ss:$16 sps:$4 sm:$0xff]   ;;  %v4062_v41 = vld [vmem:[%s5246_s3 + $0xac] ss:$16 sps:$4 sm:$0xff]  }
   0xe   :  { %v4043_v38 = vld [vmem:[%s5246_s3 + $0x80] ss:$16 sps:$4 sm:$0xff]   ;;  %v4055_v40 = vld [vmem:[%s5246_s3 + $0xa4] ss:$16 sps:$4 sm:$0xff]   ;;  %v4076_v43 = vld [vmem:[%s5246_s3 + $0xa8] ss:$16 sps:$4 sm:$0xff]  }
   0xf   :  { %v4071_v42 = vld [vmem:[%s5246_s3 + $0xa0] ss:$16 sps:$4 sm:$0xff]   ;;  %v4086_v45 = vld [vmem:[%s5246_s3 + $0xc4] ss:$16 sps:$4 sm:$0xff]   ;;  %v4091_v46 = vld [vmem:[%s5246_s3 + $0xcc] ss:$16 sps:$4 sm:$0xff]  }
  0x10   :  { %208 = vmatpush1.bf16.msra.mxu0 %v3450_v15  ;;  %281 = vmatpush1.bf16.msra.mxu1 %v3451_v16  ;;  %v685_v44 = vld [vmem:[%s5244_s1] sm:$0xff]  ;;  %v3491_v47 = vld [vmem:[%s5243_s0 + $0x18] sm:$0xff]   ;;  %v817_v52 = vld [vmem:[%s5244_s1 + $0x8] sm:$0xff] }
  0x11   :  { %575 = vmatprep.subr.bf16.mxu0 %v3922_v17  ;;  %616 = vmatprep.subr.bf16.mxu1 %v3927_v18  ;;  %v4103_v48 = vld [vmem:[%s5246_s3 + $0xc0] ss:$16 sps:$4 sm:$0xff]   ;;  %v4108_v49 = vld [vmem:[%s5246_s3 + $0xc8] ss:$16 sps:$4 sm:$0xff]   ;;  %v4113_v50 = vld [vmem:[%s5246_s3 + $0xe4] ss:$16 sps:$4 sm:$0xff]  }
  0x12   :  { %688 = vperm.xlu0 %3426, %v685_v44   ;;  %v4120_v51 = vld [vmem:[%s5246_s3 + $0xec] ss:$16 sps:$4 sm:$0xff]   ;;  %v4128_v53 = vld [vmem:[%s5246_s3 + $0xe0] ss:$16 sps:$4 sm:$0xff]   ;;  %v4133_v54 = vld [vmem:[%s5246_s3 + $0xe8] ss:$16 sps:$4 sm:$0xff]   ;;  %820 = vperm.xlu1 %3427, %v817_v52  }
  0x13   :  { %2971 = vmatmul.mubr.msk.bf16.vlgmr.msra.gmra.mrb[0].mxu0 %vm188_vm0, %v3452_v19  ;;  %2975 = vmatmul.mubr.msk.bf16.vlgmr.msra.gmra.mrb[0].mxu1 %vm188_vm0, %v3452_v19  ;;  %v692_v55 = vsub.f32 1.0, %v685_v44  ;;  %v950_v56 = vld [vmem:[%s5244_s1 + $0x10] sm:$0xff]  ;;  %v1083_v57 = vld [vmem:[%s5244_s1 + $0x18] sm:$0xff]  ;;  %v1216_v59 = vld [vmem:[%s5244_s1 + $0x20] sm:$0xff]  ;;  %v824_v60 = vsub.f32 1.0, %v817_v52 }
  0x14   :  { %576 = vmatpush1.bf16.msra.mxu0 %v3935_v20  ;;  %617 = vmatpush1.bf16.msra.mxu1 %v3940_v21  ;;  %v957_v58 = vsub.f32 1.0, %v950_v56  ;;  %v1090_v61 = vsub.f32 1.0, %v1083_v57  ;;  %v1223_v62 = vsub.f32 1.0, %v1216_v59  ;;  %v1349_v63 = vld [vmem:[%s5244_s1 + $0x28] sm:$0xff]  ;;  %v1482_v1 = vld [vmem:[%s5244_s1 + $0x30] sm:$0xff] }
  0x15   :  { %577 = vmatprep.subr.bf16.mxu0 %v3945_v22  ;;  %618 = vmatprep.subr.bf16.mxu1 %v3952_v23  ;;  %v1356_v0 = vsub.f32 1.0, %v1349_v63  ;;  %v1489_v3 = vsub.f32 1.0, %v1482_v1 }
  0x16   :  { %243 = vmatprep.mubr.bf16.mxu0 %v5257_v2  ;;  %316 = vmatprep.mubr.bf16.mxu1 %v5257_v2 }
  0x17   :  { %695 = vperm.xlu0 %3426, %v692_v55   ;;  %827 = vperm.xlu1 %3427, %v824_v60  }
  0x18   :  { %578 = vmatpush1.bf16.msra.mxu0 %v3959_v24  ;;  %619 = vmatpush1.bf16.msra.mxu1 %v3966_v25 }
  0x19   :  { %579 = vmatprep.subr.bf16.mxu0 %v3971_v26  ;;  %620 = vmatprep.subr.bf16.mxu1 %v3978_v27 }
  0x1b   :  { %2972 = vmatmul.mubr.msk.bf16.gmra.mrb[4].mxu0 %vm188_vm0, %v3465_v28  ;;  %2976 = vmatmul.mubr.msk.bf16.gmra.mrb[4].mxu1 %vm188_vm0, %v3465_v28 }
  0x1c   :  { %580 = vmatpush1.bf16.msra.mxu0 %v3988_v29  ;;  %621 = vmatpush1.bf16.msra.mxu1 %v3993_v30 }
  0x1d   :  { %581 = vmatprep.subr.bf16.mxu0 %v4000_v31  ;;  %622 = vmatprep.subr.bf16.mxu1 %v4007_v32 }
  0x1e   :  { %253 = vmatprep.mubr.bf16.mxu0 %v5257_v2  ;;  %326 = vmatprep.mubr.bf16.mxu1 %v5257_v2 }
  0x1f   :  { %953 = vperm.xlu0 %3426, %v950_v56   ;;  %960 = vperm.xlu1 %3427, %v957_v58  }
  0x20   :  { %582 = vmatpush1.bf16.msra.mxu0 %v4014_v33  ;;  %623 = vmatpush1.bf16.msra.mxu1 %v4021_v34 }
  0x21   :  { %583 = vmatprep.subr.bf16.mxu0 %v4028_v35  ;;  %624 = vmatprep.subr.bf16.mxu1 %v4033_v36 }
  0x23   :  { %2973 = vmatmul.mubr.msk.bf16.gmra.mrb[8].mxu0 %vm188_vm0, %v3478_v37  ;;  %2977 = vmatmul.mubr.msk.bf16.gmra.mrb[8].mxu1 %vm188_vm0, %v3478_v37 }
  0x24   :  { %584 = vmatpush1.bf16.msra.mxu0 %v4043_v38  ;;  %625 = vmatpush1.bf16.msra.mxu1 %v4050_v39 }
  0x25   :  { %585 = vmatprep.subr.bf16.mxu0 %v4055_v40  ;;  %626 = vmatprep.subr.bf16.mxu1 %v4062_v41 }
  0x26   :  { %263 = vmatprep.mubr.bf16.mxu0 %v5257_v2  ;;  %336 = vmatprep.mubr.bf16.mxu1 %v5257_v2 }
  0x27   :  { %1086 = vperm.xlu0 %3426, %v1083_v57   ;;  %1093 = vperm.xlu1 %3427, %v1090_v61  }
  0x28   :  { %586 = vmatpush1.bf16.msra.mxu0 %v4071_v42  ;;  %627 = vmatpush1.bf16.msra.mxu1 %v4076_v43 }
  0x29   :  { %587 = vmatprep.subr.bf16.mxu0 %v4086_v45  ;;  %628 = vmatprep.subr.bf16.mxu1 %v4091_v46 }
  0x2b   :  { %2974 = vmatmul.mubr.msk.bf16.gmra.mrb[12].mxu0 %vm188_vm0, %v3491_v47  ;;  %2978 = vmatmul.mubr.msk.bf16.gmra.mrb[12].mxu1 %vm188_vm0, %v3491_v47 }
  0x2c   :  { %588 = vmatpush1.bf16.msra.mxu0 %v4103_v48  ;;  %629 = vmatpush1.bf16.msra.mxu1 %v4108_v49 }
  0x2d   :  { %589 = vmatprep.subr.bf16.mxu0 %v4113_v50  ;;  %630 = vmatprep.subr.bf16.mxu1 %v4120_v51 }
  0x2e   :  { %607 = vmatprep.mubr.bf16.mxu0 %v5257_v2  ;;  %648 = vmatprep.mubr.bf16.mxu1 %v5257_v2 }
  0x2f   :  { %1219 = vperm.xlu0 %3426, %v1216_v59   ;;  %1226 = vperm.xlu1 %3427, %v1223_v62  }
  0x30   :  { %590 = vmatpush1.bf16.msra.mxu0 %v4128_v53  ;;  %631 = vmatpush1.bf16.msra.mxu1 %v4133_v54 }
  0x31   :  { %707 = vmatprep.subr.bf16.mxu0 %v3922_v17  ;;  %748 = vmatprep.subr.bf16.mxu1 %v3927_v18 }
  0x33   :  { %608 = vmatmul.mubr.bf16.vlgmr.msra.gmra.mrb[16].mxu0 %v5257_v2  ;;  %649 = vmatmul.mubr.bf16.vlgmr.msra.gmra.mrb[16].mxu1 %v5257_v2 }
  0x34   :  { %708 = vmatpush1.bf16.msra.mxu0 %v3935_v20  ;;  %749 = vmatpush1.bf16.msra.mxu1 %v3940_v21 }
  0x35   :  { %709 = vmatprep.subr.bf16.mxu0 %v3945_v22  ;;  %750 = vmatprep.subr.bf16.mxu1 %v3952_v23 }
  0x36   :  { %739 = vmatprep.mubr.bf16.mxu0 %v5257_v2  ;;  %780 = vmatprep.mubr.bf16.mxu1 %v5257_v2 }
  0x37   :  { %1352 = vperm.xlu0 %3426, %v1349_v63   ;;  %1359 = vperm.xlu1 %3427, %v1356_v0  }
  0x38   :  { %710 = vmatpush1.bf16.msra.mxu0 %v3959_v24  ;;  %751 = vmatpush1.bf16.msra.mxu1 %v3966_v25 }
  0x39   :  { %711 = vmatprep.subr.bf16.mxu0 %v3971_v26  ;;  %752 = vmatprep.subr.bf16.mxu1 %v3978_v27 }
  0x3c   :  { %712 = vmatpush1.bf16.msra.mxu0 %v3988_v29  ;;  %753 = vmatpush1.bf16.msra.mxu1 %v3993_v30 }
  0x3d   :  { %713 = vmatprep.subr.bf16.mxu0 %v4000_v31  ;;  %754 = vmatprep.subr.bf16.mxu1 %v4007_v32 }
  0x40   :  { %714 = vmatpush1.bf16.msra.mxu0 %v4014_v33  ;;  %755 = vmatpush1.bf16.msra.mxu1 %v4021_v34 }
  0x41   :  { %715 = vmatprep.subr.bf16.mxu0 %v4028_v35  ;;  %756 = vmatprep.subr.bf16.mxu1 %v4033_v36 }
  0x42   :  { %18 = vsyncpa [#allocation4], 0  ;;  %1485 = vperm.xlu0 %3426, %v1482_v1   ;;  %1492 = vperm.xlu1 %3427, %v1489_v3   ;;  %v1619_v4 = vld [vmem:[%s5247_s4] sm:$0xff]  ;;  %v1621_v6 = vld [vmem:[%s5247_s4 + $0x10] sm:$0xff]  ;;  %vm3798_vm1 = vmmov 0   ;;  %vm2306_vm2 = vcmask 517120  }
  0x43   :  { %v1635_v5 = vmul.f32 %v1619_v4, %v1619_v4  ;;  %v1637_v8 = vmul.f32 %v1621_v6, %v1621_v6  ;;  %v1622_v9 = vld [vmem:[%s5247_s4 + $0x18] sm:$0xff]  ;;  %v1624_v12 = vld [vmem:[%s5247_s4 + $0x28] sm:$0xff]  ;;  %v1623_v3 = vld [vmem:[%s5247_s4 + $0x20] sm:$0xff]  ;;  %vm2508_vm3 = vcmask 1041409   ;;  %vm2899_vm4 = vcmask 1041408  }
  0x44   :  { %716 = vmatpush1.bf16.msra.mxu0 %v4043_v38  ;;  %757 = vmatpush1.bf16.msra.mxu1 %v4050_v39  ;;  %v1638_v11 = vmul.f32 %v1622_v9, %v1622_v9  ;;  %v1640_v14 = vmul.f32 %v1624_v12, %v1624_v12  ;;  %v1626_v15 = vld [vmem:[%s5247_s4 + $0x38] sm:$0xff]  ;;  %v1628_v28 = vld [vmem:[%s5247_s4 + $0x48] sm:$0xff]  ;;  %v1625_v6 = vld [vmem:[%s5247_s4 + $0x30] sm:$0xff] }
  0x45   :  { %717 = vmatprep.subr.bf16.mxu0 %v4055_v40  ;;  %758 = vmatprep.subr.bf16.mxu1 %v4062_v41  ;;  %v1651_v7 = vsel %vm188_vm0, %v1635_v5, 0.0  ;;  %v1657_v10 = vsel %vm188_vm0, %v1637_v8, 0.0  ;;  %v1642_v19 = vmul.f32 %v1626_v15, %v1626_v15  ;;  %v1644_v44 = vmul.f32 %v1628_v28, %v1628_v28  ;;  %v1630_v47 = vld [vmem:[%s5247_s4 + $0x58] sm:$0xff]  ;;  %v1632_v56 = vld [vmem:[%s5247_s4 + $0x68] sm:$0xff] }
  0x46   :  { %v1660_v13 = vsel %vm188_vm0, %v1638_v11, 0.0  ;;  %v1666_v16 = vsel %vm188_vm0, %v1640_v14, 0.0  ;;  %v1646_v55 = vmul.f32 %v1630_v47, %v1630_v47  ;;  %v1648_v58 = vmul.f32 %v1632_v56, %v1632_v56  ;;  %v1634_v59 = vld [vmem:[%s5247_s4 + $0x78] sm:$0xff]  ;;  %v1620_v1 = vld [vmem:[%s5247_s4 + $0x8] sm:$0xff] }
  0x47   :  { %v1672_v37 = vsel %vm188_vm0, %v1642_v19, 0.0  ;;  %v1678_v52 = vsel %vm188_vm0, %v1644_v44, 0.0  ;;  %v1650_v61 = vmul.f32 %v1634_v59, %v1634_v59  ;;  %v1604_v63 = vld [vmem:[%s5244_s1 + $0x38] sm:$0xff]  ;;  %v1636_v4 = vmul.f32 %v1620_v1, %v1620_v1 }
  0x48   :  { %718 = vmatpush1.bf16.msra.mxu0 %v4071_v42  ;;  %759 = vmatpush1.bf16.msra.mxu1 %v4076_v43  ;;  %v1684_v57 = vsel %vm188_vm0, %v1646_v55, 0.0  ;;  %v1690_v60 = vsel %vm188_vm0, %v1648_v58, 0.0  ;;  %v1611_v0 = vsub.f32 1.0, %v1604_v63  ;;  %v1639_v5 = vmul.f32 %v1623_v3, %v1623_v3 }
  0x49   :  { %719 = vmatprep.subr.bf16.mxu0 %v4086_v45  ;;  %760 = vmatprep.subr.bf16.mxu1 %v4091_v46  ;;  %v1696_v62 = vsel %vm188_vm0, %v1650_v61, 0.0  ;;  %v1641_v9 = vmul.f32 %v1625_v6, %v1625_v6  ;;  %v68_v55 = vlaneseq }
  0x4a   :  { %v1663_v8 = vsel %vm188_vm0, %v1639_v5, 0.0 }
  0x4b   :  { %v1669_v11 = vsel %vm188_vm0, %v1641_v9, 0.0  ;;  %v4265_v56 = vshrl.u32 %v68_v55, 7 }
  0x4c   :  { %720 = vmatpush1.bf16.msra.mxu0 %v4103_v48  ;;  %761 = vmatpush1.bf16.msra.mxu1 %v4108_v49 }
  0x4d   :  { %721 = vmatprep.subr.bf16.mxu0 %v4113_v50  ;;  %762 = vmatprep.subr.bf16.mxu1 %v4120_v51  ;;  %5263 = vst [vmem:[#allocation6_spill] sm:$0xff] %v4265_v56  ;;  %v82_v58 = vsub.s32 3, %v4265_v56  ;;  %v4270_v59 = vsub.s32 0, %v4265_v56  ;;  %v5256_v61 = vsub.s32 1, %v4265_v56 }
  0x4f   :  { %5264 = vst [vmem:[#allocation7_spill] sm:$0xff] %v4270_v59 }
  0x50   :  { %722 = vmatpush1.bf16.msra.mxu0 %v4128_v53  ;;  %763 = vmatpush1.bf16.msra.mxu1 %v4133_v54 }
  0x51   :  { %840 = vmatprep.subr.bf16.mxu0 %v3922_v17  ;;  %881 = vmatprep.subr.bf16.mxu1 %v3927_v18 }
  0x61   :  { %1652 = vadd.xlane.f32.xlu0 %v1651_v7  ;;  %v1654_v7 = vsel %vm188_vm0, %v1636_v4, 0.0 }
  0x65   :  { %1658 = vadd.xlane.f32.xlu0 %v1657_v10  ;;  %v1627_v10 = vld [vmem:[%s5247_s4 + $0x40] sm:$0xff] }
  0x66   :  { %1655 = vadd.xlane.f32.xlu1 %v1654_v7  ;;  %v1643_v12 = vmul.f32 %v1627_v10, %v1627_v10 }
  0x68   :  { %v1675_v14 = vsel %vm188_vm0, %v1643_v12, 0.0 }
  0x69   :  { %1661 = vadd.xlane.f32.xlu0 %v1660_v13  ;;  %v1629_v13 = vld [vmem:[%s5247_s4 + $0x50] sm:$0xff] }
  0x6a   :  { %1664 = vadd.xlane.f32.xlu1 %v1663_v8  ;;  %v1645_v15 = vmul.f32 %v1629_v13, %v1629_v13 }
  0x6c   :  { %v1681_v19 = vsel %vm188_vm0, %v1645_v15, 0.0 }
  0x6d   :  { %1667 = vadd.xlane.f32.xlu0 %v1666_v16  ;;  %v1631_v16 = vld [vmem:[%s5247_s4 + $0x60] sm:$0xff] }
  0x6e   :  { %1670 = vadd.xlane.f32.xlu1 %v1669_v11  ;;  %v1647_v28 = vmul.f32 %v1631_v16, %v1631_v16 }
  0x70   :  { %v1687_v44 = vsel %vm188_vm0, %v1647_v28, 0.0 }
  0x71   :  { %1673 = vadd.xlane.f32.xlu0 %v1672_v37  ;;  %v1633_v37 = vld [vmem:[%s5247_s4 + $0x70] sm:$0xff] }
  0x72   :  { %1676 = vadd.xlane.f32.xlu1 %v1675_v14  ;;  %v1649_v47 = vmul.f32 %v1633_v37, %v1633_v37 }
  0x75   :  { %1679 = vadd.xlane.f32.xlu0 %v1678_v52  ;;  %v1693_v52 = vsel %vm188_vm0, %v1649_v47, 0.0 }
  0x76   :  { %1682 = vadd.xlane.f32.xlu1 %v1681_v19 }
  0x79   :  { %1685 = vadd.xlane.f32.xlu0 %v1684_v57  ;;  %v78_v57 = vsub.s32 2, %v4265_v56 }
  0x7a   :  { %1688 = vadd.xlane.f32.xlu1 %v1687_v44 }
  0x7d   :  { %1691 = vadd.xlane.f32.xlu0 %v1690_v60  ;;  %v66_v60 = vld [vmem:[%s5253_s10] ss:$8 sm:$0xf] }
  0x7e   :  { %1694 = vadd.xlane.f32.xlu1 %v1693_v52  ;;  %v4282_v3 = vrot.slane %v66_v60, %v82_v58  ;;  %v71_v4 = vrot.slane %v66_v60, %v4270_v59  ;;  %v75_v7 = vrot.slane %v66_v60, %v5256_v61 }
  0x81   :  { %1697 = vadd.xlane.f32.xlu0 %v1696_v62  ;;  %v4276_v62 = vrot.slane %v66_v60, %v78_v57 }
  0x8f   :  { %1607 = vperm.xlu1 %3427, %v1604_v63  }
  0x97   :  { %1614 = vperm.xlu0 %3426, %v1611_v0  }
  0xe6   :  { %v4278_v0 = vpop.f32.mrb[0].mxu0  ;;  %v4280_v1 = vpop.f32.mrb[0].mxu1 }
  0xe7   :  { %v237_v5 = vpop.f32.mrb[1].mxu0  ;;  %v310_v6 = vpop.f32.mrb[1].mxu1 }
  0xe8   :  { %v239_v8 = vpop.f32.mrb[2].mxu0  ;;  %v312_v9 = vpop.f32.mrb[2].mxu1 }
  0xe9   :  { %v4287_v10 = vadd.f32 %v239_v8, %v71_v4  ;;  %v241_v11 = vpop.f32.mrb[3].mxu0  ;;  %v4290_v12 = vadd.f32 %v312_v9, %v4276_v62  ;;  %v314_v13 = vpop.f32.mrb[3].mxu1 }
  0xea   :  { %v4292_v14 = vadd.f32 %v241_v11, %v75_v7  ;;  %v4295_v15 = vadd.f32 %v314_v13, %v4282_v3 }
  0xee   :  { %v245_v16 = vpop.f32.mrb[4].mxu0  ;;  %v318_v19 = vpop.f32.mrb[4].mxu1 }
  0xef   :  { %v4297_v28 = vadd.f32 %v245_v16, %v71_v4  ;;  %v247_v37 = vpop.f32.mrb[5].mxu0  ;;  %v4300_v44 = vadd.f32 %v318_v19, %v4276_v62  ;;  %v320_v63 = vpop.f32.mrb[5].mxu1 }
  0xf0   :  { %v4302_v47 = vadd.f32 %v247_v37, %v75_v7  ;;  %v249_v52 = vpop.f32.mrb[6].mxu0  ;;  %v4305_v55 = vadd.f32 %v320_v63, %v4282_v3  ;;  %v322_v57 = vpop.f32.mrb[6].mxu1 }
  0xf1   :  { %v4307_v58 = vadd.f32 %v249_v52, %v71_v4  ;;  %v251_v60 = vpop.f32.mrb[7].mxu0  ;;  %v4310_v8 = vadd.f32 %v322_v57, %v4276_v62  ;;  %v324_v9 = vpop.f32.mrb[7].mxu1 }
  0xf2   :  { %5265 = vst [vmem:[#allocation8_spill] sm:$0xff] %v4305_v55  ;;  %v4312_v11 = vadd.f32 %v251_v60, %v75_v7  ;;  %v4315_v13 = vadd.f32 %v324_v9, %v4282_v3 }
  0xf3   :  { %5266 = vst [vmem:[#allocation9_spill] sm:$0xff] %v4307_v58  ;;  %5267 = vst [vmem:[#allocation10_spill] sm:$0xff] %v4310_v8 }
  0xf4   :  { %5268 = vst [vmem:[#allocation11_spill] sm:$0xff] %v4312_v11  ;;  %5269 = vst [vmem:[#allocation12_spill] sm:$0xff] %v4315_v13 }
  0xf6   :  { %v255_v16 = vpop.f32.mrb[8].mxu0  ;;  %v328_v19 = vpop.f32.mrb[8].mxu1 }
  0xf7   :  { %v4317_v37 = vadd.f32 %v255_v16, %v71_v4  ;;  %v257_v61 = vpop.f32.mrb[9].mxu0  ;;  %v4320_v63 = vadd.f32 %v328_v19, %v4276_v62  ;;  %v330_v52 = vpop.f32.mrb[9].mxu1 }
  0xf8   :  { %v4322_v2 = vadd.f32 %v257_v61, %v75_v7  ;;  %v259_v59 = vpop.f32.mrb[10].mxu0  ;;  %v4325_v57 = vadd.f32 %v330_v52, %v4282_v3  ;;  %v332_v60 = vpop.f32.mrb[10].mxu1 }
  0xf9   :  { %5270 = vst [vmem:[#allocation13_spill] sm:$0xff] %v4317_v37  ;;  %5271 = vst [vmem:[#allocation14_spill] sm:$0xff] %v4320_v63  ;;  %v4327_v56 = vadd.f32 %v259_v59, %v71_v4  ;;  %v261_v9 = vpop.f32.mrb[11].mxu0  ;;  %v4330_v13 = vadd.f32 %v332_v60, %v4276_v62  ;;  %v334_v16 = vpop.f32.mrb[11].mxu1 }
  0xfa   :  { %5272 = vst [vmem:[#allocation15_spill] sm:$0xff] %v4322_v2  ;;  %5273 = vst [vmem:[#allocation16_spill] sm:$0xff] %v4325_v57  ;;  %v4332_v37 = vadd.f32 %v261_v9, %v75_v7  ;;  %v4335_v19 = vadd.f32 %v334_v16, %v4282_v3 }
  0xfb   :  { %5274 = vst [vmem:[#allocation17_spill] sm:$0xff] %v4327_v56  ;;  %5275 = vst [vmem:[#allocation18_spill] sm:$0xff] %v4330_v13 }
  0xfc   :  { %5276 = vst [vmem:[#allocation19_spill] sm:$0xff] %v4332_v37  ;;  %5277 = vst [vmem:[#allocation20_spill] sm:$0xff] %v4335_v19 }
  0xfe   :  { %v265_v63 = vpop.f32.mrb[12].mxu0  ;;  %v338_v61 = vpop.f32.mrb[12].mxu1 }
  0xff   :  { %v4337_v2 = vadd.f32 %v265_v63, %v71_v4  ;;  %v267_v11 = vpop.f32.mrb[13].mxu0  ;;  %v4340_v52 = vadd.f32 %v338_v61, %v4276_v62  ;;  %v340_v59 = vpop.f32.mrb[13].mxu1  ;;  %v236_v61 = vadd.f32 %v4278_v0, %v71_v4 }
 0x100   :  { %v4342_v56 = vadd.f32 %v267_v11, %v75_v7  ;;  %v269_v57 = vpop.f32.mrb[14].mxu0  ;;  %v4345_v60 = vadd.f32 %v340_v59, %v4282_v3  ;;  %v342_v9 = vpop.f32.mrb[14].mxu1  ;;  %v309_v11 = vadd.f32 %v4280_v1, %v4276_v62 }
 0x101   :  { %5278 = vst [vmem:[#allocation21_spill] sm:$0xff] %v4337_v2  ;;  %5279 = vst [vmem:[#allocation22_spill] sm:$0xff] %v4340_v52  ;;  %v4347_v37 = vadd.f32 %v269_v57, %v71_v4  ;;  %v271_v16 = vpop.f32.mrb[15].mxu0  ;;  %v4350_v19 = vadd.f32 %v342_v9, %v4276_v62  ;;  %v344_v63 = vpop.f32.mrb[15].mxu1  ;;  %v311_v52 = vadd.f32 %v310_v6, %v4282_v3 }
 0x102   :  { %5280 = vst [vmem:[#allocation23_spill] sm:$0xff] %v4342_v56  ;;  %5281 = vst [vmem:[#allocation24_spill] sm:$0xff] %v4345_v60  ;;  %v4352_v2 = vadd.f32 %v271_v16, %v75_v7  ;;  %v238_v56 = vadd.f32 %v237_v5, %v75_v7  ;;  %v689_v6 = vpop.permute.xlu0 %688 }
 0x103   :  { %5282 = vst [vmem:[#allocation25_spill] sm:$0xff] %v4347_v37  ;;  %5283 = vst [vmem:[#allocation26_spill] sm:$0xff] %v4350_v19 }
 0x104   :  { %5284 = vst [vmem:[#allocation27_spill] sm:$0xff] %v4352_v2 }
 0x106   :  { %v609_v59 = vpop.f32.mrb[16].mxu0  ;;  %v650_v60 = vpop.f32.mrb[16].mxu1 }
 0x107   :  { %v657_v13 = vadd.f32 %v609_v59, %v236_v61  ;;  %v659_v57 = vadd.f32 %v650_v60, %v309_v11  ;;  %v611_v37 = vpop.f32.mrb[17].mxu0  ;;  %v652_v8 = vpop.f32.mrb[17].mxu1 }
 0x108   :  { %v658_v58 = vadd.f32 %v611_v37, %v238_v56  ;;  %v660_v9 = vadd.f32 %v652_v8, %v311_v52  ;;  %v613_v19 = vpop.f32.mrb[18].mxu0  ;;  %v654_v63 = vpop.f32.mrb[18].mxu1 }
 0x109   :  { %v3011_v16 = vmul.f32 -1.442695, %v657_v13  ;;  %v614_v2 = vpop.f32.mrb[19].mxu0  ;;  %v655_v55 = vpop.f32.mrb[19].mxu1 }
 0x10a   :  { %v3012_v0 = vmul.f32 -1.442695, %v658_v58  ;;  %v3013_v62 = vmul.f32 -1.442695, %v660_v9  ;;  %v696_v58 = vpop.permute.xlu0 %695 }
 0x10b   :  { %3556 = vpow2.f32 %v3011_v16  ;;  %v698_v19 = vmul.f32 0.0, %v696_v58 }
 0x10c   :  { %3558 = vpow2.f32 %v3012_v0  ;;  %v5285_v0 = vmov 0  }
 0x10d   :  { %3560 = vpow2.f32 %v3013_v62 }
 0x10e   :  { %3562 = vtanh.f32 %v659_v57 }
 0x115   :  { %v3557_v1 = vpop.eup %3556 }
 0x116   :  { %v3559_v4 = vpop.eup %3558  ;;  %v664_v3 = vadd.f32 1.0, %v3557_v1 }
 0x117   :  { %v670_v5 = vadd.f32 1.0, %v3559_v4  ;;  %v3561_v56 = vpop.eup %3560 }
 0x118   :  { %3564 = vrcp.f32 %v664_v3  ;;  %v3563_v7 = vpop.eup %3562  ;;  %v677_v13 = vadd.f32 1.0, %v3561_v56 }
 0x119   :  { %3566 = vrcp.f32 %v670_v5 }
 0x11a   :  { %3568 = vrcp.f32 %v677_v13 }
 0x122   :  { %v3565_v8 = vpop.eup %3564 }
 0x123   :  { %v3567_v37 = vpop.eup %3566  ;;  %v681_v2 = vmul.f32 %v3565_v8, %v3563_v7 }
 0x124   :  { %v680_v55 = vmul.f32 0.0, %v3567_v37  ;;  %v3569_v11 = vpop.eup %3568 }
 0x126   :  { %v682_v52 = vadd.f32 %v681_v2, %v680_v55 }
 0x128   :  { %3570 = vtanh.f32 %v682_v52  ;;  %v691_v60 = vmul.f32 %v689_v6, %v682_v52 }
 0x12a   :  { %v4358_v61 = vadd.f32 %v698_v19, %v691_v60  ;;  %v4406_v60 = vpop.permute.xlu1 %820 }
 0x132   :  { %v3571_v59 = vpop.eup %3570 }
 0x133   :  { %v684_v57 = vmul.f32 %v3571_v59, %v3569_v11 }
 0x135   :  { %v700_v9 = vmul.f32 %v689_v6, %v684_v57 }
 0x137   :  { %v4360_v63 = vadd.f32 %v700_v9, %v698_v19  ;;  %v4408_v9 = vpop.permute.xlu1 %827 }
 0x139   :  { %v706_v16 = vpack.c.bf16 %v4360_v63, %v4360_v63 }
 0x13b   :  { %740 = vmatmul.mubr.bf16.vlgmr.msra.gmra.mrb[20].mxu0 %v706_v16  ;;  %781 = vmatmul.mubr.bf16.vlgmr.msra.gmra.mrb[20].mxu1 %v706_v16  ;;  %v833_v16 = vmul.f32 %v4408_v9, %v4360_v63  ;;  %v4426_v63 = vld [vmem:[%s5246_s3 + $0x8] ss:$16 sps:$4 sm:$0xff]  }
 0x13c   :  { %841 = vmatpush1.bf16.msra.mxu0 %v3935_v20  ;;  %882 = vmatpush1.bf16.msra.mxu1 %v3940_v21 }
 0x13d   :  { %842 = vmatprep.subr.bf16.mxu0 %v3945_v22  ;;  %883 = vmatprep.subr.bf16.mxu1 %v3952_v23 }
 0x13e   :  { %872 = vmatprep.mubr.bf16.mxu0 %v5285_v0  ;;  %913 = vmatprep.mubr.bf16.mxu1 %v5285_v0 }
 0x140   :  { %843 = vmatpush1.bf16.msra.mxu0 %v3959_v24  ;;  %884 = vmatpush1.bf16.msra.mxu1 %v3966_v25 }
 0x141   :  { %844 = vmatprep.subr.bf16.mxu0 %v3971_v26  ;;  %885 = vmatprep.subr.bf16.mxu1 %v3978_v27 }
 0x144   :  { %845 = vmatpush1.bf16.msra.mxu0 %v3988_v29  ;;  %886 = vmatpush1.bf16.msra.mxu1 %v3993_v30 }
 0x145   :  { %846 = vmatprep.subr.bf16.mxu0 %v4000_v31  ;;  %887 = vmatprep.subr.bf16.mxu1 %v4007_v32 }
 0x148   :  { %847 = vmatpush1.bf16.msra.mxu0 %v4014_v33  ;;  %888 = vmatpush1.bf16.msra.mxu1 %v4021_v34 }
 0x149   :  { %848 = vmatprep.subr.bf16.mxu0 %v4028_v35  ;;  %889 = vmatprep.subr.bf16.mxu1 %v4033_v36 }
 0x14c   :  { %849 = vmatpush1.bf16.msra.mxu0 %v4043_v38  ;;  %890 = vmatpush1.bf16.msra.mxu1 %v4050_v39 }
 0x14d   :  { %850 = vmatprep.subr.bf16.mxu0 %v4055_v40  ;;  %891 = vmatprep.subr.bf16.mxu1 %v4062_v41 }
 0x150   :  { %851 = vmatpush1.bf16.msra.mxu0 %v4071_v42  ;;  %892 = vmatpush1.bf16.msra.mxu1 %v4076_v43 }
 0x151   :  { %852 = vmatprep.subr.bf16.mxu0 %v4086_v45  ;;  %893 = vmatprep.subr.bf16.mxu1 %v4091_v46 }
 0x154   :  { %853 = vmatpush1.bf16.msra.mxu0 %v4103_v48  ;;  %894 = vmatpush1.bf16.msra.mxu1 %v4108_v49 }
 0x155   :  { %854 = vmatprep.subr.bf16.mxu0 %v4113_v50  ;;  %895 = vmatprep.subr.bf16.mxu1 %v4120_v51 }
 0x158   :  { %855 = vmatpush1.bf16.msra.mxu0 %v4128_v53  ;;  %896 = vmatpush1.bf16.msra.mxu1 %v4133_v54 }
 0x159   :  { %973 = vmatprep.subr.bf16.mxu0 %v3922_v17  ;;  %1014 = vmatprep.subr.bf16.mxu1 %v3927_v18 }
 0x20e   :  { %v741_v20 = vpop.f32.mrb[20].mxu0  ;;  %v782_v21 = vpop.f32.mrb[20].mxu1 }
 0x20f   :  { %v789_v22 = vadd.f32 %v741_v20, %v4287_v10  ;;  %v791_v23 = vadd.f32 %v782_v21, %v4290_v12  ;;  %v743_v24 = vpop.f32.mrb[21].mxu0  ;;  %v784_v62 = vpop.f32.mrb[21].mxu1 }
 0x210   :  { %v790_v1 = vadd.f32 %v743_v24, %v4292_v14  ;;  %v792_v4 = vadd.f32 %v784_v62, %v4295_v15  ;;  %v745_v3 = vpop.f32.mrb[22].mxu0  ;;  %v786_v5 = vpop.f32.mrb[22].mxu1  ;;  %v4432_v24 = vld [vmem:[%s5246_s3 + $0x24] ss:$16 sps:$4 sm:$0xff]   ;;  %v4438_v62 = vld [vmem:[%s5246_s3 + $0x2c] ss:$16 sps:$4 sm:$0xff]  }
 0x211   :  { %v3014_v6 = vmul.f32 -1.442695, %v789_v22  ;;  %v746_v56 = vpop.f32.mrb[23].mxu0  ;;  %v787_v7 = vpop.f32.mrb[23].mxu1 }
 0x212   :  { %v3015_v17 = vmul.f32 -1.442695, %v790_v1  ;;  %v3016_v18 = vmul.f32 -1.442695, %v792_v4  ;;  %v4446_v1 = vld [vmem:[%s5246_s3 + $0x20] ss:$16 sps:$4 sm:$0xff]  }
 0x213   :  { %3572 = vpow2.f32 %v3014_v6 }
 0x214   :  { %3574 = vpow2.f32 %v3015_v17 }
 0x215   :  { %3576 = vpow2.f32 %v3016_v18 }
 0x216   :  { %3578 = vtanh.f32 %v791_v23  ;;  %v4420_v23 = vld [vmem:[%s5246_s3] ss:$16 sps:$4 sm:$0xff]  }
 0x21d   :  { %v3573_v8 = vpop.eup %3572 }
 0x21e   :  { %v3575_v37 = vpop.eup %3574  ;;  %v796_v10 = vadd.f32 1.0, %v3573_v8  ;;  %v4500_v8 = vpop.permute.xlu0 %953 }
 0x21f   :  { %v802_v12 = vadd.f32 1.0, %v3575_v37  ;;  %v3577_v14 = vpop.eup %3576 }
 0x220   :  { %3580 = vrcp.f32 %v796_v10  ;;  %v3579_v13 = vpop.eup %3578  ;;  %v809_v58 = vadd.f32 1.0, %v3577_v14 }
 0x221   :  { %3582 = vrcp.f32 %v802_v12 }
 0x222   :  { %3584 = vrcp.f32 %v809_v58  ;;  %v4545_v58 = vld [vmem:[%s5246_s3 + $0x48] ss:$16 sps:$4 sm:$0xff]  }
 0x22a   :  { %v3581_v15 = vpop.eup %3580 }
 0x22b   :  { %v3583_v2 = vpop.eup %3582  ;;  %v813_v55 = vmul.f32 %v3581_v15, %v3579_v13  ;;  %v4521_v13 = vld [vmem:[%s5246_s3 + $0x28] ss:$16 sps:$4 sm:$0xff]   ;;  %v4527_v15 = vld [vmem:[%s5246_s3 + $0x44] ss:$16 sps:$4 sm:$0xff]  }
 0x22c   :  { %v812_v19 = vmul.f32 %v3583_v2, %v4358_v61  ;;  %v3585_v11 = vpop.eup %3584  ;;  %v4533_v2 = vld [vmem:[%s5246_s3 + $0x4c] ss:$16 sps:$4 sm:$0xff]  }
 0x22e   :  { %v4403_v52 = vadd.f32 %v813_v55, %v812_v19  ;;  %v4539_v55 = vld [vmem:[%s5246_s3 + $0x40] ss:$16 sps:$4 sm:$0xff]   ;;  %v4551_v19 = vld [vmem:[%s5246_s3 + $0x64] ss:$16 sps:$4 sm:$0xff]  }
 0x230   :  { %3586 = vtanh.f32 %v4403_v52 }
 0x23a   :  { %v3587_v59 = vpop.eup %3586 }
 0x23b   :  { %v816_v57 = vmul.f32 %v3587_v59, %v3585_v11  ;;  %v4569_v11 = vld [vmem:[%s5246_s3 + $0x68] ss:$16 sps:$4 sm:$0xff]   ;;  %v4575_v59 = vld [vmem:[%s5246_s3 + $0x84] ss:$16 sps:$4 sm:$0xff]  }
 0x23d   :  { %v832_v20 = vmul.f32 %v4406_v60, %v816_v57  ;;  %v4581_v57 = vld [vmem:[%s5246_s3 + $0x8c] ss:$16 sps:$4 sm:$0xff]  }
 0x23f   :  { %v4413_v21 = vadd.f32 %v833_v16, %v832_v20  ;;  %v4593_v16 = vld [vmem:[%s5246_s3 + $0x88] ss:$16 sps:$4 sm:$0xff]   ;;  %v4599_v20 = vld [vmem:[%s5246_s3 + $0xa4] ss:$16 sps:$4 sm:$0xff]  }
 0x241   :  { %v839_v22 = vpack.c.bf16 %v4413_v21, %v4413_v21 }
 0x243   :  { %873 = vmatmul.mubr.bf16.vlgmr.msra.gmra.mrb[24].mxu0 %v839_v22  ;;  %914 = vmatmul.mubr.bf16.vlgmr.msra.gmra.mrb[24].mxu1 %v839_v22  ;;  %v4611_v22 = vld [vmem:[%s5246_s3 + $0xa0] ss:$16 sps:$4 sm:$0xff]  }
 0x244   :  { %974 = vmatpush1.bf16.msra.mxu0 %v4420_v23  ;;  %1015 = vmatpush1.bf16.msra.mxu1 %v4426_v63 }
 0x245   :  { %975 = vmatprep.subr.bf16.mxu0 %v4432_v24  ;;  %1016 = vmatprep.subr.bf16.mxu1 %v4438_v62 }
 0x246   :  { %1005 = vmatprep.mubr.bf16.mxu0 %v5285_v0  ;;  %1046 = vmatprep.mubr.bf16.mxu1 %v5285_v0 }
 0x248   :  { %976 = vmatpush1.bf16.msra.mxu0 %v4446_v1  ;;  %1017 = vmatpush1.bf16.msra.mxu1 %v3966_v25  ;;  %v4477_v25 = vld [vmem:[%s5246_s3 + $0x4] ss:$16 sps:$4 sm:$0xff]  }
 0x249   :  { %977 = vmatprep.subr.bf16.mxu0 %v3971_v26  ;;  %1018 = vmatprep.subr.bf16.mxu1 %v3978_v27  ;;  %v4483_v26 = vld [vmem:[%s5246_s3 + $0xc] ss:$16 sps:$4 sm:$0xff]  }
 0x24c   :  { %978 = vmatpush1.bf16.msra.mxu0 %v3988_v29  ;;  %1019 = vmatpush1.bf16.msra.mxu1 %v3993_v30 }
 0x24d   :  { %979 = vmatprep.subr.bf16.mxu0 %v4000_v31  ;;  %1020 = vmatprep.subr.bf16.mxu1 %v4007_v32 }
 0x250   :  { %980 = vmatpush1.bf16.msra.mxu0 %v4014_v33  ;;  %1021 = vmatpush1.bf16.msra.mxu1 %v4021_v34 }
 0x251   :  { %981 = vmatprep.subr.bf16.mxu0 %v4028_v35  ;;  %1022 = vmatprep.subr.bf16.mxu1 %v4033_v36  ;;  %v5286_v35 = vld [vmem:[#allocation8_spill] sm:$0xff] }
 0x254   :  { %982 = vmatpush1.bf16.msra.mxu0 %v4043_v38  ;;  %1023 = vmatpush1.bf16.msra.mxu1 %v4050_v39 }
 0x255   :  { %983 = vmatprep.subr.bf16.mxu0 %v4055_v40  ;;  %1024 = vmatprep.subr.bf16.mxu1 %v4062_v41 }
 0x258   :  { %984 = vmatpush1.bf16.msra.mxu0 %v4071_v42  ;;  %1025 = vmatpush1.bf16.msra.mxu1 %v4076_v43 }
 0x259   :  { %985 = vmatprep.subr.bf16.mxu0 %v4086_v45  ;;  %1026 = vmatprep.subr.bf16.mxu1 %v4091_v46 }
 0x25c   :  { %986 = vmatpush1.bf16.msra.mxu0 %v4103_v48  ;;  %1027 = vmatpush1.bf16.msra.mxu1 %v4108_v49 }
 0x25d   :  { %987 = vmatprep.subr.bf16.mxu0 %v4113_v50  ;;  %1028 = vmatprep.subr.bf16.mxu1 %v4120_v51  ;;  %v823_v51 = vmul.f32 %v4406_v60, %v4403_v52  ;;  %v4557_v52 = vld [vmem:[%s5246_s3 + $0x6c] ss:$16 sps:$4 sm:$0xff]   ;;  %v4563_v60 = vld [vmem:[%s5246_s3 + $0x60] ss:$16 sps:$4 sm:$0xff]  }
 0x260   :  { %988 = vmatpush1.bf16.msra.mxu0 %v4128_v53  ;;  %1029 = vmatpush1.bf16.msra.mxu1 %v4133_v54  ;;  %v830_v54 = vmul.f32 %v4408_v9, %v4358_v61  ;;  %v4502_v61 = vpop.permute.xlu1 %960  ;;  %v4587_v9 = vld [vmem:[%s5246_s3 + $0x80] ss:$16 sps:$4 sm:$0xff]  }
 0x261   :  { %1106 = vmatprep.subr.bf16.mxu0 %v4477_v25  ;;  %1147 = vmatprep.subr.bf16.mxu1 %v4483_v26  ;;  %v966_v10 = vmul.f32 %v4502_v61, %v4413_v21  ;;  %v4605_v21 = vld [vmem:[%s5246_s3 + $0xac] ss:$16 sps:$4 sm:$0xff]  }
 0x316   :  { %v874_v27 = vpop.f32.mrb[24].mxu0  ;;  %v915_v29 = vpop.f32.mrb[24].mxu1 }
 0x317   :  { %v922_v30 = vadd.f32 %v874_v27, %v4297_v28  ;;  %v924_v31 = vadd.f32 %v915_v29, %v4300_v44  ;;  %v876_v32 = vpop.f32.mrb[25].mxu0  ;;  %v917_v33 = vpop.f32.mrb[25].mxu1  ;;  %v4617_v27 = vld [vmem:[%s5246_s3 + $0xa8] ss:$16 sps:$4 sm:$0xff]   ;;  %v4623_v29 = vld [vmem:[%s5246_s3 + $0xc4] ss:$16 sps:$4 sm:$0xff]  }
 0x318   :  { %v923_v34 = vadd.f32 %v876_v32, %v4302_v47  ;;  %v925_v36 = vadd.f32 %v917_v33, %v5286_v35  ;;  %v878_v38 = vpop.f32.mrb[26].mxu0  ;;  %v919_v39 = vpop.f32.mrb[26].mxu1  ;;  %v4494_v47 = vadd.f32 %v830_v54, %v823_v51  ;;  %v4641_v32 = vld [vmem:[%s5246_s3 + $0xc8] ss:$16 sps:$4 sm:$0xff]   ;;  %v4647_v33 = vld [vmem:[%s5246_s3 + $0xe4] ss:$16 sps:$4 sm:$0xff]  }
 0x319   :  { %v3017_v40 = vmul.f32 -1.442695, %v922_v30  ;;  %v879_v41 = vpop.f32.mrb[27].mxu0  ;;  %v920_v42 = vpop.f32.mrb[27].mxu1  ;;  %v4629_v30 = vld [vmem:[%s5246_s3 + $0xcc] ss:$16 sps:$4 sm:$0xff]  }
 0x31a   :  { %v3018_v43 = vmul.f32 -1.442695, %v923_v34  ;;  %v3019_v45 = vmul.f32 -1.442695, %v925_v36  ;;  %v4653_v34 = vld [vmem:[%s5246_s3 + $0xec] ss:$16 sps:$4 sm:$0xff]  }
 0x31b   :  { %3588 = vpow2.f32 %v3017_v40  ;;  %v4659_v35 = vld [vmem:[%s5246_s3 + $0xe0] ss:$16 sps:$4 sm:$0xff]   ;;  %v4665_v36 = vld [vmem:[%s5246_s3 + $0xe8] ss:$16 sps:$4 sm:$0xff]  }
 0x31c   :  { %3590 = vpow2.f32 %v3018_v43  ;;  %v5287_v40 = vld [vmem:[#allocation9_spill] sm:$0xff]  ;;  %v5288_v42 = vld [vmem:[#allocation10_spill] sm:$0xff] }
 0x31d   :  { %3592 = vpow2.f32 %v3019_v45 }
 0x31e   :  { %3594 = vtanh.f32 %v924_v31  ;;  %v4635_v31 = vld [vmem:[%s5246_s3 + $0xc0] ss:$16 sps:$4 sm:$0xff]  }
 0x325   :  { %v3589_v46 = vpop.eup %3588 }
 0x326   :  { %v3591_v48 = vpop.eup %3590  ;;  %v929_v49 = vadd.f32 1.0, %v3589_v46 }
 0x327   :  { %v935_v50 = vadd.f32 1.0, %v3591_v48  ;;  %v3593_v53 = vpop.eup %3592  ;;  %v5289_v48 = vld [vmem:[#allocation11_spill] sm:$0xff] }
 0x328   :  { %3596 = vrcp.f32 %v929_v49  ;;  %v3595_v28 = vpop.eup %3594  ;;  %v942_v5 = vadd.f32 1.0, %v3593_v53 }
 0x329   :  { %3598 = vrcp.f32 %v935_v50  ;;  %v5290_v50 = vld [vmem:[#allocation12_spill] sm:$0xff] }
 0x32a   :  { %3600 = vrcp.f32 %v942_v5 }
 0x332   :  { %v3597_v44 = vpop.eup %3596 }
 0x333   :  { %v3599_v4 = vpop.eup %3598  ;;  %v946_v3 = vmul.f32 %v3597_v44, %v3595_v28 }
 0x334   :  { %v945_v6 = vmul.f32 %v3599_v4, %v4494_v47  ;;  %v3601_v7 = vpop.eup %3600 }
 0x336   :  { %v4497_v56 = vadd.f32 %v946_v3, %v945_v6 }
 0x338   :  { %3602 = vtanh.f32 %v4497_v56 }
 0x342   :  { %v3603_v17 = vpop.eup %3602 }
 0x343   :  { %v949_v18 = vmul.f32 %v3603_v17, %v3601_v7 }
 0x345   :  { %v965_v37 = vmul.f32 %v4500_v8, %v949_v18 }
 0x347   :  { %v4507_v12 = vadd.f32 %v966_v10, %v965_v37  ;;  %v956_v37 = vmul.f32 %v4500_v8, %v4497_v56 }
 0x349   :  { %v972_v14 = vpack.c.bf16 %v4507_v12, %v4507_v12 }
 0x34b   :  { %1006 = vmatmul.mubr.bf16.vlgmr.msra.gmra.mrb[28].mxu0 %v972_v14  ;;  %1047 = vmatmul.mubr.bf16.vlgmr.msra.gmra.mrb[28].mxu1 %v972_v14  ;;  %v963_v14 = vmul.f32 %v4502_v61, %v4494_v47  ;;  %v4686_v47 = vpop.permute.xlu1 %1093 }
 0x34c   :  { %1107 = vmatpush1.bf16.msra.mxu0 %v4420_v23  ;;  %1148 = vmatpush1.bf16.msra.mxu1 %v4426_v63 }
 0x34d   :  { %1108 = vmatprep.subr.bf16.mxu0 %v4432_v24  ;;  %1149 = vmatprep.subr.bf16.mxu1 %v4438_v62 }
 0x34e   :  { %1138 = vmatprep.mubr.bf16.mxu0 %v5285_v0  ;;  %1179 = vmatprep.mubr.bf16.mxu1 %v5285_v0 }
 0x350   :  { %1109 = vmatpush1.bf16.msra.mxu0 %v4446_v1  ;;  %1150 = vmatpush1.bf16.msra.mxu1 %v4521_v13 }
 0x351   :  { %1110 = vmatprep.subr.bf16.mxu0 %v4527_v15  ;;  %1151 = vmatprep.subr.bf16.mxu1 %v4533_v2 }
 0x354   :  { %1111 = vmatpush1.bf16.msra.mxu0 %v4539_v55  ;;  %1152 = vmatpush1.bf16.msra.mxu1 %v4545_v58 }
 0x355   :  { %1112 = vmatprep.subr.bf16.mxu0 %v4551_v19  ;;  %1153 = vmatprep.subr.bf16.mxu1 %v4557_v52 }
 0x358   :  { %1113 = vmatpush1.bf16.msra.mxu0 %v4563_v60  ;;  %1154 = vmatpush1.bf16.msra.mxu1 %v4569_v11 }
 0x359   :  { %1114 = vmatprep.subr.bf16.mxu0 %v4575_v59  ;;  %1155 = vmatprep.subr.bf16.mxu1 %v4581_v57 }
 0x35c   :  { %1115 = vmatpush1.bf16.msra.mxu0 %v4587_v9  ;;  %1156 = vmatpush1.bf16.msra.mxu1 %v4593_v16 }
 0x35d   :  { %1116 = vmatprep.subr.bf16.mxu0 %v4599_v20  ;;  %1157 = vmatprep.subr.bf16.mxu1 %v4605_v21 }
 0x360   :  { %1117 = vmatpush1.bf16.msra.mxu0 %v4611_v22  ;;  %1158 = vmatpush1.bf16.msra.mxu1 %v4617_v27 }
 0x361   :  { %1118 = vmatprep.subr.bf16.mxu0 %v4623_v29  ;;  %1159 = vmatprep.subr.bf16.mxu1 %v4629_v30 }
 0x364   :  { %1119 = vmatpush1.bf16.msra.mxu0 %v4635_v31  ;;  %1160 = vmatpush1.bf16.msra.mxu1 %v4641_v32 }
 0x365   :  { %1120 = vmatprep.subr.bf16.mxu0 %v4647_v33  ;;  %1161 = vmatprep.subr.bf16.mxu1 %v4653_v34 }
 0x368   :  { %1121 = vmatpush1.bf16.msra.mxu0 %v4659_v35  ;;  %1162 = vmatpush1.bf16.msra.mxu1 %v4665_v36 }
 0x369   :  { %1239 = vmatprep.subr.bf16.mxu0 %v4477_v25  ;;  %1280 = vmatprep.subr.bf16.mxu1 %v4483_v26 }
 0x41e   :  { %v1007_v38 = vpop.f32.mrb[28].mxu0  ;;  %v1048_v39 = vpop.f32.mrb[28].mxu1 }
 0x41f   :  { %v1055_v41 = vadd.f32 %v1007_v38, %v5287_v40  ;;  %v1057_v43 = vadd.f32 %v1048_v39, %v5288_v42  ;;  %v1009_v45 = vpop.f32.mrb[29].mxu0  ;;  %v1050_v46 = vpop.f32.mrb[29].mxu1  ;;  %v4678_v40 = vadd.f32 %v963_v14, %v956_v37 }
 0x420   :  { %v1056_v49 = vadd.f32 %v1009_v45, %v5289_v48  ;;  %v1058_v51 = vadd.f32 %v1050_v46, %v5290_v50  ;;  %v1011_v53 = vpop.f32.mrb[30].mxu0  ;;  %v1052_v54 = vpop.f32.mrb[30].mxu1  ;;  %v1099_v50 = vmul.f32 %v4686_v47, %v4507_v12 }
 0x421   :  { %v3020_v28 = vmul.f32 -1.442695, %v1055_v41  ;;  %v1012_v44 = vpop.f32.mrb[31].mxu0  ;;  %v1053_v4 = vpop.f32.mrb[31].mxu1 }
 0x422   :  { %v3021_v3 = vmul.f32 -1.442695, %v1056_v49  ;;  %v3022_v5 = vmul.f32 -1.442695, %v1058_v51  ;;  %v4684_v49 = vpop.permute.xlu0 %1086  ;;  %v5292_v4 = vld [vmem:[#allocation14_spill] sm:$0xff] }
 0x423   :  { %3604 = vpow2.f32 %v3020_v28  ;;  %v5291_v28 = vld [vmem:[#allocation13_spill] sm:$0xff] }
 0x424   :  { %3606 = vpow2.f32 %v3021_v3 }
 0x425   :  { %3608 = vpow2.f32 %v3022_v5 }
 0x426   :  { %3610 = vtanh.f32 %v1057_v43 }
 0x42d   :  { %v3605_v6 = vpop.eup %3604 }
 0x42e   :  { %v3607_v7 = vpop.eup %3606  ;;  %v1062_v17 = vadd.f32 1.0, %v3605_v6 }
 0x42f   :  { %v1068_v18 = vadd.f32 1.0, %v3607_v7  ;;  %v3609_v10 = vpop.eup %3608  ;;  %v5293_v7 = vld [vmem:[#allocation15_spill] sm:$0xff] }
 0x430   :  { %3612 = vrcp.f32 %v1062_v17  ;;  %v3611_v38 = vpop.eup %3610  ;;  %v1075_v45 = vadd.f32 1.0, %v3609_v10 }
 0x431   :  { %3614 = vrcp.f32 %v1068_v18  ;;  %v5294_v18 = vld [vmem:[#allocation16_spill] sm:$0xff] }
 0x432   :  { %3616 = vrcp.f32 %v1075_v45 }
 0x43a   :  { %v3613_v39 = vpop.eup %3612 }
 0x43b   :  { %v3615_v41 = vpop.eup %3614  ;;  %v1079_v42 = vmul.f32 %v3613_v39, %v3611_v38 }
 0x43c   :  { %v1078_v46 = vmul.f32 %v3615_v41, %v4678_v40  ;;  %v3617_v48 = vpop.eup %3616 }
 0x43e   :  { %v4681_v43 = vadd.f32 %v1079_v42, %v1078_v46 }
 0x440   :  { %3618 = vtanh.f32 %v4681_v43 }
 0x44a   :  { %v3619_v56 = vpop.eup %3618 }
 0x44b   :  { %v1082_v8 = vmul.f32 %v3619_v56, %v3617_v48 }
 0x44d   :  { %v1098_v61 = vmul.f32 %v4684_v49, %v1082_v8 }
 0x44f   :  { %v4691_v51 = vadd.f32 %v1099_v50, %v1098_v61  ;;  %v1089_v61 = vmul.f32 %v4684_v49, %v4681_v43 }
 0x451   :  { %v1105_v53 = vpack.c.bf16 %v4691_v51, %v4691_v51 }
 0x453   :  { %1139 = vmatmul.mubr.bf16.vlgmr.msra.gmra.mrb[32].mxu0 %v1105_v53  ;;  %1180 = vmatmul.mubr.bf16.vlgmr.msra.gmra.mrb[32].mxu1 %v1105_v53  ;;  %v1096_v53 = vmul.f32 %v4686_v47, %v4678_v40  ;;  %v4745_v40 = vpop.permute.xlu1 %1226 }
 0x454   :  { %1240 = vmatpush1.bf16.msra.mxu0 %v4420_v23  ;;  %1281 = vmatpush1.bf16.msra.mxu1 %v4426_v63 }
 0x455   :  { %1241 = vmatprep.subr.bf16.mxu0 %v4432_v24  ;;  %1282 = vmatprep.subr.bf16.mxu1 %v4438_v62 }
 0x456   :  { %1271 = vmatprep.mubr.bf16.mxu0 %v5285_v0  ;;  %1312 = vmatprep.mubr.bf16.mxu1 %v5285_v0 }
 0x458   :  { %1242 = vmatpush1.bf16.msra.mxu0 %v4446_v1  ;;  %1283 = vmatpush1.bf16.msra.mxu1 %v4521_v13 }
 0x459   :  { %1243 = vmatprep.subr.bf16.mxu0 %v4527_v15  ;;  %1284 = vmatprep.subr.bf16.mxu1 %v4533_v2 }
 0x45c   :  { %1244 = vmatpush1.bf16.msra.mxu0 %v4539_v55  ;;  %1285 = vmatpush1.bf16.msra.mxu1 %v4545_v58 }
 0x45d   :  { %1245 = vmatprep.subr.bf16.mxu0 %v4551_v19  ;;  %1286 = vmatprep.subr.bf16.mxu1 %v4557_v52 }
 0x460   :  { %1246 = vmatpush1.bf16.msra.mxu0 %v4563_v60  ;;  %1287 = vmatpush1.bf16.msra.mxu1 %v4569_v11 }
 0x461   :  { %1247 = vmatprep.subr.bf16.mxu0 %v4575_v59  ;;  %1288 = vmatprep.subr.bf16.mxu1 %v4581_v57 }
 0x464   :  { %1248 = vmatpush1.bf16.msra.mxu0 %v4587_v9  ;;  %1289 = vmatpush1.bf16.msra.mxu1 %v4593_v16 }
 0x465   :  { %1249 = vmatprep.subr.bf16.mxu0 %v4599_v20  ;;  %1290 = vmatprep.subr.bf16.mxu1 %v4605_v21 }
 0x468   :  { %1250 = vmatpush1.bf16.msra.mxu0 %v4611_v22  ;;  %1291 = vmatpush1.bf16.msra.mxu1 %v4617_v27 }
 0x469   :  { %1251 = vmatprep.subr.bf16.mxu0 %v4623_v29  ;;  %1292 = vmatprep.subr.bf16.mxu1 %v4629_v30 }
 0x46c   :  { %1252 = vmatpush1.bf16.msra.mxu0 %v4635_v31  ;;  %1293 = vmatpush1.bf16.msra.mxu1 %v4641_v32 }
 0x46d   :  { %1253 = vmatprep.subr.bf16.mxu0 %v4647_v33  ;;  %1294 = vmatprep.subr.bf16.mxu1 %v4653_v34 }
 0x470   :  { %1254 = vmatpush1.bf16.msra.mxu0 %v4659_v35  ;;  %1295 = vmatpush1.bf16.msra.mxu1 %v4665_v36 }
 0x471   :  { %1372 = vmatprep.subr.bf16.mxu0 %v4477_v25  ;;  %1413 = vmatprep.subr.bf16.mxu1 %v4483_v26 }
 0x526   :  { %v1140_v12 = vpop.f32.mrb[32].mxu0  ;;  %v1181_v54 = vpop.f32.mrb[32].mxu1 }
 0x527   :  { %v1188_v44 = vadd.f32 %v1140_v12, %v5291_v28  ;;  %v1190_v3 = vadd.f32 %v1181_v54, %v5292_v4  ;;  %v1142_v5 = vpop.f32.mrb[33].mxu0  ;;  %v1183_v6 = vpop.f32.mrb[33].mxu1  ;;  %v4737_v28 = vadd.f32 %v1096_v53, %v1089_v61 }
 0x528   :  { %v1189_v17 = vadd.f32 %v1142_v5, %v5293_v7  ;;  %v1191_v37 = vadd.f32 %v1183_v6, %v5294_v18  ;;  %v1144_v10 = vpop.f32.mrb[34].mxu0  ;;  %v1185_v14 = vpop.f32.mrb[34].mxu1  ;;  %v1232_v18 = vmul.f32 %v4745_v40, %v4691_v51 }
 0x529   :  { %v3023_v38 = vmul.f32 -1.442695, %v1188_v44  ;;  %v1145_v39 = vpop.f32.mrb[35].mxu0  ;;  %v1186_v41 = vpop.f32.mrb[35].mxu1 }
 0x52a   :  { %v3024_v42 = vmul.f32 -1.442695, %v1189_v17  ;;  %v3025_v45 = vmul.f32 -1.442695, %v1191_v37  ;;  %v4743_v17 = vpop.permute.xlu0 %1219  ;;  %v5296_v41 = vld [vmem:[#allocation18_spill] sm:$0xff] }
 0x52b   :  { %3620 = vpow2.f32 %v3023_v38  ;;  %v5295_v38 = vld [vmem:[#allocation17_spill] sm:$0xff] }
 0x52c   :  { %3622 = vpow2.f32 %v3024_v42 }
 0x52d   :  { %3624 = vpow2.f32 %v3025_v45 }
 0x52e   :  { %3626 = vtanh.f32 %v1190_v3 }
 0x535   :  { %v3621_v46 = vpop.eup %3620 }
 0x536   :  { %v3623_v48 = vpop.eup %3622  ;;  %v1195_v56 = vadd.f32 1.0, %v3621_v46 }
 0x537   :  { %v1201_v8 = vadd.f32 1.0, %v3623_v48  ;;  %v3625_v50 = vpop.eup %3624  ;;  %v5297_v48 = vld [vmem:[#allocation19_spill] sm:$0xff] }
 0x538   :  { %3628 = vrcp.f32 %v1195_v56  ;;  %v3627_v12 = vpop.eup %3626  ;;  %v1208_v5 = vadd.f32 1.0, %v3625_v50 }
 0x539   :  { %3630 = vrcp.f32 %v1201_v8  ;;  %v5298_v8 = vld [vmem:[#allocation20_spill] sm:$0xff] }
 0x53a   :  { %3632 = vrcp.f32 %v1208_v5 }
 0x542   :  { %v3629_v54 = vpop.eup %3628 }
 0x543   :  { %v3631_v44 = vpop.eup %3630  ;;  %v1212_v4 = vmul.f32 %v3629_v54, %v3627_v12 }
 0x544   :  { %v1211_v6 = vmul.f32 %v3631_v44, %v4737_v28  ;;  %v3633_v7 = vpop.eup %3632 }
 0x546   :  { %v4740_v3 = vadd.f32 %v1212_v4, %v1211_v6 }
 0x548   :  { %3634 = vtanh.f32 %v4740_v3 }
 0x552   :  { %v3635_v43 = vpop.eup %3634 }
 0x553   :  { %v1215_v49 = vmul.f32 %v3635_v43, %v3633_v7  ;;  %v1222_v43 = vmul.f32 %v4743_v17, %v4740_v3 }
 0x555   :  { %v1231_v47 = vmul.f32 %v4743_v17, %v1215_v49 }
 0x557   :  { %v4750_v37 = vadd.f32 %v1232_v18, %v1231_v47  ;;  %v1229_v47 = vmul.f32 %v4745_v40, %v4737_v28  ;;  %v4804_v28 = vpop.permute.xlu1 %1359 }
 0x559   :  { %v1238_v10 = vpack.c.bf16 %v4750_v37, %v4750_v37 }
 0x55b   :  { %1272 = vmatmul.mubr.bf16.vlgmr.msra.gmra.mrb[36].mxu0 %v1238_v10  ;;  %1313 = vmatmul.mubr.bf16.vlgmr.msra.gmra.mrb[36].mxu1 %v1238_v10 }
 0x55c   :  { %1373 = vmatpush1.bf16.msra.mxu0 %v4420_v23  ;;  %1414 = vmatpush1.bf16.msra.mxu1 %v4426_v63 }
 0x55d   :  { %1374 = vmatprep.subr.bf16.mxu0 %v4432_v24  ;;  %1415 = vmatprep.subr.bf16.mxu1 %v4438_v62 }
 0x55e   :  { %1404 = vmatprep.mubr.bf16.mxu0 %v5285_v0  ;;  %1445 = vmatprep.mubr.bf16.mxu1 %v5285_v0 }
 0x560   :  { %1375 = vmatpush1.bf16.msra.mxu0 %v4446_v1  ;;  %1416 = vmatpush1.bf16.msra.mxu1 %v4521_v13 }
 0x561   :  { %1376 = vmatprep.subr.bf16.mxu0 %v4527_v15  ;;  %1417 = vmatprep.subr.bf16.mxu1 %v4533_v2 }
 0x564   :  { %1377 = vmatpush1.bf16.msra.mxu0 %v4539_v55  ;;  %1418 = vmatpush1.bf16.msra.mxu1 %v4545_v58 }
 0x565   :  { %1378 = vmatprep.subr.bf16.mxu0 %v4551_v19  ;;  %1419 = vmatprep.subr.bf16.mxu1 %v4557_v52 }
 0x568   :  { %1379 = vmatpush1.bf16.msra.mxu0 %v4563_v60  ;;  %1420 = vmatpush1.bf16.msra.mxu1 %v4569_v11 }
 0x569   :  { %1380 = vmatprep.subr.bf16.mxu0 %v4575_v59  ;;  %1421 = vmatprep.subr.bf16.mxu1 %v4581_v57 }
 0x56c   :  { %1381 = vmatpush1.bf16.msra.mxu0 %v4587_v9  ;;  %1422 = vmatpush1.bf16.msra.mxu1 %v4593_v16 }
 0x56d   :  { %1382 = vmatprep.subr.bf16.mxu0 %v4599_v20  ;;  %1423 = vmatprep.subr.bf16.mxu1 %v4605_v21 }
 0x570   :  { %1383 = vmatpush1.bf16.msra.mxu0 %v4611_v22  ;;  %1424 = vmatpush1.bf16.msra.mxu1 %v4617_v27 }
 0x571   :  { %1384 = vmatprep.subr.bf16.mxu0 %v4623_v29  ;;  %1425 = vmatprep.subr.bf16.mxu1 %v4629_v30 }
 0x574   :  { %1385 = vmatpush1.bf16.msra.mxu0 %v4635_v31  ;;  %1426 = vmatpush1.bf16.msra.mxu1 %v4641_v32 }
 0x575   :  { %1386 = vmatprep.subr.bf16.mxu0 %v4647_v33  ;;  %1427 = vmatprep.subr.bf16.mxu1 %v4653_v34 }
 0x578   :  { %1387 = vmatpush1.bf16.msra.mxu0 %v4659_v35  ;;  %1428 = vmatpush1.bf16.msra.mxu1 %v4665_v36 }
 0x579   :  { %1504 = vmatprep.subr.bf16.mxu0 %v4477_v25  ;;  %1545 = vmatprep.subr.bf16.mxu1 %v4483_v26 }
 0x62e   :  { %v1273_v51 = vpop.f32.mrb[36].mxu0  ;;  %v1314_v14 = vpop.f32.mrb[36].mxu1 }
 0x62f   :  { %v1321_v39 = vadd.f32 %v1273_v51, %v5295_v38  ;;  %v1323_v42 = vadd.f32 %v1314_v14, %v5296_v41  ;;  %v1275_v45 = vpop.f32.mrb[37].mxu0  ;;  %v1316_v46 = vpop.f32.mrb[37].mxu1  ;;  %v4796_v51 = vadd.f32 %v1229_v47, %v1222_v43  ;;  %v3506_v47 = vld [vmem:[%s5248_s5 + $0x10] sm:$0xff]  }
 0x630   :  { %v1322_v56 = vadd.f32 %v1275_v45, %v5297_v48  ;;  %v1324_v61 = vadd.f32 %v1316_v46, %v5298_v8  ;;  %v1277_v50 = vpop.f32.mrb[38].mxu0  ;;  %v1318_v53 = vpop.f32.mrb[38].mxu1  ;;  %v1365_v48 = vmul.f32 %v4804_v28, %v4750_v37 }
 0x631   :  { %v3026_v12 = vmul.f32 -1.442695, %v1321_v39  ;;  %v1278_v54 = vpop.f32.mrb[39].mxu0  ;;  %v1319_v44 = vpop.f32.mrb[39].mxu1 }
 0x632   :  { %v3027_v25 = vmul.f32 -1.442695, %v1322_v56  ;;  %v3028_v26 = vmul.f32 -1.442695, %v1324_v61  ;;  %v4802_v46 = vpop.permute.xlu0 %1352 }
 0x633   :  { %3636 = vpow2.f32 %v3026_v12 }
 0x634   :  { %3638 = vpow2.f32 %v3027_v25 }
 0x635   :  { %3640 = vpow2.f32 %v3028_v26 }
 0x636   :  { %3642 = vtanh.f32 %v1323_v42  ;;  %v4862_v26 = vpop.permute.xlu0 %1485 }
 0x63d   :  { %v3637_v4 = vpop.eup %3636 }
 0x63e   :  { %v3639_v5 = vpop.eup %3638  ;;  %v1328_v6 = vadd.f32 1.0, %v3637_v4  ;;  %v4864_v4 = vpop.permute.xlu1 %1492 }
 0x63f   :  { %v1334_v7 = vadd.f32 1.0, %v3639_v5  ;;  %v3641_v49 = vpop.eup %3640 }
 0x640   :  { %3644 = vrcp.f32 %v1328_v6  ;;  %v3643_v18 = vpop.eup %3642  ;;  %v1341_v39 = vadd.f32 1.0, %v3641_v49  ;;  %v3505_v49 = vld [vmem:[%s5248_s5 + $0x8] sm:$0xff]  }
 0x641   :  { %3646 = vrcp.f32 %v1334_v7 }
 0x642   :  { %3648 = vrcp.f32 %v1341_v39 }
 0x64a   :  { %v3645_v10 = vpop.eup %3644 }
 0x64b   :  { %v3647_v14 = vpop.eup %3646  ;;  %v1345_v38 = vmul.f32 %v3645_v10, %v3643_v18  ;;  %v3507_v18 = vld [vmem:[%s5248_s5 + $0x18] sm:$0xff]   ;;  %v1653_v10 = vpop.xlane.xlu0 %1652 }
 0x64c   :  { %v1344_v41 = vmul.f32 %v3647_v14, %v4796_v51  ;;  %v3649_v45 = vpop.eup %3648 }
 0x64e   :  { %v4799_v42 = vadd.f32 %v1345_v38, %v1344_v41  ;;  %v1656_v38 = vpop.xlane.xlu1 %1655  ;;  %v1699_v41 = vadd.f32 1e-08, %v1653_v10 }
 0x650   :  { %3650 = vtanh.f32 %v4799_v42 }
 0x65a   :  { %v3651_v3 = vpop.eup %3650 }
 0x65b   :  { %v1348_v17 = vmul.f32 %v3651_v3, %v3649_v45  ;;  %v1665_v45 = vpop.xlane.xlu1 %1664 }
 0x65d   :  { %v1364_v40 = vmul.f32 %v4802_v46, %v1348_v17  ;;  %v1700_v17 = vadd.f32 1e-08, %v1656_v38 }
 0x65f   :  { %v4809_v56 = vadd.f32 %v1365_v48, %v1364_v40 }
 0x661   :  { %v1371_v8 = vpack.c.bf16 %v4809_v56, %v4809_v56  ;;  %v1498_v6 = vmul.f32 %v4864_v4, %v4809_v56 }
 0x663   :  { %1405 = vmatmul.mubr.bf16.vlgmr.msra.gmra.mrb[40].mxu0 %v1371_v8  ;;  %1446 = vmatmul.mubr.bf16.vlgmr.msra.gmra.mrb[40].mxu1 %v1371_v8 }
 0x664   :  { %1505 = vmatpush1.bf16.msra.mxu0 %v4420_v23  ;;  %1546 = vmatpush1.bf16.msra.mxu1 %v4426_v63  ;;  %v3504_v23 = vld [vmem:[%s5248_s5] sm:$0xff]  }
 0x665   :  { %1506 = vmatprep.subr.bf16.mxu0 %v4432_v24  ;;  %1547 = vmatprep.subr.bf16.mxu1 %v4438_v62  ;;  %v5299_v62 = vld [vmem:[#allocation21_spill] sm:$0xff] }
 0x666   :  { %1536 = vmatprep.mubr.bf16.mxu0 %v5285_v0  ;;  %1577 = vmatprep.mubr.bf16.mxu1 %v5285_v0 }
 0x668   :  { %1507 = vmatpush1.bf16.msra.mxu0 %v4446_v1  ;;  %1548 = vmatpush1.bf16.msra.mxu1 %v4521_v13  ;;  %v5300_v13 = vld [vmem:[#allocation22_spill] sm:$0xff] }
 0x669   :  { %1508 = vmatprep.subr.bf16.mxu0 %v4527_v15  ;;  %1549 = vmatprep.subr.bf16.mxu1 %v4533_v2 }
 0x66c   :  { %1509 = vmatpush1.bf16.msra.mxu0 %v4539_v55  ;;  %1550 = vmatpush1.bf16.msra.mxu1 %v4545_v58  ;;  %v5301_v58 = vld [vmem:[#allocation23_spill] sm:$0xff] }
 0x66d   :  { %1510 = vmatprep.subr.bf16.mxu0 %v4551_v19  ;;  %1551 = vmatprep.subr.bf16.mxu1 %v4557_v52  ;;  %v5302_v52 = vld [vmem:[#allocation24_spill] sm:$0xff] }
 0x670   :  { %1511 = vmatpush1.bf16.msra.mxu0 %v4563_v60  ;;  %1552 = vmatpush1.bf16.msra.mxu1 %v4569_v11 }
 0x671   :  { %1512 = vmatprep.subr.bf16.mxu0 %v4575_v59  ;;  %1553 = vmatprep.subr.bf16.mxu1 %v4581_v57 }
 0x674   :  { %1513 = vmatpush1.bf16.msra.mxu0 %v4587_v9  ;;  %1554 = vmatpush1.bf16.msra.mxu1 %v4593_v16 }
 0x675   :  { %1514 = vmatprep.subr.bf16.mxu0 %v4599_v20  ;;  %1555 = vmatprep.subr.bf16.mxu1 %v4605_v21 }
 0x678   :  { %1515 = vmatpush1.bf16.msra.mxu0 %v4611_v22  ;;  %1556 = vmatpush1.bf16.msra.mxu1 %v4617_v27 }
 0x679   :  { %1516 = vmatprep.subr.bf16.mxu0 %v4623_v29  ;;  %1557 = vmatprep.subr.bf16.mxu1 %v4629_v30 }
 0x67c   :  { %1517 = vmatpush1.bf16.msra.mxu0 %v4635_v31  ;;  %1558 = vmatpush1.bf16.msra.mxu1 %v4641_v32  ;;  %v1355_v31 = vmul.f32 %v4802_v46, %v4799_v42 }
 0x67d   :  { %1518 = vmatprep.subr.bf16.mxu0 %v4647_v33  ;;  %1559 = vmatprep.subr.bf16.mxu1 %v4653_v34  ;;  %v1362_v33 = vmul.f32 %v4804_v28, %v4796_v51  ;;  %v1659_v51 = vpop.xlane.xlu0 %1658  ;;  %v1671_v28 = vpop.xlane.xlu1 %1670 }
 0x67e   :  { %v1701_v42 = vadd.f32 1e-08, %v1659_v51  ;;  %v3509_v51 = vld [vmem:[%s5249_s6 + $0x8] sm:$0xff]  }
 0x680   :  { %1519 = vmatpush1.bf16.msra.mxu0 %v4659_v35  ;;  %1560 = vmatpush1.bf16.msra.mxu1 %v4665_v36  ;;  %v4856_v36 = vadd.f32 %v1362_v33, %v1355_v31 }
 0x681   :  { %3182 = vmatprep.subr.bf16.mxu1 %v3504_v23  ;;  %v1662_v14 = vpop.xlane.xlu0 %1661  ;;  %v1677_v56 = vpop.xlane.xlu1 %1676 }
 0x682   :  { %v1702_v3 = vadd.f32 1e-08, %v1662_v14 }
 0x685   :  { %v1668_v39 = vpop.xlane.xlu0 %1667 }
 0x686   :  { %v1704_v48 = vadd.f32 1e-08, %v1668_v39 }
 0x689   :  { %v1674_v46 = vpop.xlane.xlu0 %1673 }
 0x68d   :  { %v1680_v40 = vpop.xlane.xlu0 %1679 }
 0x736   :  { %v1406_v63 = vpop.f32.mrb[40].mxu0  ;;  %v1447_v24 = vpop.f32.mrb[40].mxu1 }
 0x737   :  { %v1454_v1 = vadd.f32 %v1406_v63, %v5299_v62  ;;  %v1456_v15 = vadd.f32 %v1447_v24, %v5300_v13  ;;  %v1408_v2 = vpop.f32.mrb[41].mxu0  ;;  %v1449_v55 = vpop.f32.mrb[41].mxu1  ;;  %v1703_v24 = vadd.f32 1e-08, %v1665_v45 }
 0x738   :  { %v1455_v19 = vadd.f32 %v1408_v2, %v5301_v58  ;;  %v1457_v60 = vadd.f32 %v1449_v55, %v5302_v52  ;;  %v1410_v11 = vpop.f32.mrb[42].mxu0  ;;  %v1451_v59 = vpop.f32.mrb[42].mxu1  ;;  %v3756_v2 = vld [vmem:[%s5247_s4 + $0x10] sm:$0xff]  ;;  %v3757_v58 = vld [vmem:[%s5247_s4 + $0x18] sm:$0xff] }
 0x739   :  { %v3029_v57 = vmul.f32 -1.442695, %v1454_v1  ;;  %v1411_v9 = vpop.f32.mrb[43].mxu0  ;;  %v1452_v16 = vpop.f32.mrb[43].mxu1  ;;  %v1705_v1 = vadd.f32 1e-08, %v1671_v28 }
 0x73a   :  { %v3030_v20 = vmul.f32 -1.442695, %v1455_v19  ;;  %v3031_v21 = vmul.f32 -1.442695, %v1457_v60  ;;  %v1683_v52 = vpop.xlane.xlu1 %1682  ;;  %v3758_v60 = vld [vmem:[%s5247_s4] sm:$0xff]  ;;  %v3759_v59 = vld [vmem:[%s5247_s4 + $0x8] sm:$0xff] }
 0x73b   :  { %3652 = vpow2.f32 %v3029_v57  ;;  %v1708_v9 = vadd.f32 1e-08, %v1680_v40  ;;  %v3765_v28 = vld [vmem:[%s5247_s4 + $0x48] sm:$0xff] }
 0x73c   :  { %3654 = vpow2.f32 %v3030_v20 }
 0x73d   :  { %3656 = vpow2.f32 %v3031_v21 }
 0x73e   :  { %3658 = vtanh.f32 %v1456_v15  ;;  %v1686_v15 = vpop.xlane.xlu0 %1685 }
 0x73f   :  { %v1710_v16 = vadd.f32 1e-08, %v1686_v15 }
 0x742   :  { %v1692_v21 = vpop.xlane.xlu0 %1691 }
 0x745   :  { %v3653_v22 = vpop.eup %3652 }
 0x746   :  { %v3655_v27 = vpop.eup %3654  ;;  %v1461_v29 = vadd.f32 1.0, %v3653_v22  ;;  %v1707_v22 = vadd.f32 1e-08, %v1677_v56 }
 0x747   :  { %v1467_v30 = vadd.f32 1.0, %v3655_v27  ;;  %v3657_v32 = vpop.eup %3656 }
 0x748   :  { %3660 = vrcp.f32 %v1461_v29  ;;  %v3659_v34 = vpop.eup %3658  ;;  %v1474_v50 = vadd.f32 1.0, %v3657_v32  ;;  %v1709_v29 = vadd.f32 1e-08, %v1683_v52  ;;  %v3769_v52 = vld [vmem:[%s5247_s4 + $0x68] sm:$0xff] }
 0x749   :  { %3662 = vrcp.f32 %v1467_v30  ;;  %v1689_v30 = vpop.xlane.xlu1 %1688 }
 0x74a   :  { %3664 = vrcp.f32 %v1474_v50  ;;  %v3508_v50 = vld [vmem:[%s5249_s6] sm:$0xff]  }
 0x752   :  { %v3661_v35 = vpop.eup %3660 }
 0x753   :  { %v3663_v37 = vpop.eup %3662  ;;  %v1478_v61 = vmul.f32 %v3661_v35, %v3659_v34  ;;  %v1712_v34 = vadd.f32 1e-08, %v1692_v21  ;;  %v1698_v35 = vpop.xlane.xlu0 %1697 }
 0x754   :  { %v1477_v53 = vmul.f32 %v3663_v37, %v4856_v36  ;;  %v3665_v54 = vpop.eup %3664 }
 0x756   :  { %v4859_v12 = vadd.f32 %v1478_v61, %v1477_v53  ;;  %v1714_v61 = vadd.f32 1e-08, %v1698_v35  ;;  %v1711_v53 = vadd.f32 1e-08, %v1689_v30  ;;  %v3515_v30 = vld [vmem:[%s5249_s6 + $0x38] sm:$0xff]   ;;  %v2082_v35 = vld [vmem:[%s5250_s7 + $0x10] sm:$0xff] }
 0x758   :  { %3666 = vtanh.f32 %v4859_v12 }
 0x759   :  { %3668 = vrsqrt.f32 %v1699_v41 }
 0x75a   :  { %3670 = vrsqrt.f32 %v1701_v42 }
 0x75b   :  { %3672 = vrsqrt.f32 %v1702_v3  ;;  %v3510_v3 = vld [vmem:[%s5249_s6 + $0x10] sm:$0xff]  }
 0x75c   :  { %3674 = vrsqrt.f32 %v1700_v17  ;;  %v3764_v17 = vld [vmem:[%s5247_s4 + $0x40] sm:$0xff] }
 0x75d   :  { %3676 = vrsqrt.f32 %v1704_v48  ;;  %v3766_v48 = vld [vmem:[%s5247_s4 + $0x50] sm:$0xff] }
 0x762   :  { %v3667_v44 = vpop.eup %3666 }
 0x763   :  { %v1481_v25 = vmul.f32 %v3667_v44, %v3665_v54  ;;  %v3669_v8 = vpop.eup %3668  ;;  %v1695_v54 = vpop.xlane.xlu1 %1694  ;;  %v3797_v44 = vmov 0.0  }
 0x764   :  { %v3671_v63 = vpop.eup %3670  ;;  %v1731_v11 = vmul.f32 %v3758_v60, %v3669_v8  ;;  %v3767_v8 = vld [vmem:[%s5247_s4 + $0x58] sm:$0xff] }
 0x765   :  { %v1497_v5 = vmul.f32 %v4862_v26, %v1481_v25  ;;  %v3673_v62 = vpop.eup %3672  ;;  %v1733_v55 = vmul.f32 %v3756_v2, %v3671_v63  ;;  %v1713_v25 = vadd.f32 1e-08, %v1695_v54  ;;  %v3511_v63 = vld [vmem:[%s5249_s6 + $0x18] sm:$0xff]  }
 0x766   :  { %v3675_v13 = vpop.eup %3674  ;;  %v1734_v19 = vmul.f32 %v3757_v58, %v3673_v62  ;;  %v3768_v58 = vld [vmem:[%s5247_s4 + $0x60] sm:$0xff] }
 0x767   :  { %v1499_v7 = vadd.f32 %v1498_v6, %v1497_v5  ;;  %v1732_v57 = vmul.f32 %v3759_v59, %v3675_v13  ;;  %v3677_v31 = vpop.eup %3676  ;;  %v3760_v5 = vld [vmem:[%s5247_s4 + $0x20] sm:$0xff] }
 0x768   :  { %v4892_v27 = vpack.c.bf16 %v1734_v19, %v1733_v55  ;;  %v3512_v55 = vld [vmem:[%s5249_s6 + $0x20] sm:$0xff]  }
 0x769   :  { %v1503_v43 = vpack.c.bf16 %v1499_v7, %v1499_v7  ;;  %v4890_v20 = vpack.c.bf16 %v1732_v57, %v1731_v11  ;;  %v3761_v7 = vld [vmem:[%s5247_s4 + $0x28] sm:$0xff]  ;;  %v3770_v11 = vld [vmem:[%s5247_s4 + $0x70] sm:$0xff]  ;;  %v3771_v57 = vld [vmem:[%s5247_s4 + $0x78] sm:$0xff] }
 0x76b   :  { %1537 = vmatmul.mubr.bf16.vlgmr.msra.gmra.mrb[44].mxu0 %v1503_v43  ;;  %1578 = vmatmul.mubr.bf16.vlgmr.msra.gmra.mrb[44].mxu1 %v1503_v43  ;;  %v1736_v43 = vmul.f32 %v3761_v7, %v3677_v31  ;;  %v3799_v31 = vmov 0.0|0.0  }
 0x76c   :  { %3183 = vmatpush3.bf16.msra.mxu1 %v3504_v23  ;;  %v1706_v23 = vadd.f32 1e-08, %v1674_v46  ;;  %3190 = vmatprep.mubr.msk.bf16.mxu1 %vm188_vm0, %v4890_v20 }
 0x76d   :  { %3184 = vmatprep.subr.bf16.mxu1 %v3505_v49 }
 0x76e   :  { %3678 = vrsqrt.f32 %v1706_v23 }
 0x76f   :  { %3680 = vrsqrt.f32 %v1703_v24 }
 0x770   :  { %3185 = vmatpush3.bf16.msra.mxu1 %v3505_v49  ;;  %3682 = vrsqrt.f32 %v1705_v1  ;;  %v3762_v49 = vld [vmem:[%s5247_s4 + $0x30] sm:$0xff] }
 0x771   :  { %3186 = vmatprep.subr.bf16.mxu1 %v3506_v47  ;;  %3684 = vrsqrt.f32 %v1708_v9 }
 0x772   :  { %3686 = vrsqrt.f32 %v1710_v16  ;;  %v3513_v16 = vld [vmem:[%s5249_s6 + $0x28] sm:$0xff]  }
 0x773   :  { %3688 = vrsqrt.f32 %v1707_v22 }
 0x774   :  { %3187 = vmatpush3.bf16.msra.mxu1 %v3506_v47  ;;  %3690 = vrsqrt.f32 %v1709_v29  ;;  %v3514_v29 = vld [vmem:[%s5249_s6 + $0x30] sm:$0xff]  }
 0x775   :  { %3188 = vmatprep.subr.bf16.mxu1 %v3507_v18  ;;  %3692 = vrsqrt.f32 %v1712_v34 }
 0x776   :  { %3694 = vrsqrt.f32 %v1714_v61 }
 0x777   :  { %3696 = vrsqrt.f32 %v1711_v53  ;;  %v2085_v53 = vld [vmem:[%s5250_s7 + $0x28] sm:$0xff] }
 0x778   :  { %3189 = vmatpush3.bf16.msra.mxu1 %v3507_v18  ;;  %v3679_v32 = vpop.eup %3678  ;;  %v3763_v18 = vld [vmem:[%s5247_s4 + $0x38] sm:$0xff]  ;;  %3698 = vrsqrt.f32 %v1713_v25  ;;  %v2086_v25 = vld [vmem:[%s5250_s7 + $0x30] sm:$0xff] }
 0x779   :  { %v3681_v33 = vpop.eup %3680  ;;  %3206 = vmatprep.subr.bf16.mxu1 %v3797_v44  ;;  %v1738_v10 = vmul.f32 %v3763_v18, %v3679_v32  ;;  %v2080_v32 = vld [vmem:[%s5250_s7] sm:$0xff] }
 0x77a   :  { %v3683_v37 = vpop.eup %3682  ;;  %v1735_v6 = vmul.f32 %v3760_v5, %v3681_v33  ;;  %v2081_v33 = vld [vmem:[%s5250_s7 + $0x8] sm:$0xff]  ;;  %v2087_v5 = vld [vmem:[%s5250_s7 + $0x38] sm:$0xff] }
 0x77b   :  { %3191 = vmatmul.mubr.msk.bf16.vlgmr.msra.gmra.mrb[48].mxu1 %vm188_vm0, %v4892_v27  ;;  %v1737_v47 = vmul.f32 %v3762_v49, %v3683_v37  ;;  %v3685_v38 = vpop.eup %3684  ;;  %v3364_v34 = vpack.c.bf16 %v2081_v33, %v2080_v32  ;;  %v2083_v37 = vld [vmem:[%s5250_s7 + $0x18] sm:$0xff]  ;;  %v3376_v7 = vpack.c.bf16 %v2087_v5, %v2086_v25 }
 0x77c   :  { %3207 = vmatpush3.bf16.msra.mxu1 %v3508_v50  ;;  %v4918_v14 = vpack.c.bf16 %v1736_v43, %v1735_v6  ;;  %v3687_v41 = vpop.eup %3686  ;;  %v1740_v40 = vmul.f32 %v3765_v28, %v3685_v38  ;;  %v3368_v61 = vpack.c.bf16 %v2083_v37, %v2082_v35  ;;  %v2084_v50 = vld [vmem:[%s5250_s7 + $0x20] sm:$0xff]  ;;  %v2089_v43 = vld [vmem:[%s5250_s7 + $0x48] sm:$0xff]  ;;  %v2091_v5 = vld [vmem:[%s5250_s7 + $0x58] sm:$0xff] }
 0x77d   :  { %3208 = vmatprep.subr.bf16.mxu1 %v3797_v44  ;;  %v4920_v39 = vpack.c.bf16 %v1738_v10, %v1737_v47  ;;  %v3689_v42 = vpop.eup %3688  ;;  %v1742_v23 = vmul.f32 %v3767_v8, %v3687_v41  ;;  %3365 = vmatprep.subr.bf16.mxu0 %v3364_v34  ;;  %v3372_v54 = vpack.c.bf16 %v2085_v53, %v2084_v50  ;;  %v2088_v6 = vld [vmem:[%s5250_s7 + $0x40] sm:$0xff] }
 0x77e   :  { %3194 = vmatprep.mubr.msk.bf16.mxu1 %vm188_vm0, %v4918_v14  ;;  %v3691_v45 = vpop.eup %3690  ;;  %v1739_v46 = vmul.f32 %v3764_v17, %v3689_v42  ;;  %3367 = vmatpush3.bf16.msra.mxu0 %v3364_v34  ;;  %v3380_v49 = vpack.c.bf16 %v2089_v43, %v2088_v6  ;;  %v5303_v10 = vld [vmem:[#allocation25_spill] sm:$0xff]  ;;  %v5304_v38 = vld [vmem:[#allocation26_spill] sm:$0xff] }
 0x77f   :  { %v1741_v56 = vmul.f32 %v3766_v48, %v3691_v45  ;;  %v3693_v62 = vpop.eup %3692  ;;  %3369 = vmatprep.subr.bf16.mxu0 %v3368_v61  ;;  %v2093_v43 = vld [vmem:[%s5250_s7 + $0x68] sm:$0xff] }
 0x780   :  { %3209 = vmatpush3.bf16.msra.mxu1 %v3509_v51  ;;  %v4946_v24 = vpack.c.bf16 %v1740_v40, %v1739_v46  ;;  %v3695_v13 = vpop.eup %3694  ;;  %v1744_v60 = vmul.f32 %v3769_v52, %v3693_v62 }
 0x781   :  { %3210 = vmatprep.subr.bf16.mxu1 %v3797_v44  ;;  %v4948_v1 = vpack.c.bf16 %v1742_v23, %v1741_v56  ;;  %v3697_v15 = vpop.eup %3696  ;;  %v1746_v9 = vmul.f32 %v3771_v57, %v3695_v13  ;;  %v1615_v57 = vpop.permute.xlu0 %1614 }
 0x782   :  { %v3699_v2 = vpop.eup %3698  ;;  %v1743_v19 = vmul.f32 %v3768_v58, %v3697_v15  ;;  %3371 = vmatpush3.bf16.msra.mxu0 %v3368_v61  ;;  %v1488_v15 = vmul.f32 %v4862_v26, %v4859_v12 }
 0x783   :  { %3195 = vmatmul.mubr.msk.bf16.gmra.mrb[52].mxu1 %vm188_vm0, %v4920_v39  ;;  %v1745_v59 = vmul.f32 %v3770_v11, %v3699_v2  ;;  %3373 = vmatprep.subr.bf16.mxu0 %v3372_v54  ;;  %v1495_v2 = vmul.f32 %v4864_v4, %v4856_v36 }
 0x784   :  { %3211 = vmatpush3.bf16.msra.mxu1 %v3510_v3  ;;  %3198 = vmatprep.mubr.msk.bf16.mxu1 %vm188_vm0, %v4946_v24  ;;  %v4974_v21 = vpack.c.bf16 %v1744_v60, %v1743_v19  ;;  %v5305_v3 = vld [vmem:[#allocation27_spill] sm:$0xff] }
 0x785   :  { %3212 = vmatprep.subr.bf16.mxu1 %v3797_v44  ;;  %v4976_v22 = vpack.c.bf16 %v1746_v9, %v1745_v59  ;;  %v1496_v19 = vadd.f32 %v1495_v2, %v1488_v15  ;;  %v1608_v9 = vpop.permute.xlu1 %1607 }
 0x786   :  { %3375 = vmatpush3.bf16.msra.mxu0 %v3372_v54 }
 0x787   :  { %3377 = vmatprep.subr.bf16.mxu0 %v3376_v7 }
 0x788   :  { %3213 = vmatpush3.bf16.msra.mxu1 %v3511_v63 }
 0x789   :  { %3214 = vmatprep.subr.bf16.mxu1 %v3797_v44 }
 0x78a   :  { %3379 = vmatpush3.bf16.msra.mxu0 %v3376_v7  ;;  %v2092_v7 = vld [vmem:[%s5250_s7 + $0x60] sm:$0xff] }
 0x78b   :  { %3199 = vmatmul.mubr.msk.bf16.gmra.mrb[56].mxu1 %vm188_vm0, %v4948_v1  ;;  %3381 = vmatprep.subr.bf16.mxu0 %v3380_v49 }
 0x78c   :  { %3215 = vmatpush3.bf16.msra.mxu1 %v3512_v55  ;;  %3202 = vmatprep.mubr.msk.bf16.mxu1 %vm188_vm0, %v4974_v21 }
 0x78d   :  { %3216 = vmatprep.subr.bf16.mxu1 %v3797_v44 }
 0x78e   :  { %3383 = vmatpush3.bf16.msra.mxu0 %v3380_v49  ;;  %v3388_v49 = vpack.c.bf16 %v2093_v43, %v2092_v7 }
 0x790   :  { %3217 = vmatpush3.bf16.msra.mxu1 %v3513_v16 }
 0x791   :  { %3218 = vmatprep.subr.bf16.mxu1 %v3797_v44 }
 0x793   :  { %3203 = vmatmul.mubr.msk.bf16.gmra.mrb[60].mxu1 %vm188_vm0, %v4976_v22 }
 0x794   :  { %3222 = vmatprep.mubr.msk.bf16.mxu1 %vm3798_vm1, %v3797_v44  ;;  %3219 = vmatpush3.bf16.msra.mxu1 %v3514_v29  ;;  %v1617_v29 = vmul.f32 %v1615_v57, %v1496_v19 }
 0x795   :  { %3220 = vmatprep.subr.bf16.mxu1 %v3797_v44 }
 0x798   :  { %3221 = vmatpush3.bf16.msra.mxu1 %v3515_v30 }
 0x799   :  { %3396 = vmatprep.subr.bf16.mxu1 %v3799_v31 }
 0x83e   :  { %v1538_v47 = vpop.f32.mrb[44].mxu0  ;;  %v1579_v18 = vpop.f32.mrb[44].mxu1 }
 0x83f   :  { %v1585_v51 = vadd.f32 %v1538_v47, %v5303_v10  ;;  %v1587_v41 = vadd.f32 %v1579_v18, %v5304_v38  ;;  %v1540_v42 = vpop.f32.mrb[45].mxu0  ;;  %v1581_v45 = vpop.f32.mrb[45].mxu1  ;;  %v2094_v47 = vld [vmem:[%s5250_s7 + $0x70] sm:$0xff]  ;;  %v2095_v18 = vld [vmem:[%s5250_s7 + $0x78] sm:$0xff] }
 0x840   :  { %v1586_v17 = vadd.f32 %v1540_v42, %v5305_v3  ;;  %v1542_v46 = vpop.f32.mrb[46].mxu0  ;;  %v1582_v28 = vpop.f32.mrb[46].mxu1  ;;  %v3392_v10 = vpack.c.bf16 %v2095_v18, %v2094_v47  ;;  %v1926_v42 = vld [vmem:[%s5253_s10 + $0x2] ss:$0 sm:$0xff]  ;;  %v5306_v45 = vld [vmem:[#allocation6_spill] sm:$0xff] }
 0x841   :  { %v3032_v40 = vmul.f32 -1.442695, %v1585_v51  ;;  %v1543_v48 = vpop.f32.mrb[47].mxu0  ;;  %v1583_v56 = vpop.f32.mrb[47].mxu1  ;;  %v3800_v51 = vmov 1966171168  }
 0x842   :  { %v3033_v8 = vmul.f32 -1.442695, %v1586_v17  ;;  %v2017_v38 = vunpack.c.l.s4 %v3800_v51 }
 0x843   :  { %3700 = vpow2.f32 %v3032_v40  ;;  %v1763_v40 = vld [vmem:[%s5253_s10 + $0x1] ss:$0 sm:$0xff] }
 0x844   :  { %3702 = vpow2.f32 %v3033_v8 }
 0x845   :  { %3704 = vtanh.f32 %v1587_v41  ;;  %v2018_v41 = vunpack.c.0.s8 %v2017_v38 }
 0x847   :  { %v2021_v3 = vsub.s32 %v2018_v41, %v5306_v45 }
 0x84d   :  { %v3701_v23 = vpop.eup %3700 }
 0x84e   :  { %v3703_v63 = vpop.eup %3702  ;;  %v1591_v62 = vadd.f32 1.0, %v3701_v23  ;;  %v3192_v36 = vpop.f32.mrb[48].mxu1 }
 0x84f   :  { %v1597_v13 = vadd.f32 1.0, %v3703_v63  ;;  %v3705_v55 = vpop.eup %3704  ;;  %v1846_v12 = vpop.f32.mrb[49].mxu1  ;;  %v1855_v23 = vadd.f32 %v3192_v36, %v1763_v40 }
 0x850   :  { %3706 = vrcp.f32 %v1591_v62  ;;  %v3193_v26 = vpop.f32.mrb[50].mxu1 }
 0x851   :  { %3708 = vrcp.f32 %v1597_v13  ;;  %v1849_v4 = vpop.f32.mrb[51].mxu1  ;;  %v1847_v13 = vadd.f32 %v1846_v12, %v1763_v40  ;;  %v1858_v15 = vadd.f32 %v3193_v26, %v1763_v40 }
 0x852   :  { %v1850_v2 = vadd.f32 %v1849_v4, %v1763_v40 }
 0x85a   :  { %v3707_v58 = vpop.eup %3706 }
 0x85b   :  { %v3709_v52 = vpop.eup %3708  ;;  %v1602_v60 = vmul.f32 %v3707_v58, %v3705_v55 }
 0x85c   :  { %v1601_v11 = vmul.f32 %v3709_v52, %v1496_v19 }
 0x85e   :  { %v1603_v59 = vadd.f32 %v1602_v60, %v1601_v11  ;;  %v5307_v60 = vld [vmem:[#allocation7_spill] sm:$0xff] }
 0x860   :  { %v1610_v16 = vmul.f32 %v1608_v9, %v1603_v59 }
 0x862   :  { %v1618_v30 = vadd.f32 %v1617_v29, %v1610_v16 }
 0x864   :  { %v5030_v32 = vpack.c.bf16 %v1618_v30, %v1618_v30 }
 0x866   :  { %3223 = vmatmul.mubr.bf16.vlgmr.msra.gmra.mrb[64].mxu1 %v5030_v32 }
 0x867   :  { %3398 = vmatpush3.bf16.msra.mxu1 %v4890_v20  ;;  %3298 = vmatprep.mubr.msk.f32.mxu1 %vm3798_vm1, %v3797_v44  ;;  %v3196_v20 = vpop.f32.mrb[52].mxu1 }
 0x868   :  { %3399 = vmatprep.subr.bf16.mxu1 %v3799_v31  ;;  %v1862_v33 = vpop.f32.mrb[53].mxu1  ;;  %v1871_v55 = vadd.f32 %v3196_v20, %v1763_v40 }
 0x869   :  { %v3197_v34 = vpop.f32.mrb[54].mxu1  ;;  %v1863_v58 = vadd.f32 %v1862_v33, %v1763_v40 }
 0x86a   :  { %v1865_v35 = vpop.f32.mrb[55].mxu1  ;;  %v1874_v19 = vadd.f32 %v3197_v34, %v1763_v40 }
 0x86b   :  { %3401 = vmatpush3.bf16.msra.mxu1 %v4892_v27  ;;  %v3200_v37 = vpop.f32.mrb[56].mxu1  ;;  %v1866_v59 = vadd.f32 %v1865_v35, %v1763_v40 }
 0x86c   :  { %3402 = vmatprep.subr.bf16.mxu1 %v3799_v31  ;;  %v1878_v27 = vpop.f32.mrb[57].mxu1  ;;  %v1887_v57 = vadd.f32 %v3200_v37, %v1763_v40 }
 0x86d   :  { %v3201_v61 = vpop.f32.mrb[58].mxu1  ;;  %v1879_v9 = vadd.f32 %v1878_v27, %v1763_v40 }
 0x86e   :  { %v1881_v50 = vpop.f32.mrb[59].mxu1  ;;  %v1890_v16 = vadd.f32 %v3201_v61, %v1763_v40 }
 0x86f   :  { %3404 = vmatpush3.bf16.msra.mxu1 %v4918_v14  ;;  %v3204_v53 = vpop.f32.mrb[60].mxu1  ;;  %v1882_v4 = vadd.f32 %v1881_v50, %v1763_v40 }
 0x870   :  { %3405 = vmatprep.subr.bf16.mxu1 %v3799_v31  ;;  %v1894_v14 = vpop.f32.mrb[61].mxu1  ;;  %v1903_v7 = vadd.f32 %v3204_v53, %v1763_v40 }
 0x871   :  { %v3205_v54 = vpop.f32.mrb[62].mxu1  ;;  %v1895_v43 = vadd.f32 %v1894_v14, %v1763_v40 }
 0x872   :  { %v1897_v25 = vpop.f32.mrb[63].mxu1 }
 0x873   :  { %3407 = vmatpush3.bf16.msra.mxu1 %v4920_v39  ;;  %v2090_v39 = vld [vmem:[%s5250_s7 + $0x50] sm:$0xff]  ;;  %v1898_v35 = vadd.f32 %v1897_v25, %v1763_v40 }
 0x874   :  { %3408 = vmatprep.subr.bf16.mxu1 %v3799_v31  ;;  %v3384_v6 = vpack.c.bf16 %v2091_v5, %v2090_v39 }
 0x876   :  { %3385 = vmatprep.subr.bf16.mxu0 %v3384_v6 }
 0x877   :  { %3387 = vmatpush3.bf16.msra.mxu0 %v3384_v6 }
 0x878   :  { %3389 = vmatprep.subr.bf16.mxu0 %v3388_v49 }
 0x87b   :  { %3391 = vmatpush3.bf16.msra.mxu0 %v3388_v49  ;;  %v1906_v49 = vadd.f32 %v3205_v54, %v1763_v40 }
 0x87c   :  { %3393 = vmatprep.subr.bf16.mxu0 %v3392_v10 }
 0x87f   :  { %3395 = vmatpush3.bf16.msra.mxu0 %v3392_v10 }
 0x880   :  { %3320 = vmatprep.subr.bf16.mxu0 %v3797_v44 }
 0x939   :  { %v2009_v17 = vpop.f32.mrb[64].mxu1 }
 0x93a   :  { %v2010_v46 = vadd.f32 %v2009_v17, %v1926_v42  ;;  %v3224_v28 = vpop.f32.mrb[65].mxu1 }
 0x93b   :  { %v2012_v48 = vpop.f32.mrb[66].mxu1 }
 0x93c   :  { %v2022_v56 = vrot.slane %v2010_v46, %v2021_v3  ;;  %v3225_v8 = vpop.f32.mrb[67].mxu1 }
 0x93d   :  { %v2096_v8 = vld [vmem:[%s5253_s10 + $0x3] ss:$0 sm:$0xff] }
 0x93e   :  { %v2023_v63 = vcombine.high %v2022_v56, %v2022_v56  ;;  %v2030_v62 = vrot.slane %v2022_v56, %v2021_v3 }
 0x940   :  { %v2037_v52 = vrot.slane %v2023_v63, %v2021_v3  ;;  %v2041_v11 = vrot.slane %v2030_v62, %v5307_v60 }
 0x942   :  { %v2045_v29 = vrot.slane %v2037_v52, %v5307_v60  ;;  %v2048_v30 = vadd.f32 %v2041_v11, %v1847_v13  ;;  %v2049_v39 = vadd.f32 %v2041_v11, %v1850_v2  ;;  %v2050_v36 = vadd.f32 %v2041_v11, %v1855_v23 }
 0x943   :  { %v2051_v5 = vadd.f32 %v2041_v11, %v1858_v15  ;;  %v2052_v6 = vadd.f32 %v2041_v11, %v1863_v58  ;;  %v2053_v12 = vadd.f32 %v2041_v11, %v1866_v59  ;;  %v2054_v26 = vadd.f32 %v2041_v11, %v1871_v55 }
 0x944   :  { %v2064_v20 = vmax.f32 %v2048_v30, 0.0  ;;  %v2065_v33 = vmax.f32 %v2049_v39, 0.0  ;;  %v2055_v34 = vadd.f32 %v2041_v11, %v1874_v19  ;;  %v2066_v37 = vmax.f32 %v2050_v36, 0.0 }
 0x945   :  { %v2056_v27 = vadd.f32 %v2045_v29, %v1879_v9  ;;  %v2057_v61 = vadd.f32 %v2045_v29, %v1882_v4  ;;  %v2058_v47 = vadd.f32 %v2045_v29, %v1887_v57  ;;  %v2059_v18 = vadd.f32 %v2045_v29, %v1890_v16 }
 0x946   :  { %3258 = vmatprep.mubr.f32.mxu0 %v2064_v20  ;;  %v2060_v10 = vadd.f32 %v2045_v29, %v1895_v43  ;;  %v2061_v51 = vadd.f32 %v2045_v29, %v1898_v35  ;;  %v2062_v38 = vadd.f32 %v2045_v29, %v1903_v7  ;;  %v2063_v41 = vadd.f32 %v2045_v29, %v1906_v49 }
 0x947   :  { %3259 = vmatmul.mubr.f32.vlgmr.msra.gmra.mrb[48].mxu0 %v2065_v33  ;;  %v2067_v50 = vmax.f32 %v2051_v5, 0.0  ;;  %v2068_v42 = vmax.f32 %v2052_v6, 0.0  ;;  %v2069_v53 = vmax.f32 %v2053_v12, 0.0  ;;  %v2070_v14 = vmax.f32 %v2054_v26, 0.0 }
 0x948   :  { %3261 = vmatprep.mubr.f32.mxu0 %v2066_v37  ;;  %v2071_v54 = vmax.f32 %v2055_v34, 0.0  ;;  %v2072_v25 = vmax.f32 %v2056_v27, 0.0  ;;  %v2073_v3 = vmax.f32 %v2057_v61, 0.0  ;;  %v2074_v17 = vmax.f32 %v2058_v47, 0.0 }
 0x949   :  { %v2075_v46 = vmax.f32 %v2059_v18, 0.0  ;;  %v2076_v28 = vmax.f32 %v2060_v10, 0.0  ;;  %v2077_v40 = vmax.f32 %v2061_v51, 0.0  ;;  %v2078_v48 = vmax.f32 %v2062_v38, 0.0 }
 0x94a   :  { %v2079_v56 = vmax.f32 %v2063_v41, 0.0 }
 0x94b   :  { %3262 = vmatmul.mubr.f32.gmra.mrb[50].mxu0 %v2067_v50 }
 0x94c   :  { %3264 = vmatprep.mubr.f32.mxu0 %v2068_v42 }
 0x94f   :  { %3265 = vmatmul.mubr.f32.gmra.mrb[52].mxu0 %v2069_v53 }
 0x950   :  { %3267 = vmatprep.mubr.f32.mxu0 %v2070_v14 }
 0x953   :  { %3268 = vmatmul.mubr.f32.gmra.mrb[54].mxu0 %v2071_v54 }
 0x954   :  { %3270 = vmatprep.mubr.f32.mxu0 %v2072_v25 }
 0x957   :  { %3271 = vmatmul.mubr.f32.gmra.mrb[56].mxu0 %v2073_v3  ;;  %v3524_v3 = vld [vmem:[%s5251_s8] sm:$0xff]  }
 0x958   :  { %3273 = vmatprep.mubr.f32.mxu0 %v2074_v17  ;;  %3321 = vmatpush3.bf16.msra.mxu0 %v3524_v3  ;;  %v2745_v3 = vld [vmem:[%s5253_s10 + $0x4] ss:$0 sm:$0xff] }
 0x959   :  { %3322 = vmatprep.subr.bf16.mxu0 %v3797_v44 }
 0x95b   :  { %3274 = vmatmul.mubr.f32.gmra.mrb[58].mxu0 %v2075_v46 }
 0x95c   :  { %3276 = vmatprep.mubr.f32.mxu0 %v2076_v28 }
 0x95f   :  { %3277 = vmatmul.mubr.f32.gmra.mrb[60].mxu0 %v2077_v40 }
 0x960   :  { %3279 = vmatprep.mubr.f32.mxu0 %v2078_v48 }
 0x963   :  { %3280 = vmatmul.mubr.f32.gmra.mrb[62].mxu0 %v2079_v56 }
 0x964   :  { %3328 = vmatprep.mubr.msk.bf16.mxu0 %vm3798_vm1, %v3797_v44 }
 0xa1a   :  { %v3260_v23 = vpop.f32.mrb[48].mxu0 }
 0xa1b   :  { %v2163_v63 = vpop.f32.mrb[49].mxu0  ;;  %v2169_v2 = vadd.f32 %v3260_v23, %v2096_v8  ;;  %v3522_v23 = vld [vmem:[%s5251_s8 + $0x70] sm:$0xff]  }
 0xa1c   :  { %v2164_v62 = vadd.f32 %v2163_v63, %v2096_v8  ;;  %v3523_v63 = vld [vmem:[%s5251_s8 + $0x78] sm:$0xff]  }
 0xa1e   :  { %v3263_v13 = vpop.f32.mrb[50].mxu0  ;;  %2242 = vxpose.xlu1.b32.start [1/8] (short) (narrow) %v2164_v62, 8  ;;  %v3525_v62 = vld [vmem:[%s5251_s8 + $0x8] sm:$0xff]  }
 0xa1f   :  { %v2173_v15 = vpop.f32.mrb[51].mxu0  ;;  %v2179_v59 = vadd.f32 %v3263_v13, %v2096_v8  ;;  %3323 = vmatpush3.bf16.msra.mxu0 %v3525_v62  ;;  %v3526_v13 = vld [vmem:[%s5251_s8 + $0x10] sm:$0xff]  }
 0xa20   :  { %v2174_v19 = vadd.f32 %v2173_v15, %v2096_v8  ;;  %3324 = vmatprep.subr.bf16.mxu0 %v3797_v44  ;;  %v3527_v15 = vld [vmem:[%s5251_s8 + $0x18] sm:$0xff]  }
 0xa22   :  { %v3266_v55 = vpop.f32.mrb[52].mxu0  ;;  %2243 = vxpose.xlu1.b32.cont [2/8] (short) (narrow) %v2169_v2, 8 }
 0xa23   :  { %v2183_v58 = vpop.f32.mrb[53].mxu0  ;;  %v2189_v36 = vadd.f32 %v3266_v55, %v2096_v8  ;;  %3325 = vmatpush3.bf16.msra.mxu0 %v3526_v13 }
 0xa24   :  { %v2184_v16 = vadd.f32 %v2183_v58, %v2096_v8  ;;  %3326 = vmatprep.subr.bf16.mxu0 %v3797_v44 }
 0xa26   :  { %v3269_v52 = vpop.f32.mrb[54].mxu0  ;;  %2244 = vxpose.xlu1.b32.cont [3/8] (short) (narrow) %v2174_v19, 8 }
 0xa27   :  { %v2193_v11 = vpop.f32.mrb[55].mxu0  ;;  %v2199_v34 = vadd.f32 %v3269_v52, %v2096_v8  ;;  %3327 = vmatpush3.bf16.msra.mxu0 %v3527_v15 }
 0xa28   :  { %v2194_v26 = vadd.f32 %v2193_v11, %v2096_v8  ;;  %3352 = vmatprep.subr.bf16.mxu0 %v3797_v44 }
 0xa2a   :  { %v3272_v57 = vpop.f32.mrb[56].mxu0  ;;  %2245 = vxpose.xlu1.b32.cont [4/8] (short) (narrow) %v2179_v59, 8 }
 0xa2b   :  { %v2203_v9 = vpop.f32.mrb[57].mxu0  ;;  %v2209_v5 = vadd.f32 %v3272_v57, %v2096_v8 }
 0xa2c   :  { %v2204_v29 = vadd.f32 %v2203_v9, %v2096_v8 }
 0xa2e   :  { %v3275_v30 = vpop.f32.mrb[58].mxu0  ;;  %2274 = vxpose.xlu0.b32.start [1/8] (short) (narrow) %v2204_v29, 8  ;;  %2246 = vxpose.xlu1.b32.cont [5/8] (short) (narrow) %v2184_v16, 8 }
 0xa2f   :  { %v2213_v39 = vpop.f32.mrb[59].mxu0  ;;  %v2219_v7 = vadd.f32 %v3275_v30, %v2096_v8  ;;  %v3528_v30 = vld [vmem:[%s5251_s8 + $0x20] sm:$0xff]  }
 0xa30   :  { %v2214_v4 = vadd.f32 %v2213_v39, %v2096_v8 }
 0xa32   :  { %v3278_v6 = vpop.f32.mrb[60].mxu0  ;;  %2275 = vxpose.xlu0.b32.cont [2/8] (short) (narrow) %v2209_v5, 8  ;;  %2247 = vxpose.xlu1.b32.cont [6/8] (short) (narrow) %v2189_v36, 8  ;;  %v3529_v36 = vld [vmem:[%s5251_s8 + $0x28] sm:$0xff]   ;;  %v3530_v5 = vld [vmem:[%s5251_s8 + $0x30] sm:$0xff]  }
 0xa33   :  { %v2223_v12 = vpop.f32.mrb[61].mxu0  ;;  %v2229_v49 = vadd.f32 %v3278_v6, %v2096_v8  ;;  %v3531_v6 = vld [vmem:[%s5251_s8 + $0x38] sm:$0xff]  }
 0xa34   :  { %v2224_v43 = vadd.f32 %v2223_v12, %v2096_v8  ;;  %v3534_v12 = vld [vmem:[%s5252_s9 + $0x4] ss:$8 sps:$4 sm:$0xff]  }
 0xa36   :  { %v3281_v20 = vpop.f32.mrb[62].mxu0  ;;  %2276 = vxpose.xlu0.b32.cont [3/8] (short) (narrow) %v2214_v4, 8  ;;  %2248 = vxpose.xlu1.b32.cont [7/8] (short) (narrow) %v2194_v26, 8  ;;  %v3532_v26 = vld [vmem:[%s5252_s9] ss:$8 sps:$4 sm:$0xff]  }
 0xa37   :  { %v2233_v33 = vpop.f32.mrb[63].mxu0  ;;  %v2239_v37 = vadd.f32 %v3281_v20, %v2096_v8  ;;  %v3537_v20 = vld [vmem:[%s5252_s9 + $0x14] ss:$8 sps:$4 sm:$0xff]  }
 0xa38   :  { %v2234_v35 = vadd.f32 %v2233_v33, %v2096_v8  ;;  %v3521_v8 = vld [vmem:[%s5251_s8 + $0x68] sm:$0xff]  }
 0xa3a   :  { %2277 = vxpose.xlu0.b32.cont [4/8] (short) (narrow) %v2219_v7, 8  ;;  %2249 = vxpose.xlu1.b32.end [8/8] (short) (narrow) %v2199_v34, 8 }
 0xa3e   :  { %2278 = vxpose.xlu0.b32.cont [5/8] (short) (narrow) %v2224_v43, 8 }
 0xa42   :  { %2279 = vxpose.xlu0.b32.cont [6/8] (short) (narrow) %v2229_v49, 8  ;;  %v3538_v49 = vld [vmem:[%s5252_s9 + $0x20] ss:$8 sps:$4 sm:$0xff]  }
 0xa46   :  { %2280 = vxpose.xlu0.b32.cont [7/8] (short) (narrow) %v2234_v35, 8  ;;  %v3540_v35 = vld [vmem:[%s5252_s9 + $0x24] ss:$8 sps:$4 sm:$0xff]  }
 0xa4a   :  { %2281 = vxpose.xlu0.b32.end [8/8] (short) (narrow) %v2239_v37, 8  ;;  %v3543_v37 = vld [vmem:[%s5252_s9 + $0x34] ss:$8 sps:$4 sm:$0xff]  }
 0xa9e   :  { %v2258_v27 = vpop.trf.xlu1 }
 0xa9f   :  { %v2307_v61 = vsel %vm2306_vm2, %v2258_v27, -inf }
 0xaa0   :  { %2308 = vmax.xlane.f32.xlu0 %v2307_v61  ;;  %v3544_v61 = vld [vmem:[%s5252_s9 + $0x40] ss:$8 sps:$4 sm:$0xff]  }
 0xaae   :  { %v2290_v47 = vpop.trf.xlu0 }
 0xaaf   :  { %v2310_v18 = vsel %vm2306_vm2, %v2290_v47, -inf }
 0xab0   :  { %2311 = vmax.xlane.f32.xlu1 %v2310_v18  ;;  %v3547_v18 = vld [vmem:[%s5252_s9 + $0x50] ss:$8 sps:$4 sm:$0xff]  }
 0xb2d   :  { %v2309_v10 = vpop.xlane.xlu0 %2308 }
 0xb2e   :  { %v2313_v51 = vsub.f32 %v2258_v27, %v2309_v10  ;;  %v3546_v27 = vld [vmem:[%s5252_s9 + $0x44] ss:$8 sps:$4 sm:$0xff]  }
 0xb2f   :  { %v3552_v10 = vld [vmem:[%s5252_s9 + $0x64] ss:$8 sps:$4 sm:$0xff]  }
 0xb30   :  { %v2315_v38 = vmul.f32 1.442695, %v2313_v51  ;;  %v3550_v51 = vld [vmem:[%s5252_s9 + $0x60] ss:$8 sps:$4 sm:$0xff]  }
 0xb32   :  { %3710 = vpow2.f32 %v2315_v38  ;;  %v3555_v38 = vld [vmem:[%s5252_s9 + $0x74] ss:$8 sps:$4 sm:$0xff]  }
 0xb3c   :  { %v3711_v41 = vpop.eup %3710 }
 0xb3d   :  { %v2312_v50 = vpop.xlane.xlu1 %2311  ;;  %v2319_v42 = vsel %vm2306_vm2, %v3711_v41, 0.0 }
 0xb3e   :  { %v2314_v53 = vsub.f32 %v2290_v47, %v2312_v50  ;;  %2320 = vadd.xlane.f32.xlu1 %v2319_v42  ;;  %v3549_v47 = vld [vmem:[%s5252_s9 + $0x54] ss:$8 sps:$4 sm:$0xff]  }
 0xb40   :  { %v2317_v14 = vmul.f32 1.442695, %v2314_v53 }
 0xb42   :  { %3712 = vpow2.f32 %v2317_v14 }
 0xb4c   :  { %v3713_v54 = vpop.eup %3712 }
 0xb4d   :  { %v2322_v25 = vsel %vm2306_vm2, %v3713_v54, 0.0 }
 0xb4e   :  { %2323 = vadd.xlane.f32.xlu0 %v2322_v25 }
 0xbcb   :  { %v2321_v17 = vpop.xlane.xlu1 %2320 }
 0xbcc   :  { %3714 = vrcp.f32 %v2321_v17 }
 0xbd6   :  { %v3715_v46 = vpop.eup %3714 }
 0xbd7   :  { %v2326_v28 = vmul.f32 %v3715_v46, %v3711_v41  ;;  %v3553_v41 = vld [vmem:[%s5252_s9 + $0x70] ss:$8 sps:$4 sm:$0xff]  }
 0xbd9   :  { %2329 = vst.msk [vmem:[%s5255_s12] sm:$0x3] %vm2306_vm2, %v2326_v28  ;;  %3299 = vmatmul.mubr.msk.f32.vlgmr.msra.gmra.mrb[68].mxu1 %vm188_vm0, %v2326_v28 }
 0xbda   :  { %3410 = vmatpush3.bf16.msra.mxu1 %v4946_v24  ;;  %3317 = vmatprep.mubr.msk.f32.mxu1 %vm3798_vm1, %v3797_v44  ;;  %v3516_v24 = vld [vmem:[%s5251_s8 + $0x40] sm:$0xff]  }
 0xbdb   :  { %v2324_v40 = vpop.xlane.xlu0 %2323  ;;  %3411 = vmatprep.subr.bf16.mxu1 %v3799_v31 }
 0xbdc   :  { %3716 = vrcp.f32 %v2324_v40 }
 0xbde   :  { %3413 = vmatpush3.bf16.msra.mxu1 %v4948_v1  ;;  %v3517_v1 = vld [vmem:[%s5251_s8 + $0x48] sm:$0xff]  }
 0xbdf   :  { %3414 = vmatprep.subr.bf16.mxu1 %v3799_v31 }
 0xbe2   :  { %3416 = vmatpush3.bf16.msra.mxu1 %v4974_v21  ;;  %v3518_v21 = vld [vmem:[%s5251_s8 + $0x50] sm:$0xff]  }
 0xbe3   :  { %3417 = vmatprep.subr.bf16.mxu1 %v3799_v31  ;;  %v3520_v31 = vld [vmem:[%s5251_s8 + $0x60] sm:$0xff]  }
 0xbe6   :  { %v3717_v48 = vpop.eup %3716  ;;  %3419 = vmatpush3.bf16.msra.mxu1 %v4976_v22  ;;  %v3519_v22 = vld [vmem:[%s5251_s8 + $0x58] sm:$0xff]  }
 0xbe7   :  { %v2328_v56 = vmul.f32 %v3717_v48, %v3713_v54  ;;  %3332 = vmatprep.subr.bf16.mxu1 %v3797_v44 }
 0xbe9   :  { %2330 = vst.msk [vmem:[%s5255_s12 + $0x2] sm:$0x3] %vm2306_vm2, %v2328_v56  ;;  %3318 = vmatmul.mubr.msk.f32.vlgmr.msra.gmra.mrb[70].mxu1 %vm188_vm0, %v2328_v56 }
 0xbea   :  { %3333 = vmatpush3.bf16.msra.mxu1 %v3516_v24  ;;  %3348 = vmatprep.mubr.msk.bf16.mxu1 %vm3798_vm1, %v3797_v44 }
 0xbeb   :  { %3334 = vmatprep.subr.bf16.mxu1 %v3797_v44 }
 0xbee   :  { %3335 = vmatpush3.bf16.msra.mxu1 %v3517_v1  ;;  %v3074_v1 = vld [vmem:[%s5253_s10 + $0x5] ss:$8 sm:$0x3]  ;;  %s3801_s10 = smov [#allocation3]  }
 0xbef   :  { %3336 = vmatprep.subr.bf16.mxu1 %v3797_v44  ;;  %s2939_s28 = sshll.u32 %s3801_s10, 4  ;;  %s2940_s28 = int_to_ptr.vmem [resolvable:$true] %s2939_s28 }
 0xbf0   :  { %s3772_s29 = scalar_lea.vmem %s2940_s28, 64  ;;  %p3777_p1 = scmp.lt.s32.totalorder %s2940_s28, %s2940_s28 }
 0xbf1   :  { %p3773_p0 = scmp.ne.s32.totalorder %s2940_s28, %s3772_s29  ;;  %p3778_p2 = scmp.lt.s32.totalorder %s3772_s29, %s3772_s29 }
 0xbf2   :  { %3337 = vmatpush3.bf16.msra.mxu1 %v3518_v21  ;;  %v2771_v21 = vrot.slane %v3074_v1, %v5307_v60 }
 0xbf3   :  { %3338 = vmatprep.subr.bf16.mxu1 %v3797_v44  ;;  %p3779_p3 = por %p3778_p2, %p3777_p1 }
 0xbf5   :  { %p3780_p4 = pnand %p3779_p3, %p3773_p0 }
 0xbf6   :  { %3339 = vmatpush3.bf16.msra.mxu1 %v3519_v22  ;;  %v5308_v22 = vsub.s32 1, %v5306_v45 }
 0xbf7   :  { %3340 = vmatprep.subr.bf16.mxu1 %v3797_v44 }
 0xbfa   :  { %3341 = vmatpush3.bf16.msra.mxu1 %v3520_v31  ;;  %v2775_v31 = vrot.slane %v3074_v1, %v5308_v22 }
 0xbfb   :  { %3342 = vmatprep.subr.bf16.mxu1 %v3797_v44 }
 0xbfe   :  { %3343 = vmatpush3.bf16.msra.mxu1 %v3521_v8 }
 0xbff   :  { %3344 = vmatprep.subr.bf16.mxu1 %v3797_v44 }
 0xc02   :  { %3345 = vmatpush3.bf16.msra.mxu1 %v3522_v23 }
 0xc03   :  { %3346 = vmatprep.subr.bf16.mxu1 %v3797_v44 }
 0xc06   :  { %3347 = vmatpush3.bf16.msra.mxu1 %v3523_v63 }
 0xc09   :  { %3349 = vmatmul.mubr.bf16.vlgmr.msra.gmra.mrb[72].mxu1 %v5030_v32 }
 0xcac   :  { %v2400_v32 = vpop.f32.mrb[68].mxu1 }
 0xcad   :  { %v3300_v2 = vpop.f32.mrb[69].mxu1  ;;  %v2493_v55 = vpack.c.bf16 %v2400_v32, %v2400_v32 }
 0xcaf   :  { %v2505_v58 = vunpack.c.l.b16 %v2493_v55 }
 0xcb1   :  { %v2674_v59 = vrot.slane %v2505_v58, 1 }
 0xcbc   :  { %v2473_v19 = vpop.f32.mrb[70].mxu1 }
 0xcbd   :  { %v2494_v52 = vpack.c.bf16 %v2473_v19, %v2473_v19  ;;  %v3319_v11 = vpop.f32.mrb[71].mxu1 }
 0xcbf   :  { %v2506_v57 = vunpack.c.l.b16 %v2494_v52 }
 0xcc1   :  { %v2507_v9 = vrot.slane %v2506_v57, 7  ;;  %v2675_v16 = vsel %vm2508_vm3, %v2506_v57, %v2674_v59 }
 0xcc2   :  { %v2676_v4 = vpack.c.b16 %v2675_v16, %v2675_v16 }
 0xcc3   :  { %v2509_v29 = vsel %vm2508_vm3, %v2507_v9, %v2505_v58 }
 0xcc4   :  { %v2510_v39 = vpack.c.b16 %v2509_v29, %v2509_v29 }
 0xcc6   :  { %3329 = vmatmul.mubr.msk.bf16.vlgmr.msra.gmra.mrb[64].mxu0 %vm188_vm0, %v2510_v39 }
 0xcc7   :  { %3353 = vmatpush3.bf16.msra.mxu0 %v3528_v30  ;;  %3360 = vmatprep.mubr.msk.bf16.mxu0 %vm3798_vm1, %v3797_v44 }
 0xcc8   :  { %3354 = vmatprep.subr.bf16.mxu0 %v3797_v44 }
 0xccb   :  { %3355 = vmatpush3.bf16.msra.mxu0 %v3529_v36 }
 0xccc   :  { %3356 = vmatprep.subr.bf16.mxu0 %v3797_v44 }
 0xccf   :  { %3357 = vmatpush3.bf16.msra.mxu0 %v3530_v5 }
 0xcd0   :  { %3358 = vmatprep.subr.bf16.mxu0 %v3797_v44  ;;  %v3535_v44 = vld [vmem:[%s5252_s9 + $0x10] ss:$8 sps:$4 sm:$0xff]  }
 0xcd3   :  { %3359 = vmatpush3.bf16.msra.mxu0 %v3531_v6 }
 0xcd4   :  { %2858 = vmatprep.subr.bf16.mxu0 %v3534_v12 }
 0xcd6   :  { %3361 = vmatmul.mubr.msk.bf16.vlgmr.msra.gmra.mrb[68].mxu0 %vm188_vm0, %v2676_v4 }
 0xcd7   :  { %2859 = vmatpush1.bf16.msra.mxu0 %v3532_v26  ;;  %2890 = vmatprep.mubr.bf16.mxu0 %v5285_v0  ;;  %v3541_v0 = vld [vmem:[%s5252_s9 + $0x30] ss:$8 sps:$4 sm:$0xff]  }
 0xcd8   :  { %2860 = vmatprep.subr.bf16.mxu0 %v3537_v20 }
 0xcdb   :  { %2861 = vmatpush1.bf16.msra.mxu0 %v3535_v44 }
 0xcdc   :  { %v2660_v33 = vpop.f32.mrb[72].mxu1  ;;  %2862 = vmatprep.subr.bf16.mxu0 %v3540_v35 }
 0xcdd   :  { %v3350_v34 = vpop.f32.mrb[73].mxu1 }
 0xcde   :  { %v2663_v7 = vpop.f32.mrb[74].mxu1 }
 0xcdf   :  { %v3351_v43 = vpop.f32.mrb[75].mxu1  ;;  %2863 = vmatpush1.bf16.msra.mxu0 %v3538_v49 }
 0xce0   :  { %2864 = vmatprep.subr.bf16.mxu0 %v3543_v37 }
 0xce3   :  { %2865 = vmatpush1.bf16.msra.mxu0 %v3541_v0 }
 0xce4   :  { %2866 = vmatprep.subr.bf16.mxu0 %v3546_v27 }
 0xce7   :  { %2867 = vmatpush1.bf16.msra.mxu0 %v3544_v61 }
 0xce8   :  { %2868 = vmatprep.subr.bf16.mxu0 %v3549_v47 }
 0xceb   :  { %2869 = vmatpush1.bf16.msra.mxu0 %v3547_v18 }
 0xcec   :  { %2870 = vmatprep.subr.bf16.mxu0 %v3552_v10 }
 0xcef   :  { %2871 = vmatpush1.bf16.msra.mxu0 %v3550_v51 }
 0xcf0   :  { %2872 = vmatprep.subr.bf16.mxu0 %v3555_v38 }
 0xcf3   :  { %2873 = vmatpush1.bf16.msra.mxu0 %v3553_v41 }
 0xd99   :  { %v2572_v50 = vpop.f32.mrb[64].mxu0 }
 0xd9a   :  { %v2661_v42 = vadd.f32 %v2660_v33, %v2572_v50  ;;  %v3330_v53 = vpop.f32.mrb[65].mxu0 }
 0xd9b   :  { %v2575_v14 = vpop.f32.mrb[66].mxu0 }
 0xd9c   :  { %v3331_v54 = vpop.f32.mrb[67].mxu0 }
 0xda9   :  { %v2738_v25 = vpop.f32.mrb[68].mxu0 }
 0xdaa   :  { %v2744_v17 = vadd.f32 %v2738_v25, %v2661_v42  ;;  %v3362_v46 = vpop.f32.mrb[69].mxu0 }
 0xdab   :  { %v2741_v28 = vpop.f32.mrb[70].mxu0 }
 0xdac   :  { %v2746_v40 = vadd.f32 %v2745_v3, %v2744_v17  ;;  %v3363_v48 = vpop.f32.mrb[71].mxu0 }
 0xdae   :  { %v2747_v24 = vmax.f32 %v2746_v40, 0.0 }
 0xdb0   :  { %v2748_v56 = vpack.c.bf16 %v2747_v24, %v2747_v24 }
 0xdb2   :  { %2891 = vmatmul.mubr.bf16.vlgmr.msra.gmra.mrb[72].mxu0 %v2748_v56 }
 0xe85   :  { %v2892_v8 = vpop.f32.mrb[72].mxu0 }
 0xe86   :  { %v2893_v23 = vadd.f32 %v2892_v8, %v2771_v21  ;;  %v2894_v63 = vpop.f32.mrb[73].mxu0 }
 0xe87   :  { %v2895_v62 = vadd.f32 %v2894_v63, %v2775_v31  ;;  %v2896_v13 = vpop.f32.mrb[74].mxu0 }
 0xe88   :  { %v2897_v15 = vpop.f32.mrb[75].mxu0  ;;  %v2900_v32 = vsel %vm2899_vm4, %v2893_v23, -inf }
 0xe89   :  { %v2901_v2 = vsel %vm2899_vm4, %v2895_v62, -inf }
 0xe8a   :  { %v2902_v55 = vmax.f32 %v2900_v32, %v2901_v2 }
 0xe8c   :  { %2903 = vmax.xlane.f32.xlu1 %v2902_v55 }
 0xf19   :  { %v2904_v58 = vpop.xlane.xlu1 %2903 }
 0xf1a   :  { %v2905_v19 = vsub.f32 %v2893_v23, %v2904_v58  ;;  %v2906_v52 = vsub.f32 %v2895_v62, %v2904_v58 }
 0xf1c   :  { %v2907_v60 = vmul.f32 1.442695, %v2905_v19  ;;  %v2909_v11 = vmul.f32 1.442695, %v2906_v52 }
 0xf1e   :  { %3718 = vpow2.f32 %v2907_v60 }
 0xf1f   :  { %3720 = vpow2.f32 %v2909_v11 }
 0xf28   :  { %v3719_v45 = vpop.eup %3718 }
 0xf29   :  { %v3721_v59 = vpop.eup %3720  ;;  %v2911_v57 = vsel %vm2899_vm4, %v3719_v45, 0.0 }
 0xf2a   :  { %v2912_v9 = vsel %vm2899_vm4, %v3721_v59, 0.0 }
 0xf2b   :  { %v2913_v16 = vadd.f32 %v2912_v9, %v2911_v57 }
 0xf2d   :  { %2914 = vadd.xlane.f32.xlu0 %v2913_v16 }
 0xfba   :  { %v2915_v29 = vpop.xlane.xlu0 %2914 }
 0xfbb   :  { %3722 = vlog2.f32 %v2915_v29 }
 0xfc5   :  { %v3723_v30 = vpop.eup %3722 }
 0xfc6   :  { %v2917_v39 = vmul.f32 0.6931472, %v3723_v30 }
 0xfc8   :  { %v2918_v36 = vadd.f32 %v2917_v39, %v2904_v58 }
 0xfca   :  { %v2919_v5 = vsub.f32 %v2893_v23, %v2918_v36  ;;  %v2920_v6 = vsub.f32 %v2895_v62, %v2918_v36 }
 0xfcc   :  { %v2923_v12 = vcombine.low %v2919_v5, %v2920_v6 }
 0xfce   :  { %3091 = vst.sshfl [vmem:[#allocation3] sm:$0x33 pattern:$0x76325410] %v2923_v12 }
 0xfcf   :  { %3783 = shalt.err (!%p3780_p4)
}
 0xfd0   :  { %s3784_s13 = scalar_lea.hbm %s5254_s11, 64 }
 0xfd1   :  { %p3785_p5 = scmp.ne.s32.totalorder %s5254_s11, %s3784_s13  ;;  %p3788_p6 = scmp.lt.u32.totalorder %s3784_s13, %s5254_s11 }
 0xfd3   :  { %p3790_p7 = pnand %p3788_p6, %p3785_p5 }
 0xfd5   :  { %3793 = shalt.err (!%p3790_p7)
}
 0xfd6   :  { %2942 = dma.vmem_to_hbm [thread:$0]  %s2940_s28, 64, %s5254_s11, [#allocation4]  }
 0xfd7   :  { %3794 = dma.done.wait [#allocation4], 64  }
 0xfd8   :  { %3795 = vsyncadd [#allocation4], 4294967232 }
 0xfd9   :  { %2950 = vsyncpa [#allocation4], 1 }

</bundles_post_ra>
